<compile_context>
chip_gen: v7x
topology: tpu7x:2x2x1
jax: 0.10.0
libtpu: 0.0.40
codegen_flags: <defaults>
</compile_context>

<pallas_src>
import jax
import jax.numpy as jnp
from jax import lax
from jax.experimental import pallas as pl
from jax.experimental.pallas import tpu as pltpu

EPS = 1e-5


# ---------------------------------------------------------------------------
# In-kernel helpers
# ---------------------------------------------------------------------------
def _zero_border(pad_ref, H, W):
    """Zero only the 1-px halo ring of a (H+2, W+2, C) VMEM buffer."""
    C = pad_ref.shape[-1]
    z_row = jnp.zeros((1, W + 2, C), pad_ref.dtype)
    z_col = jnp.zeros((H, 1, C), pad_ref.dtype)
    pad_ref[0:1, :, :] = z_row
    pad_ref[H + 1:H + 2, :, :] = z_row
    pad_ref[1:H + 1, 0:1, :] = z_col
    pad_ref[1:H + 1, W + 1:W + 2, :] = z_col


def _pack_taps(pat_ref, src_ref, H, W, C, k, oh, ow, lane_off):
    """Copy the k*k shifted taps of the padded (H+2, W+2, C) buffer `src_ref`
    (window origin (oh, ow)) into `pat_ref` lanes [lane_off, lane_off+k*k*C)."""
    for i in range(k):
        for j in range(k):
            t = lane_off + (i * k + j) * C
            pat_ref[:, :, t:t + C] = src_ref[oh + i:oh + i + H,
                                             ow + j:ow + j + W, :].astype(pat_ref.dtype)


# ---------------------------------------------------------------------------
# Fused kernels (one per stride flavour)
# ---------------------------------------------------------------------------
def _make_stride1_kernel(H, W, C):
    HW = H * W
    K = 9 * C

    def kernel(x_ref, w2_ref, s2_ref, h2_ref, w1_ref, h1_ref,
               o_ref, xpad, mpad, pat):
        _zero_border(xpad, H, W)
        _zero_border(mpad, H, W)

        x = x_ref[0]                                            # (H, W, C)
        xpad[1:H + 1, 1:W + 1, :] = x.astype(xpad.dtype)

        # mid = bn2(relu(conv2(x)))  -- one K=9C MXU matmul; keep the BN2
        # scale multiply in-kernel (relu between conv2 and bn2).
        _pack_taps(pat, xpad, H, W, C, 3, 0, 0, 0)
        p = pat[:, :, 0:K].reshape(HW, K)
        mid = jnp.dot(p, w2_ref[...], preferred_element_type=jnp.float32)
        mid = jnp.maximum(mid, 0.0) * s2_ref[...] + h2_ref[...]

        # out = relu(conv1_scaled(mid) + shift1 + x)   (bn1 scale folded in w1)
        mpad[1:H + 1, 1:W + 1, :] = mid.reshape(H, W, C).astype(mpad.dtype)
        _pack_taps(pat, mpad, H, W, C, 3, 0, 0, 0)
        p = pat[:, :, 0:K].reshape(HW, K)
        y = jnp.dot(p, w1_ref[...], preferred_element_type=jnp.float32)
        y = y + h1_ref[...] + x.astype(jnp.float32).reshape(HW, C)
        o_ref[0] = jnp.maximum(y, 0.0).astype(o_ref.dtype)

    return kernel


def _make_stride2_kernel(H, W, C):
    HW = H * W
    K2 = 9 * C
    KP = 8 * C      # merged main(4C) + shortcut(4C) parity slab

    def kernel(x_ref, w2_ref, s2_ref, h2_ref, wm_ref, hm_ref,
               o_ref, xpad, mpad, pat):
        _zero_border(xpad, H, W)
        _zero_border(mpad, H, W)

        xpad[1:H + 1, 1:W + 1, :] = x_ref[0].astype(xpad.dtype)

        # mid = bn2(relu(conv2(x))) at base resolution
        _pack_taps(pat, xpad, H, W, C, 3, 0, 0, 0)
        p = pat[:, :, 0:K2].reshape(HW, K2)
        mid = jnp.dot(p, w2_ref[...], preferred_element_type=jnp.float32)
        mid = jnp.maximum(mid, 0.0) * s2_ref[...] + h2_ref[...]
        mpad[1:H + 1, 1:W + 1, :] = mid.reshape(H, W, C).astype(mpad.dtype)

        # nearest-2x upsample + 3x3 conv (main AND shortcut), decomposed into
        # 4 output parities; per parity, main and shortcut are concatenated
        # along K into ONE (HW, 8C) x (8C, Co) matmul (BN scales already
        # folded into the weights) plus a single combined shift.
        outs = []
        for pa in range(2):
            for pb in range(2):
                q = pa * 2 + pb
                _pack_taps(pat, mpad, H, W, C, 2, pa, pb, 0)
                _pack_taps(pat, xpad, H, W, C, 2, pa, pb, 4 * C)
                slab = pat[:, :, 0:KP].reshape(HW, KP)
                y = jnp.dot(slab, wm_ref[q], preferred_element_type=jnp.float32)
                outs.append(jnp.maximum(y + hm_ref[...], 0.0))
        # one lane-dense store: parities packed on the lane axis
        o_ref[0] = jnp.concatenate(outs, axis=-1).astype(o_ref.dtype)

    return kernel


# ---------------------------------------------------------------------------
# Host-side parameter preparation (tiny tensors, plain JAX)
# ---------------------------------------------------------------------------
def _bn_fold(gamma, beta, mean, var, bias=None):
    """Eval-mode BN as scale/shift vectors; conv bias folded into the shift."""
    scale = gamma / jnp.sqrt(var + EPS)
    shift = beta - mean * scale
    if bias is not None:
        shift = shift + bias * scale
    return scale, shift


def _pair_taps(w, axis, p):
    s = [lax.slice_in_dim(w, i, i + 1, axis=axis) for i in range(3)]
    if p == 0:
        return jnp.concatenate([s[0], s[1] + s[2]], axis=axis)
    return jnp.concatenate([s[0] + s[1], s[2]], axis=axis)


def _parity_weights(w):
    """(3,3,Cin,Cout) HWIO -> (4, 4*Cin, Cout): effective 2x2 kernels for the
    4 output parities of nearest-2x-upsample followed by this 3x3 conv."""
    cin, cout = w.shape[2], w.shape[3]
    mats = []
    for pa in range(2):
        wr = _pair_taps(w, 0, pa)                 # (2,3,Cin,Cout)
        for pb in range(2):
            we = _pair_taps(wr, 1, pb)            # (2,2,Cin,Cout)
            mats.append(we.reshape(4 * cin, cout))
    return jnp.stack(mats, axis=0)


def _vmem_limit_bytes(scratch_bytes, in_block_bytes, out_block_bytes, weight_bytes):
    """Scoped-VMEM budget: persistent scratch + double-buffered input/output
    blocks + double-buffered weight operands, plus headroom for Mosaic
    temporaries.  Clamped to v7x's 64 MiB physical VMEM."""
    need = scratch_bytes + 2 * (in_block_bytes + out_block_bytes + weight_bytes)
    need += need // 2 + (4 << 20)
    return int(min(max(need, 8 << 20), 64 << 20))


# ---------------------------------------------------------------------------
# Public forward pass (NCHW in / NCHW out, like the PyTorch module)
# ---------------------------------------------------------------------------
def basic_block_dec(x_nchw, params, stride, *, compute_dtype=jnp.bfloat16):
    assert stride in (1, 2)  # TODO(synk): general stride needs per-parity tap counts
    x = jnp.transpose(x_nchw, (0, 2, 3, 1))        # NHWC
    N, H, W, C = x.shape
    assert W % 8 == 0, "W must be a multiple of 8 (layout-preserving merges)"
    cdt = jnp.dtype(compute_dtype)
    HW = H * W

    s2, h2 = _bn_fold(*params["bn2"])              # conv2 has no bias
    w2c = params["w2"].reshape(9 * C, C).astype(cdt)
    s2 = s2.reshape(1, C).astype(jnp.float32)
    h2 = h2.reshape(1, C).astype(jnp.float32)

    vec = lambda c: pl.BlockSpec((1, c), lambda n: (0, 0))
    pad_bytes = (H + 2) * (W + 2) * C * cdt.itemsize
    pat_bytes = H * W * 9 * C * cdt.itemsize
    scratch = [pltpu.VMEM((H + 2, W + 2, C), cdt),
               pltpu.VMEM((H + 2, W + 2, C), cdt),
               pltpu.VMEM((H, W, 9 * C), cdt)]
    in_block = HW * C * x.dtype.itemsize

    if stride == 1:
        s1, h1 = _bn_fold(*params["bn1"])          # conv1 bias=False
        w1c = (params["w1"].reshape(9 * C, C) * s1[None, :]).astype(cdt)
        h1 = h1.reshape(1, C).astype(jnp.float32)
        out_block = HW * C * x.dtype.itemsize
        wbytes = (w2c.size + w1c.size) * cdt.itemsize + 3 * C * 4
        vmem = _vmem_limit_bytes(2 * pad_bytes + pat_bytes, in_block, out_block, wbytes)
        out = pl.pallas_call(
            _make_stride1_kernel(H, W, C),
            out_shape=jax.ShapeDtypeStruct((N, HW, C), x.dtype),
            grid=(N,),
            in_specs=[
                pl.BlockSpec((1, H, W, C), lambda n: (n, 0, 0, 0)),
                pl.BlockSpec((9 * C, C), lambda n: (0, 0)),
                vec(C), vec(C),
                pl.BlockSpec((9 * C, C), lambda n: (0, 0)),
                vec(C),
            ],
            out_specs=pl.BlockSpec((1, HW, C), lambda n: (n, 0, 0)),
            scratch_shapes=scratch,
            compiler_params=pltpu.CompilerParams(
                dimension_semantics=("parallel",),
                vmem_limit_bytes=vmem),
        )(x, w2c, s2, h2, w1c, h1)
        out = out.reshape(N, H, W, C)
    else:
        Co = C // stride
        s1, h1 = _bn_fold(*params["bn1"], bias=params["b1"])
        ssc, hsc = _bn_fold(*params["bn_sc"], bias=params["b_sc"])
        w1p = _parity_weights(params["w1"]) * s1[None, None, :]       # (4,4C,Co)
        wsp = _parity_weights(params["w_sc"]) * ssc[None, None, :]
        wm = jnp.concatenate([w1p, wsp], axis=1).astype(cdt)          # (4,8C,Co)
        hm = (h1 + hsc).reshape(1, Co).astype(jnp.float32)
        out_block = HW * 4 * Co * x.dtype.itemsize
        wbytes = (w2c.size + wm.size) * cdt.itemsize + (2 * C + Co) * 4
        vmem = _vmem_limit_bytes(2 * pad_bytes + pat_bytes, in_block, out_block, wbytes)
        out = pl.pallas_call(
            _make_stride2_kernel(H, W, C),
            out_shape=jax.ShapeDtypeStruct((N, HW, 4 * Co), x.dtype),
            grid=(N,),
            in_specs=[
                pl.BlockSpec((1, H, W, C), lambda n: (n, 0, 0, 0)),
                pl.BlockSpec((9 * C, C), lambda n: (0, 0)),
                vec(C), vec(C),
                pl.BlockSpec((4, 8 * C, Co), lambda n: (0, 0, 0)),
                vec(Co),
            ],
            out_specs=pl.BlockSpec((1, HW, 4 * Co), lambda n: (n, 0, 0)),
            scratch_shapes=scratch,
            compiler_params=pltpu.CompilerParams(
                dimension_semantics=("parallel",),
                vmem_limit_bytes=vmem),
        )(x, w2c, s2, h2, wm, hm)
        # parity pieces -> (N, 2H, 2W, Co); one cheap transpose of the output
        out = out.reshape(N, H, W, 2, 2, Co)
        out = out.transpose(0, 1, 3, 2, 4, 5).reshape(N, 2 * H, 2 * W, Co)

    return jnp.transpose(out, (0, 3, 1, 2))        # -> NCHW


# ---------------------------------------------------------------------------
# Parameter init (matches the PyTorch module's structure; eval-mode BN stats)
# ---------------------------------------------------------------------------
def init_params(key, in_planes, stride):
    planes = in_planes // stride
    ks = jax.random.split(key, 8)

    def conv_w(k, cin, cout):                      # HWIO layout
        bound = 1.0 / jnp.sqrt(cin * 9.0)
        return jax.random.uniform(k, (3, 3, cin, cout), jnp.float32, -bound, bound)

    def bn(k, c):
        k1, k2, k3, k4 = jax.random.split(k, 4)
        return (0.5 + jax.random.uniform(k1, (c,), jnp.float32),
                0.1 * jax.random.normal(k2, (c,), jnp.float32),
                0.1 * jax.random.normal(k3, (c,), jnp.float32),
                0.5 + jax.random.uniform(k4, (c,), jnp.float32))

    p = {"w2": conv_w(ks[0], in_planes, in_planes), "bn2": bn(ks[1], in_planes),
         "w1": conv_w(ks[2], in_planes, planes), "bn1": bn(ks[3], planes)}
    if stride != 1:
        bound = 1.0 / jnp.sqrt(in_planes * 9.0)
        p["b1"] = jax.random.uniform(ks[4], (planes,), jnp.float32, -bound, bound)
        p["w_sc"] = conv_w(ks[5], in_planes, planes)
        p["b_sc"] = jax.random.uniform(ks[6], (planes,), jnp.float32, -bound, bound)
        p["bn_sc"] = bn(ks[7], planes)
    return p


# ---------------------------------------------------------------------------
# Pure-JAX reference (correctness check)
# ---------------------------------------------------------------------------
def _ref_conv(x, w, b=None):
    y = lax.conv_general_dilated(x, w, (1, 1), ((1, 1), (1, 1)),
                                 dimension_numbers=("NHWC", "HWIO", "NHWC"))
    return y if b is None else y + b


def _ref_bn(x, bn):
    gamma, beta, mean, var = bn
    return (x - mean) / jnp.sqrt(var + EPS) * gamma + beta


def _nearest_up(x, f):
    return jnp.repeat(jnp.repeat(x, f, axis=1), f, axis=2)


def ref_forward(x_nchw, p, stride):
    x = jnp.transpose(x_nchw, (0, 2, 3, 1))
    out = _ref_bn(jax.nn.relu(_ref_conv(x, p["w2"])), p["bn2"])
    if stride == 1:
        out = _ref_bn(_ref_conv(out, p["w1"]), p["bn1"]) + x
    else:
        short = _ref_bn(_ref_conv(_nearest_up(x, stride), p["w_sc"], p["b_sc"]),
                        p["bn_sc"])
        out = _ref_bn(_ref_conv(_nearest_up(out, stride), p["w1"], p["b1"]),
                      p["bn1"]) + short
    return jnp.transpose(jax.nn.relu(out), (0, 3, 1, 2))


# ---------------------------------------------------------------------------
if __name__ == "__main__":
    key = jax.random.PRNGKey(0)
    kx, kp1, kp2 = jax.random.split(key, 3)

    N, C, H, W = 2, 8, 16, 16
    x = jax.random.normal(kx, (N, C, H, W), jnp.float32)      # NCHW input

    ok = True
    for stride, kp in ((1, kp1), (2, kp2)):
        params = init_params(kp, C, stride)
        ref = ref_forward(x, params, stride)
        exp_shape = (N, C // stride, H * stride, W * stride)

        # f32 compute path: checks the math (im2col, parity decomposition,
        # BN folding, merged main+shortcut K).
        out32 = jax.block_until_ready(
            basic_block_dec(x, params, stride, compute_dtype=jnp.float32))
        ok &= (out32.shape == exp_shape)
        ok &= bool(jnp.allclose(out32, ref, atol=2e-2, rtol=2e-2))

        # bf16 compute path (MXU-native production default): looser tolerance.
        out16 = jax.block_until_ready(
            basic_block_dec(x, params, stride, compute_dtype=jnp.bfloat16))
        ok &= (out16.shape == exp_shape)
        ok &= bool(jnp.allclose(out16, ref, atol=5e-2, rtol=5e-2))

    print("KERNEL_OK" if ok else "MISMATCH")
</pallas_src>

<mosaic_0001>
module attributes {stable_mosaic.version = 11 : i64} {
  func.func @kernel(%arg0: i32, %arg1: memref<1x16x16x8xf32, #tpu.memory_space<vmem>>, %arg2: memref<72x8xf32, #tpu.memory_space<vmem>>, %arg3: memref<1x8xf32, #tpu.memory_space<vmem>>, %arg4: memref<1x8xf32, #tpu.memory_space<vmem>>, %arg5: memref<72x8xf32, #tpu.memory_space<vmem>>, %arg6: memref<1x8xf32, #tpu.memory_space<vmem>>, %arg7: memref<1x256x8xf32, #tpu.memory_space<vmem>>, %arg8: memref<18x18x8xf32, #tpu.memory_space<vmem>>, %arg9: memref<18x18x8xf32, #tpu.memory_space<vmem>>, %arg10: memref<16x16x72xf32, #tpu.memory_space<vmem>>) attributes {dimension_semantics = [#tpu.dimension_semantics<parallel>], iteration_bounds = array<i64: 2>, scalar_prefetch = 0 : i64, scratch_operands = 3 : i64, tpu.core_type = #tpu.core_type<tc>, window_params = [{transform_indices = @transform_0, window_bounds = array<i64: 1, 16, 16, 8>}, {pipeline_mode = #tpu.pipeline_mode<synchronous>, transform_indices = @transform_1, window_bounds = array<i64: 72, 8>}, {pipeline_mode = #tpu.pipeline_mode<synchronous>, transform_indices = @transform_2, window_bounds = array<i64: 1, 8>}, {pipeline_mode = #tpu.pipeline_mode<synchronous>, transform_indices = @transform_3, window_bounds = array<i64: 1, 8>}, {pipeline_mode = #tpu.pipeline_mode<synchronous>, transform_indices = @transform_4, window_bounds = array<i64: 72, 8>}, {pipeline_mode = #tpu.pipeline_mode<synchronous>, transform_indices = @transform_5, window_bounds = array<i64: 1, 8>}, {transform_indices = @transform_6, window_bounds = array<i64: 1, 256, 8>}]} {
    %cst = arith.constant 0.000000e+00 : f32
    %0 = vector.broadcast %cst : f32 to vector<1x18x8xf32>
    %cst_0 = arith.constant 0.000000e+00 : f32
    %1 = vector.broadcast %cst_0 : f32 to vector<16x1x8xf32>
    %c0 = arith.constant 0 : index
    %c0_1 = arith.constant 0 : index
    %c0_2 = arith.constant 0 : index
    %2 = vector.load %arg8[%c0, %c0_1, %c0_2] : memref<18x18x8xf32, #tpu.memory_space<vmem>>, vector<1x18x8xf32>
    tpu.vector_store %arg8[%c0, %c0_1, %c0_2], %0 {strides = array<i32>} : memref<18x18x8xf32, #tpu.memory_space<vmem>>, vector<1x18x8xf32>,
    %c17 = arith.constant 17 : index
    %c0_3 = arith.constant 0 : index
    %c0_4 = arith.constant 0 : index
    %3 = vector.load %arg8[%c17, %c0_3, %c0_4] : memref<18x18x8xf32, #tpu.memory_space<vmem>>, vector<1x18x8xf32>
    tpu.vector_store %arg8[%c17, %c0_3, %c0_4], %0 {strides = array<i32>} : memref<18x18x8xf32, #tpu.memory_space<vmem>>, vector<1x18x8xf32>,
    %c1 = arith.constant 1 : index
    %c0_5 = arith.constant 0 : index
    %c0_6 = arith.constant 0 : index
    %4 = vector.load %arg8[%c1, %c0_5, %c0_6] : memref<18x18x8xf32, #tpu.memory_space<vmem>>, vector<16x1x8xf32>
    tpu.vector_store %arg8[%c1, %c0_5, %c0_6], %1 {strides = array<i32>} : memref<18x18x8xf32, #tpu.memory_space<vmem>>, vector<16x1x8xf32>,
    %c1_7 = arith.constant 1 : index
    %c17_8 = arith.constant 17 : index
    %c0_9 = arith.constant 0 : index
    %5 = vector.load %arg8[%c1_7, %c17_8, %c0_9] : memref<18x18x8xf32, #tpu.memory_space<vmem>>, vector<16x1x8xf32>
    tpu.vector_store %arg8[%c1_7, %c17_8, %c0_9], %1 {strides = array<i32>} : memref<18x18x8xf32, #tpu.memory_space<vmem>>, vector<16x1x8xf32>,
    %cst_10 = arith.constant 0.000000e+00 : f32
    %6 = vector.broadcast %cst_10 : f32 to vector<1x18x8xf32>
    %cst_11 = arith.constant 0.000000e+00 : f32
    %7 = vector.broadcast %cst_11 : f32 to vector<16x1x8xf32>
    %c0_12 = arith.constant 0 : index
    %c0_13 = arith.constant 0 : index
    %c0_14 = arith.constant 0 : index
    %8 = vector.load %arg9[%c0_12, %c0_13, %c0_14] : memref<18x18x8xf32, #tpu.memory_space<vmem>>, vector<1x18x8xf32>
    tpu.vector_store %arg9[%c0_12, %c0_13, %c0_14], %6 {strides = array<i32>} : memref<18x18x8xf32, #tpu.memory_space<vmem>>, vector<1x18x8xf32>,
    %c17_15 = arith.constant 17 : index
    %c0_16 = arith.constant 0 : index
    %c0_17 = arith.constant 0 : index
    %9 = vector.load %arg9[%c17_15, %c0_16, %c0_17] : memref<18x18x8xf32, #tpu.memory_space<vmem>>, vector<1x18x8xf32>
    tpu.vector_store %arg9[%c17_15, %c0_16, %c0_17], %6 {strides = array<i32>} : memref<18x18x8xf32, #tpu.memory_space<vmem>>, vector<1x18x8xf32>,
    %c1_18 = arith.constant 1 : index
    %c0_19 = arith.constant 0 : index
    %c0_20 = arith.constant 0 : index
    %10 = vector.load %arg9[%c1_18, %c0_19, %c0_20] : memref<18x18x8xf32, #tpu.memory_space<vmem>>, vector<16x1x8xf32>
    tpu.vector_store %arg9[%c1_18, %c0_19, %c0_20], %7 {strides = array<i32>} : memref<18x18x8xf32, #tpu.memory_space<vmem>>, vector<16x1x8xf32>,
    %c1_21 = arith.constant 1 : index
    %c17_22 = arith.constant 17 : index
    %c0_23 = arith.constant 0 : index
    %11 = vector.load %arg9[%c1_21, %c17_22, %c0_23] : memref<18x18x8xf32, #tpu.memory_space<vmem>>, vector<16x1x8xf32>
    tpu.vector_store %arg9[%c1_21, %c17_22, %c0_23], %7 {strides = array<i32>} : memref<18x18x8xf32, #tpu.memory_space<vmem>>, vector<16x1x8xf32>,
    %c0_24 = arith.constant 0 : index
    %c0_25 = arith.constant 0 : index
    %c0_26 = arith.constant 0 : index
    %c0_27 = arith.constant 0 : index
    %12 = vector.load %arg1[%c0_24, %c0_25, %c0_26, %c0_27] : memref<1x16x16x8xf32, #tpu.memory_space<vmem>>, vector<1x16x16x8xf32>
    %13 = vector.shape_cast %12 : vector<1x16x16x8xf32> to vector<16x16x8xf32>
    %c1_28 = arith.constant 1 : index
    %c1_29 = arith.constant 1 : index
    %c0_30 = arith.constant 0 : index
    %14 = vector.load %arg8[%c1_28, %c1_29, %c0_30] : memref<18x18x8xf32, #tpu.memory_space<vmem>>, vector<16x16x8xf32>
    tpu.vector_store %arg8[%c1_28, %c1_29, %c0_30], %13 {strides = array<i32>} : memref<18x18x8xf32, #tpu.memory_space<vmem>>, vector<16x16x8xf32>,
    %c0_31 = arith.constant 0 : index
    %c0_32 = arith.constant 0 : index
    %c0_33 = arith.constant 0 : index
    %15 = vector.load %arg8[%c0_31, %c0_32, %c0_33] : memref<18x18x8xf32, #tpu.memory_space<vmem>>, vector<16x16x8xf32>
    %c0_34 = arith.constant 0 : index
    %c0_35 = arith.constant 0 : index
    %c0_36 = arith.constant 0 : index
    %16 = vector.load %arg10[%c0_34, %c0_35, %c0_36] : memref<16x16x72xf32, #tpu.memory_space<vmem>>, vector<16x16x8xf32>
    tpu.vector_store %arg10[%c0_34, %c0_35, %c0_36], %15 {strides = array<i32>} : memref<16x16x72xf32, #tpu.memory_space<vmem>>, vector<16x16x8xf32>,
    %c0_37 = arith.constant 0 : index
    %c1_38 = arith.constant 1 : index
    %c0_39 = arith.constant 0 : index
    %17 = vector.load %arg8[%c0_37, %c1_38, %c0_39] : memref<18x18x8xf32, #tpu.memory_space<vmem>>, vector<16x16x8xf32>
    %c0_40 = arith.constant 0 : index
    %c0_41 = arith.constant 0 : index
    %c8 = arith.constant 8 : index
    %18 = vector.load %arg10[%c0_40, %c0_41, %c8] : memref<16x16x72xf32, #tpu.memory_space<vmem>>, vector<16x16x8xf32>
    tpu.vector_store %arg10[%c0_40, %c0_41, %c8], %17 {strides = array<i32>} : memref<16x16x72xf32, #tpu.memory_space<vmem>>, vector<16x16x8xf32>,
    %c0_42 = arith.constant 0 : index
    %c2 = arith.constant 2 : index
    %c0_43 = arith.constant 0 : index
    %19 = vector.load %arg8[%c0_42, %c2, %c0_43] : memref<18x18x8xf32, #tpu.memory_space<vmem>>, vector<16x16x8xf32>
    %c0_44 = arith.constant 0 : index
    %c0_45 = arith.constant 0 : index
    %c16 = arith.constant 16 : index
    %20 = vector.load %arg10[%c0_44, %c0_45, %c16] : memref<16x16x72xf32, #tpu.memory_space<vmem>>, vector<16x16x8xf32>
    tpu.vector_store %arg10[%c0_44, %c0_45, %c16], %19 {strides = array<i32>} : memref<16x16x72xf32, #tpu.memory_space<vmem>>, vector<16x16x8xf32>,
    %c1_46 = arith.constant 1 : index
    %c0_47 = arith.constant 0 : index
    %c0_48 = arith.constant 0 : index
    %21 = vector.load %arg8[%c1_46, %c0_47, %c0_48] : memref<18x18x8xf32, #tpu.memory_space<vmem>>, vector<16x16x8xf32>
    %c0_49 = arith.constant 0 : index
    %c0_50 = arith.constant 0 : index
    %c24 = arith.constant 24 : index
    %22 = vector.load %arg10[%c0_49, %c0_50, %c24] : memref<16x16x72xf32, #tpu.memory_space<vmem>>, vector<16x16x8xf32>
    tpu.vector_store %arg10[%c0_49, %c0_50, %c24], %21 {strides = array<i32>} : memref<16x16x72xf32, #tpu.memory_space<vmem>>, vector<16x16x8xf32>,
    %c1_51 = arith.constant 1 : index
    %c1_52 = arith.constant 1 : index
    %c0_53 = arith.constant 0 : index
    %23 = vector.load %arg8[%c1_51, %c1_52, %c0_53] : memref<18x18x8xf32, #tpu.memory_space<vmem>>, vector<16x16x8xf32>
    %c0_54 = arith.constant 0 : index
    %c0_55 = arith.constant 0 : index
    %c32 = arith.constant 32 : index
    %24 = vector.load %arg10[%c0_54, %c0_55, %c32] : memref<16x16x72xf32, #tpu.memory_space<vmem>>, vector<16x16x8xf32>
    tpu.vector_store %arg10[%c0_54, %c0_55, %c32], %23 {strides = array<i32>} : memref<16x16x72xf32, #tpu.memory_space<vmem>>, vector<16x16x8xf32>,
    %c1_56 = arith.constant 1 : index
    %c2_57 = arith.constant 2 : index
    %c0_58 = arith.constant 0 : index
    %25 = vector.load %arg8[%c1_56, %c2_57, %c0_58] : memref<18x18x8xf32, #tpu.memory_space<vmem>>, vector<16x16x8xf32>
    %c0_59 = arith.constant 0 : index
    %c0_60 = arith.constant 0 : index
    %c40 = arith.constant 40 : index
    %26 = vector.load %arg10[%c0_59, %c0_60, %c40] : memref<16x16x72xf32, #tpu.memory_space<vmem>>, vector<16x16x8xf32>
    tpu.vector_store %arg10[%c0_59, %c0_60, %c40], %25 {strides = array<i32>} : memref<16x16x72xf32, #tpu.memory_space<vmem>>, vector<16x16x8xf32>,
    %c2_61 = arith.constant 2 : index
    %c0_62 = arith.constant 0 : index
    %c0_63 = arith.constant 0 : index
    %27 = vector.load %arg8[%c2_61, %c0_62, %c0_63] : memref<18x18x8xf32, #tpu.memory_space<vmem>>, vector<16x16x8xf32>
    %c0_64 = arith.constant 0 : index
    %c0_65 = arith.constant 0 : index
    %c48 = arith.constant 48 : index
    %28 = vector.load %arg10[%c0_64, %c0_65, %c48] : memref<16x16x72xf32, #tpu.memory_space<vmem>>, vector<16x16x8xf32>
    tpu.vector_store %arg10[%c0_64, %c0_65, %c48], %27 {strides = array<i32>} : memref<16x16x72xf32, #tpu.memory_space<vmem>>, vector<16x16x8xf32>,
    %c2_66 = arith.constant 2 : index
    %c1_67 = arith.constant 1 : index
    %c0_68 = arith.constant 0 : index
    %29 = vector.load %arg8[%c2_66, %c1_67, %c0_68] : memref<18x18x8xf32, #tpu.memory_space<vmem>>, vector<16x16x8xf32>
    %c0_69 = arith.constant 0 : index
    %c0_70 = arith.constant 0 : index
    %c56 = arith.constant 56 : index
    %30 = vector.load %arg10[%c0_69, %c0_70, %c56] : memref<16x16x72xf32, #tpu.memory_space<vmem>>, vector<16x16x8xf32>
    tpu.vector_store %arg10[%c0_69, %c0_70, %c56], %29 {strides = array<i32>} : memref<16x16x72xf32, #tpu.memory_space<vmem>>, vector<16x16x8xf32>,
    %c2_71 = arith.constant 2 : index
    %c2_72 = arith.constant 2 : index
    %c0_73 = arith.constant 0 : index
    %31 = vector.load %arg8[%c2_71, %c2_72, %c0_73] : memref<18x18x8xf32, #tpu.memory_space<vmem>>, vector<16x16x8xf32>
    %c0_74 = arith.constant 0 : index
    %c0_75 = arith.constant 0 : index
    %c64 = arith.constant 64 : index
    %32 = vector.load %arg10[%c0_74, %c0_75, %c64] : memref<16x16x72xf32, #tpu.memory_space<vmem>>, vector<16x16x8xf32>
    tpu.vector_store %arg10[%c0_74, %c0_75, %c64], %31 {strides = array<i32>} : memref<16x16x72xf32, #tpu.memory_space<vmem>>, vector<16x16x8xf32>,
    %c0_76 = arith.constant 0 : index
    %c0_77 = arith.constant 0 : index
    %c0_78 = arith.constant 0 : index
    %33 = vector.load %arg10[%c0_76, %c0_77, %c0_78] : memref<16x16x72xf32, #tpu.memory_space<vmem>>, vector<16x16x72xf32>
    %34 = vector.shape_cast %33 : vector<16x16x72xf32> to vector<256x72xf32>
    %c0_79 = arith.constant 0 : index
    %c0_80 = arith.constant 0 : index
    %35 = vector.load %arg2[%c0_79, %c0_80] : memref<72x8xf32, #tpu.memory_space<vmem>>, vector<72x8xf32>
    %cst_81 = arith.constant dense<0.000000e+00> : vector<256x8xf32>
    %36 = tpu.matmul %34, %35, %cst_81 {dimension_numbers = #tpu.dot_dimension_numbers<[1], [0], [0], [1], [0, 0, 1, 1], [], []>} : vector<256x72xf32>, vector<72x8xf32>, vector<256x8xf32> -> vector<256x8xf32>
    %cst_82 = arith.constant 0.000000e+00 : f32
    %37 = vector.broadcast %cst_82 : f32 to vector<256x8xf32>
    %38 = arith.maximumf %36, %37 : vector<256x8xf32>
    %c0_83 = arith.constant 0 : index
    %c0_84 = arith.constant 0 : index
    %39 = vector.load %arg3[%c0_83, %c0_84] : memref<1x8xf32, #tpu.memory_space<vmem>>, vector<1x8xf32>
    %40 = vector.broadcast %39 : vector<1x8xf32> to vector<256x8xf32>
    %41 = arith.mulf %38, %40 : vector<256x8xf32>
    %c0_85 = arith.constant 0 : index
    %c0_86 = arith.constant 0 : index
    %42 = vector.load %arg4[%c0_85, %c0_86] : memref<1x8xf32, #tpu.memory_space<vmem>>, vector<1x8xf32>
    %43 = vector.broadcast %42 : vector<1x8xf32> to vector<256x8xf32>
    %44 = arith.addf %41, %43 : vector<256x8xf32>
    %45 = vector.shape_cast %44 : vector<256x8xf32> to vector<16x16x8xf32>
    %c1_87 = arith.constant 1 : index
    %c1_88 = arith.constant 1 : index
    %c0_89 = arith.constant 0 : index
    %46 = vector.load %arg9[%c1_87, %c1_88, %c0_89] : memref<18x18x8xf32, #tpu.memory_space<vmem>>, vector<16x16x8xf32>
    tpu.vector_store %arg9[%c1_87, %c1_88, %c0_89], %45 {strides = array<i32>} : memref<18x18x8xf32, #tpu.memory_space<vmem>>, vector<16x16x8xf32>,
    %c0_90 = arith.constant 0 : index
    %c0_91 = arith.constant 0 : index
    %c0_92 = arith.constant 0 : index
    %47 = vector.load %arg9[%c0_90, %c0_91, %c0_92] : memref<18x18x8xf32, #tpu.memory_space<vmem>>, vector<16x16x8xf32>
    %c0_93 = arith.constant 0 : index
    %c0_94 = arith.constant 0 : index
    %c0_95 = arith.constant 0 : index
    %48 = vector.load %arg10[%c0_93, %c0_94, %c0_95] : memref<16x16x72xf32, #tpu.memory_space<vmem>>, vector<16x16x8xf32>
    tpu.vector_store %arg10[%c0_93, %c0_94, %c0_95], %47 {strides = array<i32>} : memref<16x16x72xf32, #tpu.memory_space<vmem>>, vector<16x16x8xf32>,
    %c0_96 = arith.constant 0 : index
    %c1_97 = arith.constant 1 : index
    %c0_98 = arith.constant 0 : index
    %49 = vector.load %arg9[%c0_96, %c1_97, %c0_98] : memref<18x18x8xf32, #tpu.memory_space<vmem>>, vector<16x16x8xf32>
    %c0_99 = arith.constant 0 : index
    %c0_100 = arith.constant 0 : index
    %c8_101 = arith.constant 8 : index
    %50 = vector.load %arg10[%c0_99, %c0_100, %c8_101] : memref<16x16x72xf32, #tpu.memory_space<vmem>>, vector<16x16x8xf32>
    tpu.vector_store %arg10[%c0_99, %c0_100, %c8_101], %49 {strides = array<i32>} : memref<16x16x72xf32, #tpu.memory_space<vmem>>, vector<16x16x8xf32>,
    %c0_102 = arith.constant 0 : index
    %c2_103 = arith.constant 2 : index
    %c0_104 = arith.constant 0 : index
    %51 = vector.load %arg9[%c0_102, %c2_103, %c0_104] : memref<18x18x8xf32, #tpu.memory_space<vmem>>, vector<16x16x8xf32>
    %c0_105 = arith.constant 0 : index
    %c0_106 = arith.constant 0 : index
    %c16_107 = arith.constant 16 : index
    %52 = vector.load %arg10[%c0_105, %c0_106, %c16_107] : memref<16x16x72xf32, #tpu.memory_space<vmem>>, vector<16x16x8xf32>
    tpu.vector_store %arg10[%c0_105, %c0_106, %c16_107], %51 {strides = array<i32>} : memref<16x16x72xf32, #tpu.memory_space<vmem>>, vector<16x16x8xf32>,
    %c1_108 = arith.constant 1 : index
    %c0_109 = arith.constant 0 : index
    %c0_110 = arith.constant 0 : index
    %53 = vector.load %arg9[%c1_108, %c0_109, %c0_110] : memref<18x18x8xf32, #tpu.memory_space<vmem>>, vector<16x16x8xf32>
    %c0_111 = arith.constant 0 : index
    %c0_112 = arith.constant 0 : index
    %c24_113 = arith.constant 24 : index
    %54 = vector.load %arg10[%c0_111, %c0_112, %c24_113] : memref<16x16x72xf32, #tpu.memory_space<vmem>>, vector<16x16x8xf32>
    tpu.vector_store %arg10[%c0_111, %c0_112, %c24_113], %53 {strides = array<i32>} : memref<16x16x72xf32, #tpu.memory_space<vmem>>, vector<16x16x8xf32>,
    %c1_114 = arith.constant 1 : index
    %c1_115 = arith.constant 1 : index
    %c0_116 = arith.constant 0 : index
    %55 = vector.load %arg9[%c1_114, %c1_115, %c0_116] : memref<18x18x8xf32, #tpu.memory_space<vmem>>, vector<16x16x8xf32>
    %c0_117 = arith.constant 0 : index
    %c0_118 = arith.constant 0 : index
    %c32_119 = arith.constant 32 : index
    %56 = vector.load %arg10[%c0_117, %c0_118, %c32_119] : memref<16x16x72xf32, #tpu.memory_space<vmem>>, vector<16x16x8xf32>
    tpu.vector_store %arg10[%c0_117, %c0_118, %c32_119], %55 {strides = array<i32>} : memref<16x16x72xf32, #tpu.memory_space<vmem>>, vector<16x16x8xf32>,
    %c1_120 = arith.constant 1 : index
    %c2_121 = arith.constant 2 : index
    %c0_122 = arith.constant 0 : index
    %57 = vector.load %arg9[%c1_120, %c2_121, %c0_122] : memref<18x18x8xf32, #tpu.memory_space<vmem>>, vector<16x16x8xf32>
    %c0_123 = arith.constant 0 : index
    %c0_124 = arith.constant 0 : index
    %c40_125 = arith.constant 40 : index
    %58 = vector.load %arg10[%c0_123, %c0_124, %c40_125] : memref<16x16x72xf32, #tpu.memory_space<vmem>>, vector<16x16x8xf32>
    tpu.vector_store %arg10[%c0_123, %c0_124, %c40_125], %57 {strides = array<i32>} : memref<16x16x72xf32, #tpu.memory_space<vmem>>, vector<16x16x8xf32>,
    %c2_126 = arith.constant 2 : index
    %c0_127 = arith.constant 0 : index
    %c0_128 = arith.constant 0 : index
    %59 = vector.load %arg9[%c2_126, %c0_127, %c0_128] : memref<18x18x8xf32, #tpu.memory_space<vmem>>, vector<16x16x8xf32>
    %c0_129 = arith.constant 0 : index
    %c0_130 = arith.constant 0 : index
    %c48_131 = arith.constant 48 : index
    %60 = vector.load %arg10[%c0_129, %c0_130, %c48_131] : memref<16x16x72xf32, #tpu.memory_space<vmem>>, vector<16x16x8xf32>
    tpu.vector_store %arg10[%c0_129, %c0_130, %c48_131], %59 {strides = array<i32>} : memref<16x16x72xf32, #tpu.memory_space<vmem>>, vector<16x16x8xf32>,
    %c2_132 = arith.constant 2 : index
    %c1_133 = arith.constant 1 : index
    %c0_134 = arith.constant 0 : index
    %61 = vector.load %arg9[%c2_132, %c1_133, %c0_134] : memref<18x18x8xf32, #tpu.memory_space<vmem>>, vector<16x16x8xf32>
    %c0_135 = arith.constant 0 : index
    %c0_136 = arith.constant 0 : index
    %c56_137 = arith.constant 56 : index
    %62 = vector.load %arg10[%c0_135, %c0_136, %c56_137] : memref<16x16x72xf32, #tpu.memory_space<vmem>>, vector<16x16x8xf32>
    tpu.vector_store %arg10[%c0_135, %c0_136, %c56_137], %61 {strides = array<i32>} : memref<16x16x72xf32, #tpu.memory_space<vmem>>, vector<16x16x8xf32>,
    %c2_138 = arith.constant 2 : index
    %c2_139 = arith.constant 2 : index
    %c0_140 = arith.constant 0 : index
    %63 = vector.load %arg9[%c2_138, %c2_139, %c0_140] : memref<18x18x8xf32, #tpu.memory_space<vmem>>, vector<16x16x8xf32>
    %c0_141 = arith.constant 0 : index
    %c0_142 = arith.constant 0 : index
    %c64_143 = arith.constant 64 : index
    %64 = vector.load %arg10[%c0_141, %c0_142, %c64_143] : memref<16x16x72xf32, #tpu.memory_space<vmem>>, vector<16x16x8xf32>
    tpu.vector_store %arg10[%c0_141, %c0_142, %c64_143], %63 {strides = array<i32>} : memref<16x16x72xf32, #tpu.memory_space<vmem>>, vector<16x16x8xf32>,
    %c0_144 = arith.constant 0 : index
    %c0_145 = arith.constant 0 : index
    %c0_146 = arith.constant 0 : index
    %65 = vector.load %arg10[%c0_144, %c0_145, %c0_146] : memref<16x16x72xf32, #tpu.memory_space<vmem>>, vector<16x16x72xf32>
    %66 = vector.shape_cast %65 : vector<16x16x72xf32> to vector<256x72xf32>
    %c0_147 = arith.constant 0 : index
    %c0_148 = arith.constant 0 : index
    %67 = vector.load %arg5[%c0_147, %c0_148] : memref<72x8xf32, #tpu.memory_space<vmem>>, vector<72x8xf32>
    %cst_149 = arith.constant dense<0.000000e+00> : vector<256x8xf32>
    %68 = tpu.matmul %66, %67, %cst_149 {dimension_numbers = #tpu.dot_dimension_numbers<[1], [0], [0], [1], [0, 0, 1, 1], [], []>} : vector<256x72xf32>, vector<72x8xf32>, vector<256x8xf32> -> vector<256x8xf32>
    %c0_150 = arith.constant 0 : index
    %c0_151 = arith.constant 0 : index
    %69 = vector.load %arg6[%c0_150, %c0_151] : memref<1x8xf32, #tpu.memory_space<vmem>>, vector<1x8xf32>
    %70 = vector.broadcast %69 : vector<1x8xf32> to vector<256x8xf32>
    %71 = arith.addf %68, %70 : vector<256x8xf32>
    %72 = vector.shape_cast %13 : vector<16x16x8xf32> to vector<256x8xf32>
    %73 = arith.addf %71, %72 : vector<256x8xf32>
    %cst_152 = arith.constant 0.000000e+00 : f32
    %74 = vector.broadcast %cst_152 : f32 to vector<256x8xf32>
    %75 = arith.maximumf %73, %74 : vector<256x8xf32>
    %c0_153 = arith.constant 0 : index
    %c0_154 = arith.constant 0 : index
    %c0_155 = arith.constant 0 : index
    %76 = vector.load %arg7[%c0_153, %c0_154, %c0_155] : memref<1x256x8xf32, #tpu.memory_space<vmem>>, vector<1x256x8xf32>
    %77 = vector.shape_cast %76 : vector<1x256x8xf32> to vector<256x8xf32>
    %78 = vector.shape_cast %75 : vector<256x8xf32> to vector<1x256x8xf32>
    tpu.vector_store %arg7[%c0_153, %c0_154, %c0_155], %78 {strides = array<i32>} : memref<1x256x8xf32, #tpu.memory_space<vmem>>, vector<1x256x8xf32>,
    return
  }
  func.func @transform_0(%arg0: i32) -> (i32, i32, i32, i32) {
    %c0_i32 = arith.constant 0 : i32
    %c0_i32_0 = arith.constant 0 : i32
    %c0_i32_1 = arith.constant 0 : i32
    %c0_i32_2 = arith.constant 0 : i32
    return %arg0, %c0_i32, %c0_i32_0, %c0_i32_1 : i32, i32, i32, i32
  }
  func.func @transform_1(%arg0: i32) -> (i32, i32) {
    %c0_i32 = arith.constant 0 : i32
    %c0_i32_0 = arith.constant 0 : i32
    %c0_i32_1 = arith.constant 0 : i32
    return %c0_i32, %c0_i32_0 : i32, i32
  }
  func.func @transform_2(%arg0: i32) -> (i32, i32) {
    %c0_i32 = arith.constant 0 : i32
    %c0_i32_0 = arith.constant 0 : i32
    %c0_i32_1 = arith.constant 0 : i32
    return %c0_i32, %c0_i32_0 : i32, i32
  }
  func.func @transform_3(%arg0: i32) -> (i32, i32) {
    %c0_i32 = arith.constant 0 : i32
    %c0_i32_0 = arith.constant 0 : i32
    %c0_i32_1 = arith.constant 0 : i32
    return %c0_i32, %c0_i32_0 : i32, i32
  }
  func.func @transform_4(%arg0: i32) -> (i32, i32) {
    %c0_i32 = arith.constant 0 : i32
    %c0_i32_0 = arith.constant 0 : i32
    %c0_i32_1 = arith.constant 0 : i32
    return %c0_i32, %c0_i32_0 : i32, i32
  }
  func.func @transform_5(%arg0: i32) -> (i32, i32) {
    %c0_i32 = arith.constant 0 : i32
    %c0_i32_0 = arith.constant 0 : i32
    %c0_i32_1 = arith.constant 0 : i32
    return %c0_i32, %c0_i32_0 : i32, i32
  }
  func.func @transform_6(%arg0: i32) -> (i32, i32, i32) {
    %c0_i32 = arith.constant 0 : i32
    %c0_i32_0 = arith.constant 0 : i32
    %c0_i32_1 = arith.constant 0 : i32
    return %arg0, %c0_i32, %c0_i32_0 : i32, i32, i32
  }
}

</mosaic_0001>

<bundles_post_ra>
// kernel: tpu_custom_call.1
= control target key start
LH: loop header
LB: loop body
LE: loop exit
PB: predicated region body
PF: predicated region fallthrough
CT: control target
= control target key end

     0   :  { %s5029_s21 = smov 0   ;;  %s7476_s0 = inlined_call_operand.vmem [shape: f32[2,16,16,8], index: 0, kind: input, shape index: {}]   ;;  %s7477_s1 = inlined_call_operand.vmem [shape: f32[72,8], index: 1, kind: input, shape index: {}]   ;;  %s7478_s2 = inlined_call_operand.vmem [shape: f32[1,8], index: 2, kind: input, shape index: {}]   ;;  %s7479_s3 = inlined_call_operand.vmem [shape: f32[1,8], index: 3, kind: input, shape index: {}]   ;;  %s7480_s4 = inlined_call_operand.vmem [shape: f32[72,8], index: 4, kind: input, shape index: {}]   ;;  %s7481_s5 = inlined_call_operand.vmem [shape: f32[1,8], index: 5, kind: input, shape index: {}]   ;;  %s7482_s6 = inlined_call_operand.vmem [shape: f32[2,256,8], index: 6, kind: output, shape index: {}]  }
   0x1 LB: > { %s4634_s22 = sadd.s32 4294967295, %s4983_s21   ;;  %p4638_p0 = scmp.ge.s32.totalorder %s4983_s21, 1  ;;  %s4983_s21 = sphi %s5029_s21, %s16_s21  }
   0x2   : > { %p212_p1 = scmp.lt.s32.totalorder %s4983_s21, 3 }
   0x4   : > { %p213_p2 = pnand %p4638_p0, %p212_p1 }
   0x6   : > { %216 = sbr.rel (%p213_p2) target bundleno = 1699 (0x6a3), region = 44 }
   0xd   : > { %vm252_vm0 = vcmask 64512   ;;  %p5039_p3 = scmp.lt.s32.totalorder %s4634_s22, 1  ;;  %vm255_vm1 = vcmask 58368   ;;  %vm262_vm2 = vcmask 57344   ;;  %v4985_v0 = vmov 0.0   ;;  %s4986_s28 = smov 8  }
   0xe   : > { %253 = vst.msk [vmem:[#allocation2] sm:$0xff] %vm252_vm0, %v4985_v0  ;;  %254 = vst.msk [vmem:[#allocation2 + $0x8] sm:$0xff] %vm252_vm0, %v4985_v0  ;;  %s4987_s29 = smov 16   ;;  %vm623_vm3 = vcmask 130112   ;;  %s4988_s30 = smov 24   ;;  %vm816_vm4 = vcmask 195712  }
   0xf   : > { %258 = vst.msk [vmem:[#allocation2 + $0x198] sm:$0xff] %vm252_vm0, %v4985_v0  ;;  %259 = vst.msk [vmem:[#allocation2 + $0x1a0] sm:$0xff] %vm252_vm0, %v4985_v0  ;;  %s7671_s22 = smov (!%p5039_p3, %s4634_s22), 1  ;;  %s4989_s7 = smov 32   ;;  %vm1009_vm5 = vcmask 261312   ;;  %vm1202_vm6 = vcmask 326912  }
  0x10   : > { %295 = vst.msk [vmem:[#allocation3] sm:$0xff] %vm252_vm0, %v4985_v0  ;;  %296 = vst.msk [vmem:[#allocation3 + $0x8] sm:$0xff] %vm252_vm0, %v4985_v0  ;;  %s4712_s24 = sshll.u32 %s7671_s22, 8  ;;  %s4990_s8 = smov 40   ;;  %vm1395_vm7 = vcmask 392512   ;;  %vm1589_vm8 = vcmask 458112  }
  0x11   : > { %299 = vst.msk [vmem:[#allocation3 + $0x198] sm:$0xff] %vm252_vm0, %v4985_v0  ;;  %300 = vst.msk [vmem:[#allocation3 + $0x1a0] sm:$0xff] %vm252_vm0, %v4985_v0  ;;  %s5203_s27 = scalar_lea.vmem %s7476_s0, %s4712_s24  ;;  %s4991_s9 = smov 48   ;;  %vm1782_vm9 = vcmask 523712   ;;  %vm1975_vm10 = vcmask 589312   ;;  %vm2049_vm11 = vcmask 588800  }
  0x12   : > { %256 = vst.msk [vmem:[#allocation2 + $0x10] sm:$0x3] %vm255_vm1, %v4985_v0  ;;  %260 = vst.msk [vmem:[#allocation2 + $0x1a8] sm:$0x3] %vm255_vm1, %v4985_v0  ;;  %v5206_v1 = vld [vmem:[%s5203_s27] sm:$0xff]  ;;  %v5209_v2 = vld [vmem:[%s5203_s27 + $0x8] sm:$0xff] }
  0x13   : > { %297 = vst.msk [vmem:[#allocation3 + $0x10] sm:$0x3] %vm255_vm1, %v4985_v0  ;;  %301 = vst.msk [vmem:[#allocation3 + $0x1a8] sm:$0x3] %vm255_vm1, %v4985_v0  ;;  %v5212_v3 = vld [vmem:[%s5203_s27 + $0x10] sm:$0xff]  ;;  %v5221_v4 = vld [vmem:[%s5203_s27 + $0x18] sm:$0xff] }
  0x14   : > { %279 = vst.msk [vmem:[#allocation2 + $0x29] sm:$0x1] %vm262_vm2, %v4985_v0  ;;  %263 = vst.msk [vmem:[#allocation2 + $0x18] sm:$0x1] %vm262_vm2, %v4985_v0  ;;  %v5224_v5 = vld [vmem:[%s5203_s27 + $0x20] sm:$0xff]  ;;  %v5227_v6 = vld [vmem:[%s5203_s27 + $0x28] sm:$0xff] }
  0x15   : > { %264 = vst.msk [vmem:[#allocation2 + $0x30] sm:$0x1] %vm262_vm2, %v4985_v0  ;;  %265 = vst.msk [vmem:[#allocation2 + $0x48] sm:$0x1] %vm262_vm2, %v4985_v0  ;;  %v463_v7 = vld [vmem:[#allocation2 + $0x1] sm:$0xff]  ;;  %v5236_v9 = vld [vmem:[%s5203_s27 + $0x30] sm:$0xff] }
  0x16   : > { %266 = vst.msk [vmem:[#allocation2 + $0x60] sm:$0x1] %vm262_vm2, %v4985_v0  ;;  %267 = vst.msk [vmem:[#allocation2 + $0x78] sm:$0x1] %vm262_vm2, %v4985_v0  ;;  %527 = vrot.lane.b32.xlu0 %v463_v7, %s4986_s28  ;;  %v5242_v10 = vld [vmem:[%s5203_s27 + $0x38] sm:$0xff]  ;;  %v5245_v11 = vld [vmem:[%s5203_s27 + $0x40] sm:$0xff] }
  0x17   : > { %268 = vst.msk [vmem:[#allocation2 + $0x90] sm:$0x1] %vm262_vm2, %v4985_v0  ;;  %269 = vst.msk [vmem:[#allocation2 + $0xa8] sm:$0x1] %vm262_vm2, %v4985_v0  ;;  %v5248_v12 = vld [vmem:[%s5203_s27 + $0x48] sm:$0xff]  ;;  %v5257_v13 = vld [vmem:[%s5203_s27 + $0x50] sm:$0xff] }
  0x18   : > { %270 = vst.msk [vmem:[#allocation2 + $0xc0] sm:$0x1] %vm262_vm2, %v4985_v0  ;;  %271 = vst.msk [vmem:[#allocation2 + $0xd8] sm:$0x1] %vm262_vm2, %v4985_v0  ;;  %v5260_v14 = vld [vmem:[%s5203_s27 + $0x58] sm:$0xff]  ;;  %v5263_v15 = vld [vmem:[%s5203_s27 + $0x60] sm:$0xff] }
  0x19   : > { %272 = vst.msk [vmem:[#allocation2 + $0xf0] sm:$0x1] %vm262_vm2, %v4985_v0  ;;  %273 = vst.msk [vmem:[#allocation2 + $0x108] sm:$0x1] %vm262_vm2, %v4985_v0  ;;  %v464_v8 = vld [vmem:[#allocation2 + $0x9] sm:$0xff]  ;;  %v5278_v18 = vld [vmem:[%s5203_s27 + $0x78] sm:$0xff] }
  0x1a   : > { %274 = vst.msk [vmem:[#allocation2 + $0x120] sm:$0x1] %vm262_vm2, %v4985_v0  ;;  %275 = vst.msk [vmem:[#allocation2 + $0x138] sm:$0x1] %vm262_vm2, %v4985_v0  ;;  %v5272_v16 = vld [vmem:[%s5203_s27 + $0x68] sm:$0xff]  ;;  %v5275_v17 = vld [vmem:[%s5203_s27 + $0x70] sm:$0xff]  ;;  %529 = vrot.lane.b32.xlu0 %v464_v8, %s4986_s28 }
  0x1b   : > { %276 = vst.msk [vmem:[#allocation2 + $0x150] sm:$0x1] %vm262_vm2, %v4985_v0  ;;  %277 = vst.msk [vmem:[#allocation2 + $0x168] sm:$0x1] %vm262_vm2, %v4985_v0  ;;  %v5287_v19 = vld [vmem:[%s5203_s27 + $0x80] sm:$0xff]  ;;  %v5290_v20 = vld [vmem:[%s5203_s27 + $0x88] sm:$0xff] }
  0x1c   : > { %278 = vst.msk [vmem:[#allocation2 + $0x180] sm:$0x1] %vm262_vm2, %v4985_v0  ;;  %280 = vst.msk [vmem:[#allocation2 + $0x41] sm:$0x1] %vm262_vm2, %v4985_v0  ;;  %v5293_v21 = vld [vmem:[%s5203_s27 + $0x90] sm:$0xff]  ;;  %v5303_v22 = vld [vmem:[%s5203_s27 + $0x98] sm:$0xff] }
  0x1d   : > { %281 = vst.msk [vmem:[#allocation2 + $0x59] sm:$0x1] %vm262_vm2, %v4985_v0  ;;  %282 = vst.msk [vmem:[#allocation2 + $0x71] sm:$0x1] %vm262_vm2, %v4985_v0  ;;  %v5306_v23 = vld [vmem:[%s5203_s27 + $0xa0] sm:$0xff]  ;;  %v5309_v24 = vld [vmem:[%s5203_s27 + $0xa8] sm:$0xff] }
  0x1e   : > { %283 = vst.msk [vmem:[#allocation2 + $0x89] sm:$0x1] %vm262_vm2, %v4985_v0  ;;  %284 = vst.msk [vmem:[#allocation2 + $0xa1] sm:$0x1] %vm262_vm2, %v4985_v0  ;;  %v5326_v28 = vld [vmem:[%s5203_s27 + $0xb0] sm:$0xff]  ;;  %v5329_v29 = vld [vmem:[%s5203_s27 + $0xb8] sm:$0xff] }
  0x1f   : > { %285 = vst.msk [vmem:[#allocation2 + $0xb9] sm:$0x1] %vm262_vm2, %v4985_v0  ;;  %286 = vst.msk [vmem:[#allocation2 + $0xd1] sm:$0x1] %vm262_vm2, %v4985_v0  ;;  %v5348_v33 = vld [vmem:[%s5203_s27 + $0xc0] sm:$0xff]  ;;  %v5351_v34 = vld [vmem:[%s5203_s27 + $0xc8] sm:$0xff] }
  0x20   : > { %287 = vst.msk [vmem:[#allocation2 + $0xe9] sm:$0x1] %vm262_vm2, %v4985_v0  ;;  %288 = vst.msk [vmem:[#allocation2 + $0x101] sm:$0x1] %vm262_vm2, %v4985_v0  ;;  %v5354_v35 = vld [vmem:[%s5203_s27 + $0xd0] sm:$0xff]  ;;  %v5365_v36 = vld [vmem:[%s5203_s27 + $0xd8] sm:$0xff] }
  0x21   : > { %289 = vst.msk [vmem:[#allocation2 + $0x119] sm:$0x1] %vm262_vm2, %v4985_v0  ;;  %290 = vst.msk [vmem:[#allocation2 + $0x131] sm:$0x1] %vm262_vm2, %v4985_v0  ;;  %v5368_v37 = vld [vmem:[%s5203_s27 + $0xe0] sm:$0xff]  ;;  %v5371_v38 = vld [vmem:[%s5203_s27 + $0xe8] sm:$0xff] }
  0x22   : > { %291 = vst.msk [vmem:[#allocation2 + $0x149] sm:$0x1] %vm262_vm2, %v4985_v0  ;;  %292 = vst.msk [vmem:[#allocation2 + $0x161] sm:$0x1] %vm262_vm2, %v4985_v0  ;;  %v399_v45 = vld [vmem:[#allocation2] sm:$0xff]  ;;  %v400_v48 = vld [vmem:[#allocation2 + $0x8] sm:$0xff] }
  0x23   : > { %293 = vst.msk [vmem:[#allocation2 + $0x179] sm:$0x1] %vm262_vm2, %v4985_v0  ;;  %294 = vst.msk [vmem:[#allocation2 + $0x191] sm:$0x1] %vm262_vm2, %v4985_v0  ;;  %s4992_s11 = smov 56   ;;  %s4993_s14 = smov 64  }
  0x24   : > { %303 = vst.msk [vmem:[#allocation3 + $0x18] sm:$0x1] %vm262_vm2, %v4985_v0  ;;  %304 = vst.msk [vmem:[#allocation3 + $0x30] sm:$0x1] %vm262_vm2, %v4985_v0 }
  0x25   : > { %305 = vst.msk [vmem:[#allocation3 + $0x48] sm:$0x1] %vm262_vm2, %v4985_v0  ;;  %306 = vst.msk [vmem:[#allocation3 + $0x60] sm:$0x1] %vm262_vm2, %v4985_v0 }
  0x26   : > { %307 = vst.msk [vmem:[#allocation3 + $0x78] sm:$0x1] %vm262_vm2, %v4985_v0  ;;  %308 = vst.msk [vmem:[#allocation3 + $0x90] sm:$0x1] %vm262_vm2, %v4985_v0 }
  0x27   : > { %309 = vst.msk [vmem:[#allocation3 + $0xa8] sm:$0x1] %vm262_vm2, %v4985_v0  ;;  %310 = vst.msk [vmem:[#allocation3 + $0xc0] sm:$0x1] %vm262_vm2, %v4985_v0 }
  0x28   : > { %311 = vst.msk [vmem:[#allocation3 + $0xd8] sm:$0x1] %vm262_vm2, %v4985_v0  ;;  %312 = vst.msk [vmem:[#allocation3 + $0xf0] sm:$0x1] %vm262_vm2, %v4985_v0 }
  0x29   : > { %313 = vst.msk [vmem:[#allocation3 + $0x108] sm:$0x1] %vm262_vm2, %v4985_v0  ;;  %314 = vst.msk [vmem:[#allocation3 + $0x120] sm:$0x1] %vm262_vm2, %v4985_v0 }
  0x2a   : > { %315 = vst.msk [vmem:[#allocation3 + $0x138] sm:$0x1] %vm262_vm2, %v4985_v0  ;;  %316 = vst.msk [vmem:[#allocation3 + $0x150] sm:$0x1] %vm262_vm2, %v4985_v0 }
  0x2b   : > { %317 = vst.msk [vmem:[#allocation3 + $0x168] sm:$0x1] %vm262_vm2, %v4985_v0  ;;  %318 = vst.msk [vmem:[#allocation3 + $0x180] sm:$0x1] %vm262_vm2, %v4985_v0 }
  0x2c   : > { %319 = vst.msk [vmem:[#allocation3 + $0x29] sm:$0x1] %vm262_vm2, %v4985_v0  ;;  %320 = vst.msk [vmem:[#allocation3 + $0x41] sm:$0x1] %vm262_vm2, %v4985_v0 }
  0x2d   : > { %321 = vst.msk [vmem:[#allocation3 + $0x59] sm:$0x1] %vm262_vm2, %v4985_v0  ;;  %322 = vst.msk [vmem:[#allocation3 + $0x71] sm:$0x1] %vm262_vm2, %v4985_v0 }
  0x2e   : > { %323 = vst.msk [vmem:[#allocation3 + $0x89] sm:$0x1] %vm262_vm2, %v4985_v0  ;;  %324 = vst.msk [vmem:[#allocation3 + $0xa1] sm:$0x1] %vm262_vm2, %v4985_v0 }
  0x2f   : > { %325 = vst.msk [vmem:[#allocation3 + $0xb9] sm:$0x1] %vm262_vm2, %v4985_v0  ;;  %326 = vst.msk [vmem:[#allocation3 + $0xd1] sm:$0x1] %vm262_vm2, %v4985_v0 }
  0x30   : > { %327 = vst.msk [vmem:[#allocation3 + $0xe9] sm:$0x1] %vm262_vm2, %v4985_v0  ;;  %328 = vst.msk [vmem:[#allocation3 + $0x101] sm:$0x1] %vm262_vm2, %v4985_v0 }
  0x31   : > { %329 = vst.msk [vmem:[#allocation3 + $0x119] sm:$0x1] %vm262_vm2, %v4985_v0  ;;  %330 = vst.msk [vmem:[#allocation3 + $0x131] sm:$0x1] %vm262_vm2, %v4985_v0 }
  0x32   : > { %331 = vst.msk [vmem:[#allocation3 + $0x149] sm:$0x1] %vm262_vm2, %v4985_v0  ;;  %332 = vst.msk [vmem:[#allocation3 + $0x161] sm:$0x1] %vm262_vm2, %v4985_v0 }
  0x33   : > { %333 = vst.msk [vmem:[#allocation3 + $0x179] sm:$0x1] %vm262_vm2, %v4985_v0  ;;  %334 = vst.msk [vmem:[#allocation3 + $0x191] sm:$0x1] %vm262_vm2, %v4985_v0 }
  0x34   : > { %7546 = vst [vmem:[#allocation5_spill] sm:$0xff] %v5206_v1  ;;  %7547 = vst [vmem:[#allocation6_spill] sm:$0xff] %v5209_v2 }
  0x35   : > { %7548 = vst [vmem:[#allocation7_spill] sm:$0xff] %v5212_v3  ;;  %367 = vst.msk [vmem:[#allocation2 + $0x19] sm:$0xff] %vm252_vm0, %v5206_v1 }
  0x36   : > { %368 = vst.msk [vmem:[#allocation2 + $0x21] sm:$0xff] %vm252_vm0, %v5209_v2  ;;  %369 = vst.msk [vmem:[#allocation2 + $0x31] sm:$0xff] %vm252_vm0, %v5212_v3 }
  0x37   : > { %7549 = vst [vmem:[#allocation8_spill] sm:$0xff] %v5221_v4  ;;  %7550 = vst [vmem:[#allocation9_spill] sm:$0xff] %v5224_v5 }
  0x38   : > { %7551 = vst [vmem:[#allocation10_spill] sm:$0xff] %v5227_v6  ;;  %370 = vst.msk [vmem:[#allocation2 + $0x39] sm:$0xff] %vm252_vm0, %v5221_v4  ;;  %v656_v4 = vld [vmem:[#allocation2 + $0x2] sm:$0xff] }
  0x39   : > { %371 = vst.msk [vmem:[#allocation2 + $0x49] sm:$0xff] %vm252_vm0, %v5224_v5  ;;  %372 = vst.msk [vmem:[#allocation2 + $0x51] sm:$0xff] %vm252_vm0, %v5227_v6  ;;  %v5593_v6 = vld [vmem:[%s5203_s27 + $0xf8] sm:$0xff] }
  0x3a   : > { %7552 = vst [vmem:[#allocation11_spill] sm:$0xff] %v5236_v9  ;;  %373 = vst.msk [vmem:[#allocation2 + $0x61] sm:$0xff] %vm252_vm0, %v5236_v9 }
  0x3b   : > { %7553 = vst [vmem:[#allocation12_spill] sm:$0xff] %v5242_v10  ;;  %7554 = vst [vmem:[#allocation13_spill] sm:$0xff] %v5245_v11 }
  0x3c   : > { %7555 = vst [vmem:[#allocation14_spill] sm:$0xff] %v5248_v12  ;;  %374 = vst.msk [vmem:[#allocation2 + $0x69] sm:$0xff] %vm252_vm0, %v5242_v10  ;;  %v5311_v25 = vld [vmem:[#allocation2 + $0x19] sm:$0xff]  ;;  %v5584_v10 = vld [vmem:[%s5203_s27 + $0xf0] sm:$0xff] }
  0x3d   : > { %375 = vst.msk [vmem:[#allocation2 + $0x79] sm:$0xff] %vm252_vm0, %v5245_v11  ;;  %376 = vst.msk [vmem:[#allocation2 + $0x81] sm:$0xff] %vm252_vm0, %v5248_v12  ;;  %v5313_v26 = vld [vmem:[#allocation2 + $0x31] sm:$0xff]  ;;  %531 = vrot.lane.b32.xlu1 %v5311_v25, %s4986_s28  ;;  %v5323_v27 = vld [vmem:[#allocation2 + $0x21] sm:$0xff] }
  0x3e   : > { %7556 = vst [vmem:[#allocation15_spill] sm:$0xff] %v5257_v13  ;;  %7557 = vst [vmem:[#allocation16_spill] sm:$0xff] %v5260_v14  ;;  %535 = vrot.lane.b32.xlu0 %v5313_v26, %s4986_s28  ;;  %v5406_v47 = vld [vmem:[#allocation2 + $0x18] sm:$0xff]  ;;  %v5413_v49 = vld [vmem:[#allocation2 + $0x20] sm:$0xff] }
  0x3f   : > { %7558 = vst [vmem:[#allocation17_spill] sm:$0xff] %v5263_v15  ;;  %377 = vst.msk [vmem:[#allocation2 + $0x91] sm:$0xff] %vm252_vm0, %v5257_v13  ;;  %v5341_v31 = vld [vmem:[#allocation2 + $0x39] sm:$0xff]  ;;  %v5415_v50 = vld [vmem:[#allocation2 + $0x30] sm:$0xff] }
  0x40   : > { %378 = vst.msk [vmem:[#allocation2 + $0x99] sm:$0xff] %vm252_vm0, %v5260_v14  ;;  %379 = vst.msk [vmem:[#allocation2 + $0xa9] sm:$0xff] %vm252_vm0, %v5263_v15  ;;  %v5337_v30 = vld [vmem:[#allocation2 + $0x49] sm:$0xff]  ;;  %v5373_v39 = vld [vmem:[#allocation2 + $0x51] sm:$0xff] }
  0x41   : > { %7559 = vst [vmem:[#allocation18_spill] sm:$0xff] %v5272_v16  ;;  %7560 = vst [vmem:[#allocation19_spill] sm:$0xff] %v5275_v17  ;;  %533 = vrot.lane.b32.xlu1 %v5323_v27, %s4986_s28  ;;  %v5345_v32 = vld [vmem:[#allocation2 + $0x61] sm:$0xff]  ;;  %v5423_v52 = vld [vmem:[#allocation2 + $0x38] sm:$0xff] }
  0x42   : > { %7561 = vst [vmem:[#allocation20_spill] sm:$0xff] %v5278_v18  ;;  %380 = vst.msk [vmem:[#allocation2 + $0xb1] sm:$0xff] %vm252_vm0, %v5272_v16  ;;  %539 = vrot.lane.b32.xlu0 %v5337_v30, %s4986_s28  ;;  %v5431_v54 = vld [vmem:[#allocation2 + $0x48] sm:$0xff]  ;;  %v5433_v55 = vld [vmem:[#allocation2 + $0x50] sm:$0xff] }
  0x43   : > { %381 = vst.msk [vmem:[#allocation2 + $0xc1] sm:$0xff] %vm252_vm0, %v5275_v17  ;;  %382 = vst.msk [vmem:[#allocation2 + $0xc9] sm:$0xff] %vm252_vm0, %v5278_v18  ;;  %v5387_v41 = vld [vmem:[#allocation2 + $0x69] sm:$0xff]  ;;  %v5441_v57 = vld [vmem:[#allocation2 + $0x60] sm:$0xff] }
  0x44   : > { %7562 = vst [vmem:[#allocation21_spill] sm:$0xff] %v5287_v19  ;;  %7563 = vst [vmem:[#allocation22_spill] sm:$0xff] %v5290_v20  ;;  %v5383_v40 = vld [vmem:[#allocation2 + $0x79] sm:$0xff]  ;;  %v5395_v43 = vld [vmem:[#allocation2 + $0x81] sm:$0xff] }
  0x45   : > { %7564 = vst [vmem:[#allocation23_spill] sm:$0xff] %v5293_v21  ;;  %383 = vst.msk [vmem:[#allocation2 + $0xd9] sm:$0xff] %vm252_vm0, %v5287_v19  ;;  %537 = vrot.lane.b32.xlu1 %v5341_v31, %s4986_s28  ;;  %v5443_v58 = vld [vmem:[#allocation2 + $0x68] sm:$0xff]  ;;  %v5445_v59 = vld [vmem:[#allocation2 + $0x78] sm:$0xff] }
  0x46   : > { %384 = vst.msk [vmem:[#allocation2 + $0xe1] sm:$0xff] %vm252_vm0, %v5290_v20  ;;  %385 = vst.msk [vmem:[#allocation2 + $0xf1] sm:$0xff] %vm252_vm0, %v5293_v21  ;;  %543 = vrot.lane.b32.xlu0 %v5345_v32, %s4986_s28  ;;  %v5391_v42 = vld [vmem:[#allocation2 + $0x91] sm:$0xff]  ;;  %v5455_v60 = vld [vmem:[#allocation2 + $0x80] sm:$0xff] }
  0x47   : > { %7565 = vst [vmem:[#allocation24_spill] sm:$0xff] %v5303_v22  ;;  %7566 = vst [vmem:[#allocation25_spill] sm:$0xff] %v5306_v23  ;;  %v5399_v44 = vld [vmem:[#allocation2 + $0xa9] sm:$0xff]  ;;  %v5403_v46 = vld [vmem:[#allocation2 + $0x99] sm:$0xff] }
  0x48   : > { %7567 = vst [vmem:[#allocation26_spill] sm:$0xff] %v5309_v24  ;;  %386 = vst.msk [vmem:[#allocation2 + $0xf9] sm:$0xff] %vm252_vm0, %v5303_v22  ;;  %v5457_v61 = vld [vmem:[#allocation2 + $0x90] sm:$0xff]  ;;  %v5459_v62 = vld [vmem:[#allocation2 + $0x98] sm:$0xff] }
  0x49   : > { %387 = vst.msk [vmem:[#allocation2 + $0x109] sm:$0xff] %vm252_vm0, %v5306_v23  ;;  %388 = vst.msk [vmem:[#allocation2 + $0x111] sm:$0xff] %vm252_vm0, %v5309_v24  ;;  %541 = vrot.lane.b32.xlu1 %v5373_v39, %s4986_s28  ;;  %v5427_v53 = vld [vmem:[#allocation2 + $0xb1] sm:$0xff]  ;;  %v5469_v0 = vld [vmem:[#allocation2 + $0xa8] sm:$0xff] }
  0x4a   : > { %7568 = vst [vmem:[#allocation27_spill] sm:$0xff] %v5326_v28  ;;  %7569 = vst [vmem:[#allocation28_spill] sm:$0xff] %v5329_v29  ;;  %547 = vrot.lane.b32.xlu0 %v5383_v40, %s4986_s28  ;;  %v5417_v51 = vld [vmem:[#allocation2 + $0xc1] sm:$0xff]  ;;  %v5461_v63 = vld [vmem:[#allocation2 + $0xc9] sm:$0xff] }
  0x4b   : > { %389 = vst.msk [vmem:[#allocation2 + $0x121] sm:$0xff] %vm252_vm0, %v5326_v28  ;;  %390 = vst.msk [vmem:[#allocation2 + $0x129] sm:$0xff] %vm252_vm0, %v5329_v29  ;;  %v5471_v7 = vld [vmem:[#allocation2 + $0xb0] sm:$0xff]  ;;  %v5473_v8 = vld [vmem:[#allocation2 + $0xc0] sm:$0xff] }
  0x4c   : > { %7570 = vst [vmem:[#allocation29_spill] sm:$0xff] %v5348_v33  ;;  %7571 = vst [vmem:[#allocation30_spill] sm:$0xff] %v5351_v34  ;;  %v5435_v56 = vld [vmem:[#allocation2 + $0xd9] sm:$0xff] }
  0x4d   : > { %7572 = vst [vmem:[#allocation31_spill] sm:$0xff] %v5354_v35  ;;  %391 = vst.msk [vmem:[#allocation2 + $0x139] sm:$0xff] %vm252_vm0, %v5348_v33  ;;  %545 = vrot.lane.b32.xlu1 %v5387_v41, %s4986_s28  ;;  %v5523_v23 = vld [vmem:[#allocation2 + $0xe1] sm:$0xff]  ;;  %v5614_v2 = vld [vmem:[#allocation2 + $0x32] sm:$0xff] }
  0x4e   : > { %392 = vst.msk [vmem:[#allocation2 + $0x141] sm:$0xff] %vm252_vm0, %v5351_v34  ;;  %393 = vst.msk [vmem:[#allocation2 + $0x151] sm:$0xff] %vm252_vm0, %v5354_v35  ;;  %551 = vrot.lane.b32.xlu0 %v5391_v42, %s4986_s28  ;;  %v5511_v34 = vld [vmem:[#allocation2 + $0xf1] sm:$0xff]  ;;  %v5608_v1 = vld [vmem:[#allocation2 + $0x1a] sm:$0xff] }
  0x4f   : > { %7573 = vst [vmem:[#allocation32_spill] sm:$0xff] %v5365_v36  ;;  %7574 = vst [vmem:[#allocation33_spill] sm:$0xff] %v5368_v37  ;;  %v5497_v35 = vld [vmem:[#allocation2 + $0xf8] sm:$0xff] }
  0x50   : > { %7575 = vst [vmem:[#allocation34_spill] sm:$0xff] %v5371_v38  ;;  %394 = vst.msk [vmem:[#allocation2 + $0x159] sm:$0xff] %vm252_vm0, %v5365_v36  ;;  %v5499_v36 = vld [vmem:[#allocation2 + $0x108] sm:$0xff]  ;;  %v5509_v33 = vld [vmem:[#allocation2 + $0x110] sm:$0xff] }
  0x51   : > { %395 = vst.msk [vmem:[#allocation2 + $0x169] sm:$0xff] %vm252_vm0, %v5368_v37  ;;  %396 = vst.msk [vmem:[#allocation2 + $0x171] sm:$0xff] %vm252_vm0, %v5371_v38  ;;  %549 = vrot.lane.b32.xlu1 %v5395_v43, %s4986_s28  ;;  %v5487_v37 = vld [vmem:[#allocation2 + $0xe0] sm:$0xff]  ;;  %v5495_v38 = vld [vmem:[#allocation2 + $0xf0] sm:$0xff] }
  0x52   : > { %431 = vst.msk [vmem:[#allocation4] sm:$0xff] %vm252_vm0, %v399_v45  ;;  %555 = vrot.lane.b32.xlu0 %v5399_v44, %s4986_s28  ;;  %433 = vst.msk [vmem:[#allocation4 + $0x10] sm:$0xff] %vm252_vm0, %v5406_v47  ;;  %v5483_v45 = vld [vmem:[#allocation2 + $0xc8] sm:$0xff]  ;;  %v5515_v28 = vld [vmem:[#allocation2 + $0x120] sm:$0xff] }
  0x53   : > { %432 = vst.msk [vmem:[#allocation4 + $0x8] sm:$0xff] %vm252_vm0, %v400_v48  ;;  %434 = vst.msk [vmem:[#allocation4 + $0x18] sm:$0xff] %vm252_vm0, %v5413_v49  ;;  %v5485_v48 = vld [vmem:[#allocation2 + $0xd8] sm:$0xff]  ;;  %v5521_v29 = vld [vmem:[#allocation2 + $0x128] sm:$0xff] }
  0x54   : > { %435 = vst.msk [vmem:[#allocation4 + $0x20] sm:$0xff] %vm252_vm0, %v5415_v50  ;;  %436 = vst.msk [vmem:[#allocation4 + $0x28] sm:$0xff] %vm252_vm0, %v5423_v52  ;;  %v5529_v24 = vld [vmem:[#allocation2 + $0x109] sm:$0xff]  ;;  %v5531_v21 = vld [vmem:[#allocation2 + $0x138] sm:$0xff] }
  0x55   : > { %553 = vrot.lane.b32.xlu1 %v5403_v46, %s4986_s28  ;;  %437 = vst.msk [vmem:[#allocation4 + $0x30] sm:$0xff] %vm252_vm0, %v5431_v54  ;;  %438 = vst.msk [vmem:[#allocation4 + $0x38] sm:$0xff] %vm252_vm0, %v5433_v55  ;;  %v5537_v22 = vld [vmem:[#allocation2 + $0x140] sm:$0xff]  ;;  %v5547_v17 = vld [vmem:[#allocation2 + $0x150] sm:$0xff] }
  0x56   : > { %559 = vrot.lane.b32.xlu0 %v5417_v51, %s4986_s28  ;;  %439 = vst.msk [vmem:[#allocation4 + $0x40] sm:$0xff] %vm252_vm0, %v5441_v57  ;;  %440 = vst.msk [vmem:[#allocation4 + $0x48] sm:$0xff] %vm252_vm0, %v5443_v58  ;;  %v5539_v19 = vld [vmem:[#allocation2 + $0xf9] sm:$0xff]  ;;  %v5545_v20 = vld [vmem:[#allocation2 + $0x121] sm:$0xff] }
  0x57   : > { %441 = vst.msk [vmem:[#allocation4 + $0x50] sm:$0xff] %vm252_vm0, %v5445_v59  ;;  %442 = vst.msk [vmem:[#allocation4 + $0x58] sm:$0xff] %vm252_vm0, %v5455_v60  ;;  %v5553_v18 = vld [vmem:[#allocation2 + $0x158] sm:$0xff]  ;;  %v5571_v11 = vld [vmem:[#allocation2 + $0x129] sm:$0xff] }
  0x58   : > { %443 = vst.msk [vmem:[#allocation4 + $0x60] sm:$0xff] %vm252_vm0, %v5457_v61  ;;  %444 = vst.msk [vmem:[#allocation4 + $0x68] sm:$0xff] %vm252_vm0, %v5459_v62  ;;  %v5555_v15 = vld [vmem:[#allocation2 + $0x111] sm:$0xff]  ;;  %v5561_v16 = vld [vmem:[#allocation2 + $0x139] sm:$0xff] }
  0x59   : > { %557 = vrot.lane.b32.xlu1 %v5427_v53, %s4986_s28  ;;  %445 = vst.msk [vmem:[#allocation4 + $0x70] sm:$0xff] %vm252_vm0, %v5469_v0  ;;  %446 = vst.msk [vmem:[#allocation4 + $0x78] sm:$0xff] %vm252_vm0, %v5471_v7  ;;  %v5563_v13 = vld [vmem:[#allocation2 + $0x168] sm:$0xff]  ;;  %v5569_v14 = vld [vmem:[#allocation2 + $0x170] sm:$0xff] }
  0x5a   : > { %447 = vst.msk [vmem:[#allocation4 + $0x80] sm:$0xff] %vm252_vm0, %v5473_v8  ;;  %448 = vst.msk [vmem:[#allocation4 + $0x88] sm:$0xff] %vm252_vm0, %v5483_v45  ;;  %563 = vrot.lane.b32.xlu0 %v5435_v56, %s4986_s28  ;;  %v5577_v12 = vld [vmem:[#allocation2 + $0x151] sm:$0xff]  ;;  %v5581_v9 = vld [vmem:[#allocation2 + $0x141] sm:$0xff] }
  0x5b   : > { %449 = vst.msk [vmem:[#allocation4 + $0x90] sm:$0xff] %vm252_vm0, %v5485_v48  ;;  %450 = vst.msk [vmem:[#allocation4 + $0x98] sm:$0xff] %vm252_vm0, %v5487_v37  ;;  %v5590_v5 = vld [vmem:[#allocation2 + $0x169] sm:$0xff]  ;;  %v5599_v3 = vld [vmem:[#allocation2 + $0x159] sm:$0xff] }
  0x5c   : > { %451 = vst.msk [vmem:[#allocation4 + $0xa0] sm:$0xff] %vm252_vm0, %v5495_v38  ;;  %452 = vst.msk [vmem:[#allocation4 + $0xa8] sm:$0xff] %vm252_vm0, %v5497_v35 }
  0x5d   : > { %453 = vst.msk [vmem:[#allocation4 + $0xb0] sm:$0xff] %vm252_vm0, %v5499_v36  ;;  %454 = vst.msk [vmem:[#allocation4 + $0xb8] sm:$0xff] %vm252_vm0, %v5509_v33  ;;  %561 = vrot.lane.b32.xlu1 %v5461_v63, %s4986_s28 }
  0x5e   : > { %455 = vst.msk [vmem:[#allocation4 + $0xc0] sm:$0xff] %vm252_vm0, %v5515_v28  ;;  %456 = vst.msk [vmem:[#allocation4 + $0xc8] sm:$0xff] %vm252_vm0, %v5521_v29  ;;  %567 = vrot.lane.b32.xlu0 %v5511_v34, %s4986_s28 }
  0x5f   : > { %457 = vst.msk [vmem:[#allocation4 + $0xd0] sm:$0xff] %vm252_vm0, %v5531_v21  ;;  %458 = vst.msk [vmem:[#allocation4 + $0xd8] sm:$0xff] %vm252_vm0, %v5537_v22 }
  0x60   : > { %459 = vst.msk [vmem:[#allocation4 + $0xe0] sm:$0xff] %vm252_vm0, %v5547_v17  ;;  %460 = vst.msk [vmem:[#allocation4 + $0xe8] sm:$0xff] %vm252_vm0, %v5553_v18 }
  0x61   : > { %565 = vrot.lane.b32.xlu1 %v5523_v23, %s4986_s28  ;;  %461 = vst.msk [vmem:[#allocation4 + $0xf0] sm:$0xff] %vm252_vm0, %v5563_v13  ;;  %462 = vst.msk [vmem:[#allocation4 + $0xf8] sm:$0xff] %vm252_vm0, %v5569_v14 }
  0x62   : > { %571 = vrot.lane.b32.xlu0 %v5529_v24, %s4986_s28  ;;  %7576 = vst [vmem:[#allocation35_spill] sm:$0xff] %v5581_v9  ;;  %7577 = vst [vmem:[#allocation36_spill] sm:$0xff] %v5584_v10 }
  0x63   : > { %397 = vst.msk [vmem:[#allocation2 + $0x181] sm:$0xff] %vm252_vm0, %v5584_v10  ;;  %7578 = vst [vmem:[#allocation37_spill] sm:$0xff] %v5590_v5  ;;  %v5605_v10 = vld [vmem:[#allocation2 + $0x171] sm:$0xff] }
  0x64   : > { %7579 = vst [vmem:[#allocation38_spill] sm:$0xff] %v5593_v6  ;;  %398 = vst.msk [vmem:[#allocation2 + $0x189] sm:$0xff] %vm252_vm0, %v5593_v6  ;;  %v657_v6 = vld [vmem:[#allocation2 + $0xa] sm:$0xff] }
  0x65   : > { %569 = vrot.lane.b32.xlu1 %v5539_v19, %s4986_s28  ;;  %7580 = vst [vmem:[#allocation39_spill] sm:$0xff] %v5599_v3  ;;  %7581 = vst [vmem:[#allocation40_spill] sm:$0xff] %v5605_v10 }
  0x66   : > { %575 = vrot.lane.b32.xlu0 %v5545_v20, %s4986_s28  ;;  %7582 = vst [vmem:[#allocation41_spill] sm:$0xff] %v5608_v1  ;;  %7583 = vst [vmem:[#allocation42_spill] sm:$0xff] %v5614_v2 }
  0x69   : > { %573 = vrot.lane.b32.xlu1 %v5555_v15, %s4986_s28 }
  0x6a   : > { %579 = vrot.lane.b32.xlu0 %v5561_v16, %s4986_s28 }
  0x6d   : > { %577 = vrot.lane.b32.xlu1 %v5571_v11, %s4986_s28 }
  0x6e   : > { %583 = vrot.lane.b32.xlu0 %v5577_v12, %s4986_s28 }
  0x71   : > { %581 = vrot.lane.b32.xlu1 %v5581_v9, %s4986_s28 }
  0x72   : > { %587 = vrot.lane.b32.xlu0 %v5590_v5, %s4986_s28  ;;  %v5617_v5 = vld [vmem:[#allocation2 + $0x22] sm:$0xff] }
  0x73   : > { %7584 = vst [vmem:[#allocation43_spill] sm:$0xff] %v5617_v5 }
  0x75   : > { %585 = vrot.lane.b32.xlu1 %v5599_v3, %s4986_s28  ;;  %v5621_v3 = vld [vmem:[#allocation2 + $0x4a] sm:$0xff] }
  0x76   : > { %720 = vrot.lane.b32.xlu0 %v656_v4, %s4987_s29  ;;  %7585 = vst [vmem:[#allocation44_spill] sm:$0xff] %v5621_v3  ;;  %v5625_v4 = vld [vmem:[#allocation2 + $0x3a] sm:$0xff] }
  0x77   : > { %7586 = vst [vmem:[#allocation45_spill] sm:$0xff] %v5625_v4 }
  0x79   : > { %589 = vrot.lane.b32.xlu1 %v5605_v10, %s4986_s28  ;;  %v5715_v10 = vld [vmem:[#allocation2 + $0x142] sm:$0xff] }
  0x7a   : > { %724 = vrot.lane.b32.xlu0 %v5608_v1, %s4987_s29  ;;  %v5629_v1 = vld [vmem:[#allocation2 + $0x62] sm:$0xff]  ;;  %7607 = vst [vmem:[#allocation66_spill] sm:$0xff] %v5715_v10 }
  0x7b   : > { %7587 = vst [vmem:[#allocation46_spill] sm:$0xff] %v5629_v1 }
  0x7d   : > { %722 = vrot.lane.b32.xlu1 %v657_v6, %s4987_s29  ;;  %v5633_v6 = vld [vmem:[#allocation2 + $0x52] sm:$0xff] }
  0x7e   : > { %728 = vrot.lane.b32.xlu0 %v5614_v2, %s4987_s29  ;;  %7588 = vst [vmem:[#allocation47_spill] sm:$0xff] %v5633_v6  ;;  %v5637_v2 = vld [vmem:[#allocation2 + $0x7a] sm:$0xff] }
  0x7f   : > { %7589 = vst [vmem:[#allocation48_spill] sm:$0xff] %v5637_v2 }
  0x81   : > { %726 = vrot.lane.b32.xlu1 %v5617_v5, %s4987_s29  ;;  %v5641_v5 = vld [vmem:[#allocation2 + $0x6a] sm:$0xff] }
  0x82   : > { %732 = vrot.lane.b32.xlu0 %v5621_v3, %s4987_s29  ;;  %7590 = vst [vmem:[#allocation49_spill] sm:$0xff] %v5641_v5  ;;  %v5645_v3 = vld [vmem:[#allocation2 + $0x92] sm:$0xff] }
  0x83   : > { %7591 = vst [vmem:[#allocation50_spill] sm:$0xff] %v5645_v3 }
  0x85   : > { %730 = vrot.lane.b32.xlu1 %v5625_v4, %s4987_s29  ;;  %v5649_v4 = vld [vmem:[#allocation2 + $0x82] sm:$0xff] }
  0x86   : > { %736 = vrot.lane.b32.xlu0 %v5629_v1, %s4987_s29  ;;  %7592 = vst [vmem:[#allocation51_spill] sm:$0xff] %v5649_v4  ;;  %v5653_v1 = vld [vmem:[#allocation2 + $0xaa] sm:$0xff] }
  0x87   : > { %7593 = vst [vmem:[#allocation52_spill] sm:$0xff] %v5653_v1 }
  0x89   : > { %734 = vrot.lane.b32.xlu1 %v5633_v6, %s4987_s29  ;;  %v5657_v6 = vld [vmem:[#allocation2 + $0x9a] sm:$0xff] }
  0x8a   : > { %740 = vrot.lane.b32.xlu0 %v5637_v2, %s4987_s29  ;;  %7594 = vst [vmem:[#allocation53_spill] sm:$0xff] %v5657_v6  ;;  %v5661_v2 = vld [vmem:[#allocation2 + $0xc2] sm:$0xff] }
  0x8b   : > { %7595 = vst [vmem:[#allocation54_spill] sm:$0xff] %v5661_v2 }
  0x8d   : > { %738 = vrot.lane.b32.xlu1 %v5641_v5, %s4987_s29  ;;  %v5665_v5 = vld [vmem:[#allocation2 + $0xb2] sm:$0xff] }
  0x8e   : > { %744 = vrot.lane.b32.xlu0 %v5645_v3, %s4987_s29  ;;  %7596 = vst [vmem:[#allocation55_spill] sm:$0xff] %v5665_v5  ;;  %v5669_v3 = vld [vmem:[#allocation2 + $0xda] sm:$0xff] }
  0x8f   : > { %7597 = vst [vmem:[#allocation56_spill] sm:$0xff] %v5669_v3 }
  0x91   : > { %742 = vrot.lane.b32.xlu1 %v5649_v4, %s4987_s29  ;;  %v5673_v4 = vld [vmem:[#allocation2 + $0xca] sm:$0xff] }
  0x92   : > { %748 = vrot.lane.b32.xlu0 %v5653_v1, %s4987_s29  ;;  %7598 = vst [vmem:[#allocation57_spill] sm:$0xff] %v5673_v4  ;;  %v5677_v1 = vld [vmem:[#allocation2 + $0xf2] sm:$0xff] }
  0x93   : > { %7599 = vst [vmem:[#allocation58_spill] sm:$0xff] %v5677_v1 }
  0x95   : > { %746 = vrot.lane.b32.xlu1 %v5657_v6, %s4987_s29  ;;  %v5681_v6 = vld [vmem:[#allocation2 + $0xe2] sm:$0xff] }
  0x96   : > { %752 = vrot.lane.b32.xlu0 %v5661_v2, %s4987_s29  ;;  %7600 = vst [vmem:[#allocation59_spill] sm:$0xff] %v5681_v6  ;;  %v5685_v2 = vld [vmem:[#allocation2 + $0x10a] sm:$0xff] }
  0x97   : > { %7601 = vst [vmem:[#allocation60_spill] sm:$0xff] %v5685_v2 }
  0x99   : > { %750 = vrot.lane.b32.xlu1 %v5665_v5, %s4987_s29  ;;  %v5689_v5 = vld [vmem:[#allocation2 + $0xfa] sm:$0xff] }
  0x9a   : > { %756 = vrot.lane.b32.xlu0 %v5669_v3, %s4987_s29  ;;  %7602 = vst [vmem:[#allocation61_spill] sm:$0xff] %v5689_v5  ;;  %v5693_v3 = vld [vmem:[#allocation2 + $0x122] sm:$0xff] }
  0x9b   : > { %7603 = vst [vmem:[#allocation62_spill] sm:$0xff] %v5693_v3 }
  0x9d   : > { %754 = vrot.lane.b32.xlu1 %v5673_v4, %s4987_s29  ;;  %v5697_v4 = vld [vmem:[#allocation2 + $0x112] sm:$0xff] }
  0x9e   : > { %760 = vrot.lane.b32.xlu0 %v5677_v1, %s4987_s29  ;;  %7604 = vst [vmem:[#allocation63_spill] sm:$0xff] %v5697_v4  ;;  %v5701_v1 = vld [vmem:[#allocation2 + $0x13a] sm:$0xff] }
  0x9f   : > { %7605 = vst [vmem:[#allocation64_spill] sm:$0xff] %v5701_v1 }
  0xa1   : > { %758 = vrot.lane.b32.xlu1 %v5681_v6, %s4987_s29  ;;  %v528_v6 = vpop.permute.xlu0 %527 }
  0xa2   : > { %764 = vrot.lane.b32.xlu0 %v5685_v2, %s4987_s29  ;;  %624 = vst.msk [vmem:[#allocation4] sm:$0xff] %vm623_vm3, %v528_v6  ;;  %v5706_v2 = vld [vmem:[#allocation2 + $0x12a] sm:$0xff] }
  0xa3   : > { %7606 = vst [vmem:[#allocation65_spill] sm:$0xff] %v5706_v2  ;;  %v5720_v6 = vld [vmem:[#allocation2 + $0x16a] sm:$0xff] }
  0xa5   : > { %762 = vrot.lane.b32.xlu1 %v5689_v5, %s4987_s29  ;;  %v5710_v5 = vld [vmem:[#allocation2 + $0x152] sm:$0xff] }
  0xa6   : > { %768 = vrot.lane.b32.xlu0 %v5693_v3, %s4987_s29  ;;  %v530_v3 = vpop.permute.xlu0 %529 }
  0xa7   : > { %625 = vst.msk [vmem:[#allocation4 + $0x8] sm:$0xff] %vm623_vm3, %v530_v3 }
  0xa9   : > { %766 = vrot.lane.b32.xlu1 %v5697_v4, %s4987_s29 }
  0xaa   : > { %772 = vrot.lane.b32.xlu0 %v5701_v1, %s4987_s29 }
  0xad   : > { %770 = vrot.lane.b32.xlu1 %v5706_v2, %s4987_s29  ;;  %v5725_v2 = vld [vmem:[#allocation2 + $0x15a] sm:$0xff] }
  0xae   : > { %776 = vrot.lane.b32.xlu0 %v5710_v5, %s4987_s29 }
  0xaf   : > { %v532_v9 = vpop.permute.xlu1 %531 }
  0xb0   : > { %626 = vst.msk [vmem:[#allocation4 + $0x10] sm:$0xff] %vm623_vm3, %v532_v9  ;;  %v536_v1 = vpop.permute.xlu0 %535  ;;  %v5733_v9 = vld [vmem:[#allocation2 + $0x172] sm:$0xff] }
  0xb1   : > { %774 = vrot.lane.b32.xlu1 %v5715_v10, %s4987_s29  ;;  %628 = vst.msk [vmem:[#allocation4 + $0x20] sm:$0xff] %vm623_vm3, %v536_v1 }
  0xb2   : > { %780 = vrot.lane.b32.xlu0 %v5720_v6, %s4987_s29 }
  0xb3   : > { %v534_v4 = vpop.permute.xlu1 %533 }
  0xb4   : > { %627 = vst.msk [vmem:[#allocation4 + $0x18] sm:$0xff] %vm623_vm3, %v534_v4  ;;  %v540_v3 = vpop.permute.xlu0 %539 }
  0xb5   : > { %778 = vrot.lane.b32.xlu1 %v5725_v2, %s4987_s29  ;;  %630 = vst.msk [vmem:[#allocation4 + $0x30] sm:$0xff] %vm623_vm3, %v540_v3 }
  0xb6   : > { %913 = vrot.lane.b32.xlu0 %v5406_v47, %s4988_s30 }
  0xb7   : > { %v538_v10 = vpop.permute.xlu1 %537 }
  0xb8   : > { %629 = vst.msk [vmem:[#allocation4 + $0x28] sm:$0xff] %vm623_vm3, %v538_v10  ;;  %v544_v1 = vpop.permute.xlu0 %543 }
  0xb9   : > { %782 = vrot.lane.b32.xlu1 %v5733_v9, %s4987_s29  ;;  %632 = vst.msk [vmem:[#allocation4 + $0x40] sm:$0xff] %vm623_vm3, %v544_v1 }
  0xba   : > { %917 = vrot.lane.b32.xlu0 %v5415_v50, %s4988_s30 }
  0xbb   : > { %v542_v4 = vpop.permute.xlu1 %541 }
  0xbc   : > { %631 = vst.msk [vmem:[#allocation4 + $0x38] sm:$0xff] %vm623_vm3, %v542_v4  ;;  %v548_v3 = vpop.permute.xlu0 %547 }
  0xbd   : > { %915 = vrot.lane.b32.xlu1 %v5413_v49, %s4988_s30  ;;  %634 = vst.msk [vmem:[#allocation4 + $0x50] sm:$0xff] %vm623_vm3, %v548_v3 }
  0xbe   : > { %921 = vrot.lane.b32.xlu0 %v5431_v54, %s4988_s30 }
  0xbf   : > { %v546_v47 = vpop.permute.xlu1 %545 }
  0xc0   : > { %633 = vst.msk [vmem:[#allocation4 + $0x48] sm:$0xff] %vm623_vm3, %v546_v47  ;;  %v552_v10 = vpop.permute.xlu0 %551 }
  0xc1   : > { %919 = vrot.lane.b32.xlu1 %v5423_v52, %s4988_s30  ;;  %636 = vst.msk [vmem:[#allocation4 + $0x60] sm:$0xff] %vm623_vm3, %v552_v10 }
  0xc2   : > { %925 = vrot.lane.b32.xlu0 %v5441_v57, %s4988_s30 }
  0xc3   : > { %v550_v1 = vpop.permute.xlu1 %549 }
  0xc4   : > { %635 = vst.msk [vmem:[#allocation4 + $0x58] sm:$0xff] %vm623_vm3, %v550_v1  ;;  %v556_v49 = vpop.permute.xlu0 %555 }
  0xc5   : > { %923 = vrot.lane.b32.xlu1 %v5433_v55, %s4988_s30  ;;  %638 = vst.msk [vmem:[#allocation4 + $0x70] sm:$0xff] %vm623_vm3, %v556_v49 }
  0xc6   : > { %929 = vrot.lane.b32.xlu0 %v5445_v59, %s4988_s30 }
  0xc7   : > { %v554_v4 = vpop.permute.xlu1 %553 }
  0xc8   : > { %637 = vst.msk [vmem:[#allocation4 + $0x68] sm:$0xff] %vm623_vm3, %v554_v4  ;;  %v560_v3 = vpop.permute.xlu0 %559 }
  0xc9   : > { %927 = vrot.lane.b32.xlu1 %v5443_v58, %s4988_s30  ;;  %640 = vst.msk [vmem:[#allocation4 + $0x80] sm:$0xff] %vm623_vm3, %v560_v3 }
  0xca   : > { %933 = vrot.lane.b32.xlu0 %v5457_v61, %s4988_s30 }
  0xcb   : > { %v558_v47 = vpop.permute.xlu1 %557 }
  0xcc   : > { %639 = vst.msk [vmem:[#allocation4 + $0x78] sm:$0xff] %vm623_vm3, %v558_v47  ;;  %v564_v10 = vpop.permute.xlu0 %563 }
  0xcd   : > { %931 = vrot.lane.b32.xlu1 %v5455_v60, %s4988_s30  ;;  %642 = vst.msk [vmem:[#allocation4 + $0x90] sm:$0xff] %vm623_vm3, %v564_v10 }
  0xce   : > { %937 = vrot.lane.b32.xlu0 %v5469_v0, %s4988_s30 }
  0xcf   : > { %v562_v1 = vpop.permute.xlu1 %561 }
  0xd0   : > { %641 = vst.msk [vmem:[#allocation4 + $0x88] sm:$0xff] %vm623_vm3, %v562_v1  ;;  %v568_v49 = vpop.permute.xlu0 %567 }
  0xd1   : > { %935 = vrot.lane.b32.xlu1 %v5459_v62, %s4988_s30  ;;  %644 = vst.msk [vmem:[#allocation4 + $0xa0] sm:$0xff] %vm623_vm3, %v568_v49 }
  0xd2   : > { %941 = vrot.lane.b32.xlu0 %v5473_v8, %s4988_s30 }
  0xd3   : > { %v566_v4 = vpop.permute.xlu1 %565 }
  0xd4   : > { %643 = vst.msk [vmem:[#allocation4 + $0x98] sm:$0xff] %vm623_vm3, %v566_v4  ;;  %v572_v3 = vpop.permute.xlu0 %571 }
  0xd5   : > { %939 = vrot.lane.b32.xlu1 %v5471_v7, %s4988_s30  ;;  %646 = vst.msk [vmem:[#allocation4 + $0xb0] sm:$0xff] %vm623_vm3, %v572_v3 }
  0xd6   : > { %945 = vrot.lane.b32.xlu0 %v5485_v48, %s4988_s30 }
  0xd7   : > { %v570_v47 = vpop.permute.xlu1 %569 }
  0xd8   : > { %645 = vst.msk [vmem:[#allocation4 + $0xa8] sm:$0xff] %vm623_vm3, %v570_v47  ;;  %v576_v10 = vpop.permute.xlu0 %575 }
  0xd9   : > { %943 = vrot.lane.b32.xlu1 %v5483_v45, %s4988_s30  ;;  %648 = vst.msk [vmem:[#allocation4 + $0xc0] sm:$0xff] %vm623_vm3, %v576_v10 }
  0xda   : > { %949 = vrot.lane.b32.xlu0 %v5495_v38, %s4988_s30 }
  0xdb   : > { %v574_v1 = vpop.permute.xlu1 %573 }
  0xdc   : > { %647 = vst.msk [vmem:[#allocation4 + $0xb8] sm:$0xff] %vm623_vm3, %v574_v1  ;;  %v580_v49 = vpop.permute.xlu0 %579 }
  0xdd   : > { %947 = vrot.lane.b32.xlu1 %v5487_v37, %s4988_s30  ;;  %650 = vst.msk [vmem:[#allocation4 + $0xd0] sm:$0xff] %vm623_vm3, %v580_v49 }
  0xde   : > { %953 = vrot.lane.b32.xlu0 %v5499_v36, %s4988_s30 }
  0xdf   : > { %v578_v4 = vpop.permute.xlu1 %577 }
  0xe0   : > { %649 = vst.msk [vmem:[#allocation4 + $0xc8] sm:$0xff] %vm623_vm3, %v578_v4  ;;  %v584_v3 = vpop.permute.xlu0 %583 }
  0xe1   : > { %951 = vrot.lane.b32.xlu1 %v5497_v35, %s4988_s30  ;;  %652 = vst.msk [vmem:[#allocation4 + $0xe0] sm:$0xff] %vm623_vm3, %v584_v3 }
  0xe2   : > { %957 = vrot.lane.b32.xlu0 %v5515_v28, %s4988_s30 }
  0xe3   : > { %v582_v47 = vpop.permute.xlu1 %581 }
  0xe4   : > { %651 = vst.msk [vmem:[#allocation4 + $0xd8] sm:$0xff] %vm623_vm3, %v582_v47  ;;  %v588_v10 = vpop.permute.xlu0 %587 }
  0xe5   : > { %955 = vrot.lane.b32.xlu1 %v5509_v33, %s4988_s30  ;;  %654 = vst.msk [vmem:[#allocation4 + $0xf0] sm:$0xff] %vm623_vm3, %v588_v10  ;;  %v5822_v10 = vld [vmem:[#allocation2 + $0x180] sm:$0xff] }
  0xe6   : > { %961 = vrot.lane.b32.xlu0 %v5531_v21, %s4988_s30 }
  0xe7   : > { %v586_v1 = vpop.permute.xlu1 %585 }
  0xe8   : > { %653 = vst.msk [vmem:[#allocation4 + $0xe8] sm:$0xff] %vm623_vm3, %v586_v1  ;;  %v721_v49 = vpop.permute.xlu0 %720 }
  0xe9   : > { %959 = vrot.lane.b32.xlu1 %v5521_v29, %s4988_s30  ;;  %817 = vst.msk [vmem:[#allocation4] sm:$0xff] %vm816_vm4, %v721_v49 }
  0xea   : > { %965 = vrot.lane.b32.xlu0 %v5547_v17, %s4988_s30 }
  0xeb   : > { %v590_v4 = vpop.permute.xlu1 %589 }
  0xec   : > { %655 = vst.msk [vmem:[#allocation4 + $0xf8] sm:$0xff] %vm623_vm3, %v590_v4  ;;  %v725_v3 = vpop.permute.xlu0 %724 }
  0xed   : > { %963 = vrot.lane.b32.xlu1 %v5537_v22, %s4988_s30  ;;  %819 = vst.msk [vmem:[#allocation4 + $0x10] sm:$0xff] %vm816_vm4, %v725_v3  ;;  %v880_v3 = vld [vmem:[#allocation2 + $0x188] sm:$0xff] }
  0xee   : > { %969 = vrot.lane.b32.xlu0 %v5563_v13, %s4988_s30 }
  0xef   : > { %v723_v47 = vpop.permute.xlu1 %722 }
  0xf0   : > { %818 = vst.msk [vmem:[#allocation4 + $0x8] sm:$0xff] %vm816_vm4, %v723_v47  ;;  %v729_v1 = vpop.permute.xlu0 %728 }
  0xf1   : > { %967 = vrot.lane.b32.xlu1 %v5553_v18, %s4988_s30  ;;  %821 = vst.msk [vmem:[#allocation4 + $0x20] sm:$0xff] %vm816_vm4, %v729_v1 }
  0xf2   : > { %973 = vrot.lane.b32.xlu0 %v5822_v10, %s4988_s30 }
  0xf3   : > { %v727_v49 = vpop.permute.xlu1 %726 }
  0xf4   : > { %820 = vst.msk [vmem:[#allocation4 + $0x18] sm:$0xff] %vm816_vm4, %v727_v49  ;;  %v733_v4 = vpop.permute.xlu0 %732 }
  0xf5   : > { %971 = vrot.lane.b32.xlu1 %v5569_v14, %s4988_s30  ;;  %823 = vst.msk [vmem:[#allocation4 + $0x30] sm:$0xff] %vm816_vm4, %v733_v4 }
  0xf6   : > { %1106 = vrot.lane.b32.xlu0 %v5311_v25, %s4989_s7 }
  0xf7   : > { %v731_v47 = vpop.permute.xlu1 %730 }
  0xf8   : > { %822 = vst.msk [vmem:[#allocation4 + $0x28] sm:$0xff] %vm816_vm4, %v731_v47  ;;  %v737_v1 = vpop.permute.xlu0 %736 }
  0xf9   : > { %975 = vrot.lane.b32.xlu1 %v880_v3, %s4988_s30  ;;  %825 = vst.msk [vmem:[#allocation4 + $0x40] sm:$0xff] %vm816_vm4, %v737_v1  ;;  %v7609_v1 = vld [vmem:[#allocation37_spill] sm:$0xff] }
  0xfa   : > { %1110 = vrot.lane.b32.xlu0 %v5313_v26, %s4989_s7 }
  0xfb   : > { %v735_v49 = vpop.permute.xlu1 %734 }
  0xfc   : > { %824 = vst.msk [vmem:[#allocation4 + $0x38] sm:$0xff] %vm816_vm4, %v735_v49  ;;  %v741_v4 = vpop.permute.xlu0 %740  ;;  %v7610_v49 = vld [vmem:[#allocation39_spill] sm:$0xff] }
  0xfd   : > { %1108 = vrot.lane.b32.xlu1 %v5323_v27, %s4989_s7  ;;  %827 = vst.msk [vmem:[#allocation4 + $0x50] sm:$0xff] %vm816_vm4, %v741_v4 }
  0xfe   : > { %1114 = vrot.lane.b32.xlu0 %v5337_v30, %s4989_s7 }
  0xff   : > { %v739_v25 = vpop.permute.xlu1 %738 }
 0x100   : > { %826 = vst.msk [vmem:[#allocation4 + $0x48] sm:$0xff] %vm816_vm4, %v739_v25  ;;  %v745_v3 = vpop.permute.xlu0 %744  ;;  %v7611_v25 = vld [vmem:[#allocation40_spill] sm:$0xff] }
 0x101   : > { %1112 = vrot.lane.b32.xlu1 %v5341_v31, %s4989_s7  ;;  %829 = vst.msk [vmem:[#allocation4 + $0x60] sm:$0xff] %vm816_vm4, %v745_v3 }
 0x102   : > { %1118 = vrot.lane.b32.xlu0 %v5345_v32, %s4989_s7 }
 0x103   : > { %v743_v26 = vpop.permute.xlu1 %742 }
 0x104   : > { %828 = vst.msk [vmem:[#allocation4 + $0x58] sm:$0xff] %vm816_vm4, %v743_v26  ;;  %v749_v27 = vpop.permute.xlu0 %748  ;;  %v5930_v26 = vld [vmem:[#allocation2 + $0x189] sm:$0xff] }
 0x105   : > { %1116 = vrot.lane.b32.xlu1 %v5373_v39, %s4989_s7  ;;  %831 = vst.msk [vmem:[#allocation4 + $0x70] sm:$0xff] %vm816_vm4, %v749_v27 }
 0x106   : > { %1122 = vrot.lane.b32.xlu0 %v5383_v40, %s4989_s7 }
 0x107   : > { %v747_v30 = vpop.permute.xlu1 %746 }
 0x108   : > { %830 = vst.msk [vmem:[#allocation4 + $0x68] sm:$0xff] %vm816_vm4, %v747_v30  ;;  %v753_v31 = vpop.permute.xlu0 %752  ;;  %v7612_v30 = vld [vmem:[#allocation41_spill] sm:$0xff] }
 0x109   : > { %1120 = vrot.lane.b32.xlu1 %v5387_v41, %s4989_s7  ;;  %833 = vst.msk [vmem:[#allocation4 + $0x80] sm:$0xff] %vm816_vm4, %v753_v31 }
 0x10a   : > { %1126 = vrot.lane.b32.xlu0 %v5391_v42, %s4989_s7 }
 0x10b   : > { %v751_v32 = vpop.permute.xlu1 %750 }
 0x10c   : > { %832 = vst.msk [vmem:[#allocation4 + $0x78] sm:$0xff] %vm816_vm4, %v751_v32  ;;  %v757_v39 = vpop.permute.xlu0 %756 }
 0x10d   : > { %1124 = vrot.lane.b32.xlu1 %v5395_v43, %s4989_s7  ;;  %835 = vst.msk [vmem:[#allocation4 + $0x90] sm:$0xff] %vm816_vm4, %v757_v39  ;;  %v7613_v39 = vld [vmem:[#allocation42_spill] sm:$0xff] }
 0x10e   : > { %1130 = vrot.lane.b32.xlu0 %v5399_v44, %s4989_s7 }
 0x10f   : > { %v755_v40 = vpop.permute.xlu1 %754 }
 0x110   : > { %834 = vst.msk [vmem:[#allocation4 + $0x88] sm:$0xff] %vm816_vm4, %v755_v40  ;;  %v761_v41 = vpop.permute.xlu0 %760  ;;  %v7614_v40 = vld [vmem:[#allocation43_spill] sm:$0xff] }
 0x111   : > { %1128 = vrot.lane.b32.xlu1 %v5403_v46, %s4989_s7  ;;  %837 = vst.msk [vmem:[#allocation4 + $0xa0] sm:$0xff] %vm816_vm4, %v761_v41 }
 0x112   : > { %1134 = vrot.lane.b32.xlu0 %v5417_v51, %s4989_s7 }
 0x113   : > { %v759_v42 = vpop.permute.xlu1 %758 }
 0x114   : > { %836 = vst.msk [vmem:[#allocation4 + $0x98] sm:$0xff] %vm816_vm4, %v759_v42  ;;  %v765_v43 = vpop.permute.xlu0 %764 }
 0x115   : > { %1132 = vrot.lane.b32.xlu1 %v5427_v53, %s4989_s7  ;;  %839 = vst.msk [vmem:[#allocation4 + $0xb0] sm:$0xff] %vm816_vm4, %v765_v43  ;;  %v7615_v43 = vld [vmem:[#allocation44_spill] sm:$0xff] }
 0x116   : > { %1138 = vrot.lane.b32.xlu0 %v5435_v56, %s4989_s7 }
 0x117   : > { %v763_v44 = vpop.permute.xlu1 %762 }
 0x118   : > { %838 = vst.msk [vmem:[#allocation4 + $0xa8] sm:$0xff] %vm816_vm4, %v763_v44  ;;  %v769_v46 = vpop.permute.xlu0 %768  ;;  %v7616_v44 = vld [vmem:[#allocation45_spill] sm:$0xff] }
 0x119   : > { %1136 = vrot.lane.b32.xlu1 %v5461_v63, %s4989_s7  ;;  %841 = vst.msk [vmem:[#allocation4 + $0xc0] sm:$0xff] %vm816_vm4, %v769_v46 }
 0x11a   : > { %1142 = vrot.lane.b32.xlu0 %v5511_v34, %s4989_s7 }
 0x11b   : > { %v767_v51 = vpop.permute.xlu1 %766 }
 0x11c   : > { %840 = vst.msk [vmem:[#allocation4 + $0xb8] sm:$0xff] %vm816_vm4, %v767_v51  ;;  %v773_v53 = vpop.permute.xlu0 %772 }
 0x11d   : > { %1140 = vrot.lane.b32.xlu1 %v5523_v23, %s4989_s7  ;;  %843 = vst.msk [vmem:[#allocation4 + $0xd0] sm:$0xff] %vm816_vm4, %v773_v53  ;;  %v7617_v53 = vld [vmem:[#allocation46_spill] sm:$0xff] }
 0x11e   : > { %1146 = vrot.lane.b32.xlu0 %v5529_v24, %s4989_s7 }
 0x11f   : > { %v771_v56 = vpop.permute.xlu1 %770 }
 0x120   : > { %842 = vst.msk [vmem:[#allocation4 + $0xc8] sm:$0xff] %vm816_vm4, %v771_v56  ;;  %v777_v63 = vpop.permute.xlu0 %776  ;;  %v7618_v56 = vld [vmem:[#allocation47_spill] sm:$0xff] }
 0x121   : > { %1144 = vrot.lane.b32.xlu1 %v5539_v19, %s4989_s7  ;;  %845 = vst.msk [vmem:[#allocation4 + $0xe0] sm:$0xff] %vm816_vm4, %v777_v63 }
 0x122   : > { %1150 = vrot.lane.b32.xlu0 %v5545_v20, %s4989_s7 }
 0x123   : > { %v775_v34 = vpop.permute.xlu1 %774 }
 0x124   : > { %844 = vst.msk [vmem:[#allocation4 + $0xd8] sm:$0xff] %vm816_vm4, %v775_v34  ;;  %v781_v23 = vpop.permute.xlu0 %780 }
 0x125   : > { %1148 = vrot.lane.b32.xlu1 %v5555_v15, %s4989_s7  ;;  %847 = vst.msk [vmem:[#allocation4 + $0xf0] sm:$0xff] %vm816_vm4, %v781_v23  ;;  %v7608_v15 = vld [vmem:[#allocation35_spill] sm:$0xff]  ;;  %v7619_v23 = vld [vmem:[#allocation48_spill] sm:$0xff] }
 0x126   : > { %1154 = vrot.lane.b32.xlu0 %v5561_v16, %s4989_s7 }
 0x127   : > { %v779_v24 = vpop.permute.xlu1 %778 }
 0x128   : > { %846 = vst.msk [vmem:[#allocation4 + $0xe8] sm:$0xff] %vm816_vm4, %v779_v24  ;;  %v914_v19 = vpop.permute.xlu0 %913  ;;  %v7620_v24 = vld [vmem:[#allocation49_spill] sm:$0xff] }
 0x129   : > { %1152 = vrot.lane.b32.xlu1 %v5571_v11, %s4989_s7  ;;  %1010 = vst.msk [vmem:[#allocation4] sm:$0xff] %vm1009_vm5, %v914_v19  ;;  %v5919_v11 = vld [vmem:[#allocation2 + $0x181] sm:$0xff] }
 0x12a   : > { %1158 = vrot.lane.b32.xlu0 %v5577_v12, %s4989_s7 }
 0x12b   : > { %v783_v20 = vpop.permute.xlu1 %782 }
 0x12c   : > { %848 = vst.msk [vmem:[#allocation4 + $0xf8] sm:$0xff] %vm816_vm4, %v783_v20  ;;  %v918_v47 = vpop.permute.xlu0 %917 }
 0x12d   : > { %1156 = vrot.lane.b32.xlu1 %v7608_v15, %s4989_s7  ;;  %1012 = vst.msk [vmem:[#allocation4 + $0x10] sm:$0xff] %vm1009_vm5, %v918_v47  ;;  %v7621_v15 = vld [vmem:[#allocation50_spill] sm:$0xff]  ;;  %v7622_v47 = vld [vmem:[#allocation51_spill] sm:$0xff] }
 0x12e   : > { %1162 = vrot.lane.b32.xlu0 %v7609_v1, %s4989_s7 }
 0x12f   : > { %v916_v16 = vpop.permute.xlu1 %915 }
 0x130   : > { %1011 = vst.msk [vmem:[#allocation4 + $0x8] sm:$0xff] %vm1009_vm5, %v916_v16  ;;  %v922_v12 = vpop.permute.xlu0 %921 }
 0x131   : > { %1160 = vrot.lane.b32.xlu1 %v7610_v49, %s4989_s7  ;;  %1014 = vst.msk [vmem:[#allocation4 + $0x20] sm:$0xff] %vm1009_vm5, %v922_v12  ;;  %v7623_v49 = vld [vmem:[#allocation52_spill] sm:$0xff]  ;;  %v7624_v12 = vld [vmem:[#allocation53_spill] sm:$0xff] }
 0x132   : > { %1166 = vrot.lane.b32.xlu0 %v5919_v11, %s4989_s7 }
 0x133   : > { %v920_v4 = vpop.permute.xlu1 %919 }
 0x134   : > { %1013 = vst.msk [vmem:[#allocation4 + $0x18] sm:$0xff] %vm1009_vm5, %v920_v4  ;;  %v926_v3 = vpop.permute.xlu0 %925 }
 0x135   : > { %1164 = vrot.lane.b32.xlu1 %v7611_v25, %s4989_s7  ;;  %1016 = vst.msk [vmem:[#allocation4 + $0x30] sm:$0xff] %vm1009_vm5, %v926_v3  ;;  %v7625_v3 = vld [vmem:[#allocation54_spill] sm:$0xff] }
 0x136   : > { %1299 = vrot.lane.b32.xlu0 %v7612_v30, %s4990_s8 }
 0x137   : > { %v924_v27 = vpop.permute.xlu1 %923 }
 0x138   : > { %1015 = vst.msk [vmem:[#allocation4 + $0x28] sm:$0xff] %vm1009_vm5, %v924_v27  ;;  %v930_v31 = vpop.permute.xlu0 %929  ;;  %v7626_v27 = vld [vmem:[#allocation55_spill] sm:$0xff] }
 0x139   : > { %1168 = vrot.lane.b32.xlu1 %v5930_v26, %s4989_s7  ;;  %1018 = vst.msk [vmem:[#allocation4 + $0x40] sm:$0xff] %vm1009_vm5, %v930_v31 }
 0x13a   : > { %1303 = vrot.lane.b32.xlu0 %v7613_v39, %s4990_s8  ;;  %v7628_v39 = vld [vmem:[#allocation57_spill] sm:$0xff] }
 0x13b   : > { %v928_v32 = vpop.permute.xlu1 %927 }
 0x13c   : > { %1017 = vst.msk [vmem:[#allocation4 + $0x38] sm:$0xff] %vm1009_vm5, %v928_v32  ;;  %v934_v41 = vpop.permute.xlu0 %933  ;;  %v7627_v32 = vld [vmem:[#allocation56_spill] sm:$0xff] }
 0x13d   : > { %1301 = vrot.lane.b32.xlu1 %v7614_v40, %s4990_s8  ;;  %1020 = vst.msk [vmem:[#allocation4 + $0x50] sm:$0xff] %vm1009_vm5, %v934_v41 }
 0x13e   : > { %1307 = vrot.lane.b32.xlu0 %v7615_v43, %s4990_s8  ;;  %v7630_v43 = vld [vmem:[#allocation59_spill] sm:$0xff] }
 0x13f   : > { %v932_v42 = vpop.permute.xlu1 %931 }
 0x140   : > { %1019 = vst.msk [vmem:[#allocation4 + $0x48] sm:$0xff] %vm1009_vm5, %v932_v42  ;;  %v938_v46 = vpop.permute.xlu0 %937  ;;  %v7629_v42 = vld [vmem:[#allocation58_spill] sm:$0xff] }
 0x141   : > { %1305 = vrot.lane.b32.xlu1 %v7616_v44, %s4990_s8  ;;  %1022 = vst.msk [vmem:[#allocation4 + $0x60] sm:$0xff] %vm1009_vm5, %v938_v46 }
 0x142   : > { %1311 = vrot.lane.b32.xlu0 %v7617_v53, %s4990_s8  ;;  %v7632_v53 = vld [vmem:[#allocation61_spill] sm:$0xff] }
 0x143   : > { %v936_v51 = vpop.permute.xlu1 %935 }
 0x144   : > { %1021 = vst.msk [vmem:[#allocation4 + $0x58] sm:$0xff] %vm1009_vm5, %v936_v51  ;;  %v942_v63 = vpop.permute.xlu0 %941  ;;  %v7631_v51 = vld [vmem:[#allocation60_spill] sm:$0xff] }
 0x145   : > { %1309 = vrot.lane.b32.xlu1 %v7618_v56, %s4990_s8  ;;  %1024 = vst.msk [vmem:[#allocation4 + $0x70] sm:$0xff] %vm1009_vm5, %v942_v63 }
 0x146   : > { %1315 = vrot.lane.b32.xlu0 %v7619_v23, %s4990_s8  ;;  %v7634_v23 = vld [vmem:[#allocation63_spill] sm:$0xff] }
 0x147   : > { %v940_v34 = vpop.permute.xlu1 %939 }
 0x148   : > { %1023 = vst.msk [vmem:[#allocation4 + $0x68] sm:$0xff] %vm1009_vm5, %v940_v34  ;;  %v946_v19 = vpop.permute.xlu0 %945  ;;  %v7633_v34 = vld [vmem:[#allocation62_spill] sm:$0xff] }
 0x149   : > { %1313 = vrot.lane.b32.xlu1 %v7620_v24, %s4990_s8  ;;  %1026 = vst.msk [vmem:[#allocation4 + $0x80] sm:$0xff] %vm1009_vm5, %v946_v19 }
 0x14a   : > { %1319 = vrot.lane.b32.xlu0 %v7621_v15, %s4990_s8  ;;  %v7636_v15 = vld [vmem:[#allocation65_spill] sm:$0xff] }
 0x14b   : > { %v944_v20 = vpop.permute.xlu1 %943 }
 0x14c   : > { %1025 = vst.msk [vmem:[#allocation4 + $0x78] sm:$0xff] %vm1009_vm5, %v944_v20  ;;  %v950_v16 = vpop.permute.xlu0 %949  ;;  %v7635_v20 = vld [vmem:[#allocation64_spill] sm:$0xff] }
 0x14d   : > { %1317 = vrot.lane.b32.xlu1 %v7622_v47, %s4990_s8  ;;  %1028 = vst.msk [vmem:[#allocation4 + $0x90] sm:$0xff] %vm1009_vm5, %v950_v16 }
 0x14e   : > { %1323 = vrot.lane.b32.xlu0 %v7623_v49, %s4990_s8 }
 0x14f   : > { %v948_v1 = vpop.permute.xlu1 %947 }
 0x150   : > { %1027 = vst.msk [vmem:[#allocation4 + $0x88] sm:$0xff] %vm1009_vm5, %v948_v1  ;;  %v954_v4 = vpop.permute.xlu0 %953  ;;  %v7637_v1 = vld [vmem:[#allocation66_spill] sm:$0xff] }
 0x151   : > { %1321 = vrot.lane.b32.xlu1 %v7624_v12, %s4990_s8  ;;  %1030 = vst.msk [vmem:[#allocation4 + $0xa0] sm:$0xff] %vm1009_vm5, %v954_v4  ;;  %v6019_v4 = vld [vmem:[#allocation2 + $0x182] sm:$0xff] }
 0x152   : > { %1327 = vrot.lane.b32.xlu0 %v7625_v3, %s4990_s8  ;;  %v6030_v3 = vld [vmem:[#allocation2 + $0x18a] sm:$0xff] }
 0x153   : > { %v952_v25 = vpop.permute.xlu1 %951 }
 0x154   : > { %1029 = vst.msk [vmem:[#allocation4 + $0x98] sm:$0xff] %vm1009_vm5, %v952_v25  ;;  %v958_v30 = vpop.permute.xlu0 %957 }
 0x155   : > { %1325 = vrot.lane.b32.xlu1 %v7626_v27, %s4990_s8  ;;  %1032 = vst.msk [vmem:[#allocation4 + $0xb0] sm:$0xff] %vm1009_vm5, %v958_v30 }
 0x156   : > { %1331 = vrot.lane.b32.xlu0 %v7627_v32, %s4990_s8 }
 0x157   : > { %v956_v31 = vpop.permute.xlu1 %955 }
 0x158   : > { %1031 = vst.msk [vmem:[#allocation4 + $0xa8] sm:$0xff] %vm1009_vm5, %v956_v31  ;;  %v962_v40 = vpop.permute.xlu0 %961 }
 0x159   : > { %1329 = vrot.lane.b32.xlu1 %v7628_v39, %s4990_s8  ;;  %1034 = vst.msk [vmem:[#allocation4 + $0xc0] sm:$0xff] %vm1009_vm5, %v962_v40  ;;  %v2043_v40 = vld [vmem:[%s7477_s1 + $0x18] sm:$0xff] }
 0x15a   : > { %1335 = vrot.lane.b32.xlu0 %v7629_v42, %s4990_s8  ;;  %v2044_v42 = vld [vmem:[%s7477_s1 + $0x20] sm:$0xff] }
 0x15b   : > { %v960_v41 = vpop.permute.xlu1 %959 }
 0x15c   : > { %1033 = vst.msk [vmem:[#allocation4 + $0xb8] sm:$0xff] %vm1009_vm5, %v960_v41  ;;  %v966_v44 = vpop.permute.xlu0 %965 }
 0x15d   : > { %1333 = vrot.lane.b32.xlu1 %v7630_v43, %s4990_s8  ;;  %1036 = vst.msk [vmem:[#allocation4 + $0xd0] sm:$0xff] %vm1009_vm5, %v966_v44  ;;  %v2045_v43 = vld [vmem:[%s7477_s1 + $0x28] sm:$0xff] }
 0x15e   : > { %1339 = vrot.lane.b32.xlu0 %v7631_v51, %s4990_s8  ;;  %v2047_v51 = vld [vmem:[%s7477_s1 + $0x38] sm:$0xff] }
 0x15f   : > { %v964_v46 = vpop.permute.xlu1 %963 }
 0x160   : > { %1035 = vst.msk [vmem:[#allocation4 + $0xc8] sm:$0xff] %vm1009_vm5, %v964_v46  ;;  %v970_v56 = vpop.permute.xlu0 %969  ;;  %v2046_v46 = vld [vmem:[%s7477_s1 + $0x30] sm:$0xff] }
 0x161   : > { %1337 = vrot.lane.b32.xlu1 %v7632_v53, %s4990_s8  ;;  %1038 = vst.msk [vmem:[#allocation4 + $0xe0] sm:$0xff] %vm1009_vm5, %v970_v56  ;;  %v4940_v53 = vpack.c.bf16 %v2047_v51, %v2046_v46  ;;  %v1637_v51 = vld [vmem:[#allocation2 + $0xe1] sm:$0xff] }
 0x162   : > { %1343 = vrot.lane.b32.xlu0 %v7633_v34, %s4990_s8 }
 0x163   : > { %v968_v63 = vpop.permute.xlu1 %967 }
 0x164   : > { %1037 = vst.msk [vmem:[#allocation4 + $0xd8] sm:$0xff] %vm1009_vm5, %v968_v63  ;;  %v974_v24 = vpop.permute.xlu0 %973  ;;  %v1622_v63 = vld [vmem:[#allocation2 + $0x31] sm:$0xff] }
 0x165   : > { %1341 = vrot.lane.b32.xlu1 %v7634_v23, %s4990_s8  ;;  %1040 = vst.msk [vmem:[#allocation4 + $0xf0] sm:$0xff] %vm1009_vm5, %v974_v24  ;;  %v1816_v23 = vld [vmem:[#allocation2 + $0x3a] sm:$0xff]  ;;  %v1815_v24 = vld [vmem:[#allocation2 + $0x32] sm:$0xff] }
 0x166   : > { %1347 = vrot.lane.b32.xlu0 %v7635_v20, %s4990_s8  ;;  %v1625_v20 = vld [vmem:[#allocation2 + $0x51] sm:$0xff] }
 0x167   : > { %v972_v19 = vpop.permute.xlu1 %971 }
 0x168   : > { %1039 = vst.msk [vmem:[#allocation4 + $0xe8] sm:$0xff] %vm1009_vm5, %v972_v19  ;;  %v1107_v47 = vpop.permute.xlu0 %1106 }
 0x169   : > { %1345 = vrot.lane.b32.xlu1 %v7636_v15, %s4990_s8  ;;  %1203 = vst.msk [vmem:[#allocation4] sm:$0xff] %vm1202_vm6, %v1107_v47  ;;  %v1624_v47 = vld [vmem:[#allocation2 + $0x49] sm:$0xff] }
 0x16a   : > { %1351 = vrot.lane.b32.xlu0 %v5710_v5, %s4990_s8 }
 0x16b   : > { %v976_v16 = vpop.permute.xlu1 %975 }
 0x16c   : > { %1041 = vst.msk [vmem:[#allocation4 + $0xf8] sm:$0xff] %vm1009_vm5, %v976_v16  ;;  %v1111_v49 = vpop.permute.xlu0 %1110 }
 0x16d   : > { %1349 = vrot.lane.b32.xlu1 %v7637_v1, %s4990_s8  ;;  %1205 = vst.msk [vmem:[#allocation4 + $0x10] sm:$0xff] %vm1202_vm6, %v1111_v49  ;;  %v1818_v1 = vld [vmem:[#allocation2 + $0x52] sm:$0xff] }
 0x16e   : > { %1355 = vrot.lane.b32.xlu0 %v5720_v6, %s4990_s8 }
 0x16f   : > { %v1109_v12 = vpop.permute.xlu1 %1108 }
 0x170   : > { %1204 = vst.msk [vmem:[#allocation4 + $0x8] sm:$0xff] %vm1202_vm6, %v1109_v12  ;;  %v1115_v5 = vpop.permute.xlu0 %1114  ;;  %v1817_v12 = vld [vmem:[#allocation2 + $0x4a] sm:$0xff] }
 0x171   : > { %1353 = vrot.lane.b32.xlu1 %v5725_v2, %s4990_s8  ;;  %1207 = vst.msk [vmem:[#allocation4 + $0x20] sm:$0xff] %vm1202_vm6, %v1115_v5 }
 0x172   : > { %1359 = vrot.lane.b32.xlu0 %v6019_v4, %s4990_s8 }
 0x173   : > { %v1113_v25 = vpop.permute.xlu1 %1112 }
 0x174   : > { %1206 = vst.msk [vmem:[#allocation4 + $0x18] sm:$0xff] %vm1202_vm6, %v1113_v25  ;;  %v1119_v6 = vpop.permute.xlu0 %1118  ;;  %v1627_v25 = vld [vmem:[#allocation2 + $0x69] sm:$0xff] }
 0x175   : > { %1357 = vrot.lane.b32.xlu1 %v5733_v9, %s4990_s8  ;;  %1209 = vst.msk [vmem:[#allocation4 + $0x30] sm:$0xff] %vm1202_vm6, %v1119_v6 }
 0x176   : > { %1493 = vrot.lane.b32.xlu0 %v5415_v50, %s4991_s9 }
 0x177   : > { %v1117_v27 = vpop.permute.xlu1 %1116 }
 0x178   : > { %1208 = vst.msk [vmem:[#allocation4 + $0x28] sm:$0xff] %vm1202_vm6, %v1117_v27  ;;  %v1123_v2 = vpop.permute.xlu0 %1122  ;;  %v1626_v27 = vld [vmem:[#allocation2 + $0x61] sm:$0xff] }
 0x179   : > { %1361 = vrot.lane.b32.xlu1 %v6030_v3, %s4990_s8  ;;  %1211 = vst.msk [vmem:[#allocation4 + $0x40] sm:$0xff] %vm1202_vm6, %v1123_v2 }
 0x17a   : > { %1497 = vrot.lane.b32.xlu0 %v5431_v54, %s4991_s9 }
 0x17b   : > { %v1121_v30 = vpop.permute.xlu1 %1120 }
 0x17c   : > { %1210 = vst.msk [vmem:[#allocation4 + $0x38] sm:$0xff] %vm1202_vm6, %v1121_v30  ;;  %v1127_v9 = vpop.permute.xlu0 %1126  ;;  %v1820_v30 = vld [vmem:[#allocation2 + $0x6a] sm:$0xff] }
 0x17d   : > { %1495 = vrot.lane.b32.xlu1 %v5423_v52, %s4991_s9  ;;  %1213 = vst.msk [vmem:[#allocation4 + $0x50] sm:$0xff] %vm1202_vm6, %v1127_v9 }
 0x17e   : > { %1501 = vrot.lane.b32.xlu0 %v5441_v57, %s4991_s9 }
 0x17f   : > { %v1125_v50 = vpop.permute.xlu1 %1124 }
 0x180   : > { %1212 = vst.msk [vmem:[#allocation4 + $0x48] sm:$0xff] %vm1202_vm6, %v1125_v50  ;;  %v1131_v31 = vpop.permute.xlu0 %1130  ;;  %v1819_v50 = vld [vmem:[#allocation2 + $0x62] sm:$0xff] }
 0x181   : > { %1499 = vrot.lane.b32.xlu1 %v5433_v55, %s4991_s9  ;;  %1215 = vst.msk [vmem:[#allocation4 + $0x60] sm:$0xff] %vm1202_vm6, %v1131_v31 }
 0x182   : > { %1505 = vrot.lane.b32.xlu0 %v5445_v59, %s4991_s9 }
 0x183   : > { %v1129_v54 = vpop.permute.xlu1 %1128 }
 0x184   : > { %1214 = vst.msk [vmem:[#allocation4 + $0x58] sm:$0xff] %vm1202_vm6, %v1129_v54  ;;  %v1135_v52 = vpop.permute.xlu0 %1134  ;;  %v1629_v54 = vld [vmem:[#allocation2 + $0x81] sm:$0xff] }
 0x185   : > { %1503 = vrot.lane.b32.xlu1 %v5443_v58, %s4991_s9  ;;  %1217 = vst.msk [vmem:[#allocation4 + $0x70] sm:$0xff] %vm1202_vm6, %v1135_v52 }
 0x186   : > { %1509 = vrot.lane.b32.xlu0 %v5457_v61, %s4991_s9 }
 0x187   : > { %v1133_v57 = vpop.permute.xlu1 %1132 }
 0x188   : > { %1216 = vst.msk [vmem:[#allocation4 + $0x68] sm:$0xff] %vm1202_vm6, %v1133_v57  ;;  %v1139_v55 = vpop.permute.xlu0 %1138  ;;  %v1628_v57 = vld [vmem:[#allocation2 + $0x79] sm:$0xff] }
 0x189   : > { %1507 = vrot.lane.b32.xlu1 %v5455_v60, %s4991_s9  ;;  %1219 = vst.msk [vmem:[#allocation4 + $0x80] sm:$0xff] %vm1202_vm6, %v1139_v55 }
 0x18a   : > { %1513 = vrot.lane.b32.xlu0 %v5469_v0, %s4991_s9 }
 0x18b   : > { %v1137_v59 = vpop.permute.xlu1 %1136 }
 0x18c   : > { %1218 = vst.msk [vmem:[#allocation4 + $0x78] sm:$0xff] %vm1202_vm6, %v1137_v59  ;;  %v1143_v58 = vpop.permute.xlu0 %1142  ;;  %v1822_v59 = vld [vmem:[#allocation2 + $0x82] sm:$0xff] }
 0x18d   : > { %1511 = vrot.lane.b32.xlu1 %v5459_v62, %s4991_s9  ;;  %1221 = vst.msk [vmem:[#allocation4 + $0x90] sm:$0xff] %vm1202_vm6, %v1143_v58 }
 0x18e   : > { %1517 = vrot.lane.b32.xlu0 %v5473_v8, %s4991_s9 }
 0x18f   : > { %v1141_v61 = vpop.permute.xlu1 %1140 }
 0x190   : > { %1220 = vst.msk [vmem:[#allocation4 + $0x88] sm:$0xff] %vm1202_vm6, %v1141_v61  ;;  %v1147_v60 = vpop.permute.xlu0 %1146  ;;  %v1821_v61 = vld [vmem:[#allocation2 + $0x7a] sm:$0xff] }
 0x191   : > { %1515 = vrot.lane.b32.xlu1 %v5471_v7, %s4991_s9  ;;  %1223 = vst.msk [vmem:[#allocation4 + $0xa0] sm:$0xff] %vm1202_vm6, %v1147_v60 }
 0x192   : > { %1521 = vrot.lane.b32.xlu0 %v5485_v48, %s4991_s9 }
 0x193   : > { %v1145_v0 = vpop.permute.xlu1 %1144 }
 0x194   : > { %1222 = vst.msk [vmem:[#allocation4 + $0x98] sm:$0xff] %vm1202_vm6, %v1145_v0  ;;  %v1151_v62 = vpop.permute.xlu0 %1150  ;;  %v1631_v0 = vld [vmem:[#allocation2 + $0x99] sm:$0xff] }
 0x195   : > { %1519 = vrot.lane.b32.xlu1 %v5483_v45, %s4991_s9  ;;  %1225 = vst.msk [vmem:[#allocation4 + $0xb0] sm:$0xff] %vm1202_vm6, %v1151_v62 }
 0x196   : > { %1525 = vrot.lane.b32.xlu0 %v5495_v38, %s4991_s9 }
 0x197   : > { %v1149_v8 = vpop.permute.xlu1 %1148 }
 0x198   : > { %1224 = vst.msk [vmem:[#allocation4 + $0xa8] sm:$0xff] %vm1202_vm6, %v1149_v8  ;;  %v1155_v7 = vpop.permute.xlu0 %1154  ;;  %v1630_v8 = vld [vmem:[#allocation2 + $0x91] sm:$0xff] }
 0x199   : > { %1523 = vrot.lane.b32.xlu1 %v5487_v37, %s4991_s9  ;;  %1227 = vst.msk [vmem:[#allocation4 + $0xc0] sm:$0xff] %vm1202_vm6, %v1155_v7 }
 0x19a   : > { %1529 = vrot.lane.b32.xlu0 %v5499_v36, %s4991_s9  ;;  %v2040_v36 = vld [vmem:[%s7477_s1] sm:$0xff] }
 0x19b   : > { %v1153_v48 = vpop.permute.xlu1 %1152 }
 0x19c   : > { %1226 = vst.msk [vmem:[#allocation4 + $0xb8] sm:$0xff] %vm1202_vm6, %v1153_v48  ;;  %v1159_v45 = vpop.permute.xlu0 %1158  ;;  %v1824_v48 = vld [vmem:[#allocation2 + $0x9a] sm:$0xff] }
 0x19d   : > { %1527 = vrot.lane.b32.xlu1 %v5497_v35, %s4991_s9  ;;  %1229 = vst.msk [vmem:[#allocation4 + $0xd0] sm:$0xff] %vm1202_vm6, %v1159_v45  ;;  %v2041_v35 = vld [vmem:[%s7477_s1 + $0x8] sm:$0xff] }
 0x19e   : > { %1533 = vrot.lane.b32.xlu0 %v5515_v28, %s4991_s9  ;;  %v4928_v32 = vpack.c.bf16 %v2041_v35, %v2040_v36  ;;  %v1633_v36 = vld [vmem:[#allocation2 + $0xb1] sm:$0xff] }
 0x19f   : > { %v1157_v38 = vpop.permute.xlu1 %1156 }
 0x1a0   : > { %1228 = vst.msk [vmem:[#allocation4 + $0xc8] sm:$0xff] %vm1202_vm6, %v1157_v38  ;;  %v1163_v37 = vpop.permute.xlu0 %1162  ;;  %4929 = vmatprep.subr.bf16.mxu0 %v4928_v32  ;;  %v1823_v38 = vld [vmem:[#allocation2 + $0x92] sm:$0xff] }
 0x1a1   : > { %1531 = vrot.lane.b32.xlu1 %v5509_v33, %s4991_s9  ;;  %1231 = vst.msk [vmem:[#allocation4 + $0xe0] sm:$0xff] %vm1202_vm6, %v1163_v37  ;;  %4931 = vmatpush3.bf16.msra.mxu0 %v4928_v32  ;;  %v2042_v33 = vld [vmem:[%s7477_s1 + $0x10] sm:$0xff] }
 0x1a2   : > { %1537 = vrot.lane.b32.xlu0 %v5531_v21, %s4991_s9  ;;  %v4932_v41 = vpack.c.bf16 %v2043_v40, %v2042_v33  ;;  %v1632_v32 = vld [vmem:[#allocation2 + $0xa9] sm:$0xff] }
 0x1a3   : > { %v1161_v39 = vpop.permute.xlu1 %1160  ;;  %v1825_v40 = vld [vmem:[#allocation2 + $0xaa] sm:$0xff] }
 0x1a4   : > { %1230 = vst.msk [vmem:[#allocation4 + $0xd8] sm:$0xff] %vm1202_vm6, %v1161_v39  ;;  %v1167_v28 = vpop.permute.xlu0 %1166  ;;  %4933 = vmatprep.subr.bf16.mxu0 %v4932_v41 }
 0x1a5   : > { %1535 = vrot.lane.b32.xlu1 %v5521_v29, %s4991_s9  ;;  %1233 = vst.msk [vmem:[#allocation4 + $0xf0] sm:$0xff] %vm1202_vm6, %v1167_v28  ;;  %4935 = vmatpush3.bf16.msra.mxu0 %v4932_v41  ;;  %v1826_v28 = vld [vmem:[#allocation2 + $0xb2] sm:$0xff] }
 0x1a6   : > { %1541 = vrot.lane.b32.xlu0 %v5547_v17, %s4991_s9  ;;  %v4936_v17 = vpack.c.bf16 %v2045_v43, %v2044_v42  ;;  %v1634_v42 = vld [vmem:[#allocation2 + $0xc1] sm:$0xff] }
 0x1a7   : > { %v1165_v21 = vpop.permute.xlu1 %1164 }
 0x1a8   : > { %1232 = vst.msk [vmem:[#allocation4 + $0xe8] sm:$0xff] %vm1202_vm6, %v1165_v21  ;;  %v1300_v29 = vpop.permute.xlu0 %1299  ;;  %4937 = vmatprep.subr.bf16.mxu0 %v4936_v17  ;;  %v1635_v21 = vld [vmem:[#allocation2 + $0xc9] sm:$0xff] }
 0x1a9   : > { %1539 = vrot.lane.b32.xlu1 %v5537_v22, %s4991_s9  ;;  %1396 = vst.msk [vmem:[#allocation4] sm:$0xff] %vm1395_vm7, %v1300_v29  ;;  %4939 = vmatpush3.bf16.msra.mxu0 %v4936_v17  ;;  %v1828_v17 = vld [vmem:[#allocation2 + $0xca] sm:$0xff] }
 0x1aa   : > { %1545 = vrot.lane.b32.xlu0 %v5563_v13, %s4991_s9  ;;  %4941 = vmatprep.subr.bf16.mxu0 %v4940_v53 }
 0x1ab   : > { %v1169_v44 = vpop.permute.xlu1 %1168 }
 0x1ac   : > { %1234 = vst.msk [vmem:[#allocation4 + $0xf8] sm:$0xff] %vm1202_vm6, %v1169_v44  ;;  %v1304_v22 = vpop.permute.xlu0 %1303 }
 0x1ad   : > { %1543 = vrot.lane.b32.xlu1 %v5553_v18, %s4991_s9  ;;  %1398 = vst.msk [vmem:[#allocation4 + $0x10] sm:$0xff] %vm1395_vm7, %v1304_v22  ;;  %v1623_v18 = vld [vmem:[#allocation2 + $0x39] sm:$0xff]  ;;  %4943 = vmatpush3.bf16.msra.mxu0 %v4940_v53  ;;  %v1827_v22 = vld [vmem:[#allocation2 + $0xc2] sm:$0xff] }
 0x1ae   : > { %1549 = vrot.lane.b32.xlu0 %v5822_v10, %s4991_s9  ;;  %v2048_v10 = vld [vmem:[%s7477_s1 + $0x40] sm:$0xff] }
 0x1af   : > { %v1302_v13 = vpop.permute.xlu1 %1301  ;;  %4812 = vmatprep.subr.mxu0 %v2048_v10 }
 0x1b0   : > { %1397 = vst.msk [vmem:[#allocation4 + $0x8] sm:$0xff] %vm1395_vm7, %v1302_v13  ;;  %v1308_v56 = vpop.permute.xlu0 %1307  ;;  %v1636_v13 = vld [vmem:[#allocation2 + $0xd9] sm:$0xff] }
 0x1b1   : > { %1547 = vrot.lane.b32.xlu1 %v5569_v14, %s4991_s9  ;;  %1400 = vst.msk [vmem:[#allocation4 + $0x20] sm:$0xff] %vm1395_vm7, %v1308_v56  ;;  %4813 = vmatpush3.msra.mxu0 %v2048_v10  ;;  %v1830_v56 = vld [vmem:[#allocation2 + $0xe2] sm:$0xff] }
 0x1b2   : > { %1688 = vrot.lane.b32.xlu0 %v1623_v18, %s4992_s11 }
 0x1b3   : > { %v1306_v34 = vpop.permute.xlu1 %1305 }
 0x1b4   : > { %1399 = vst.msk [vmem:[#allocation4 + $0x18] sm:$0xff] %vm1395_vm7, %v1306_v34  ;;  %v1312_v14 = vpop.permute.xlu0 %1311  ;;  %v1829_v34 = vld [vmem:[#allocation2 + $0xda] sm:$0xff] }
 0x1b5   : > { %1686 = vrot.lane.b32.xlu1 %v1622_v63, %s4992_s11  ;;  %1402 = vst.msk [vmem:[#allocation4 + $0x30] sm:$0xff] %vm1395_vm7, %v1312_v14 }
 0x1b6   : > { %1881 = vrot.lane.b32.xlu0 %v1816_v23, %s4993_s14  ;;  %v1639_v23 = vld [vmem:[#allocation2 + $0xf9] sm:$0xff] }
 0x1b7   : > { %v1310_v19 = vpop.permute.xlu1 %1309 }
 0x1b8   : > { %1401 = vst.msk [vmem:[#allocation4 + $0x28] sm:$0xff] %vm1395_vm7, %v1310_v19  ;;  %v1316_v15 = vpop.permute.xlu0 %1315 }
 0x1b9   : > { %1879 = vrot.lane.b32.xlu1 %v1815_v24, %s4993_s14  ;;  %1404 = vst.msk [vmem:[#allocation4 + $0x40] sm:$0xff] %vm1395_vm7, %v1316_v15  ;;  %v1638_v24 = vld [vmem:[#allocation2 + $0xf1] sm:$0xff] }
 0x1ba   : > { %1692 = vrot.lane.b32.xlu0 %v1625_v20, %s4992_s11  ;;  %v1832_v20 = vld [vmem:[#allocation2 + $0xfa] sm:$0xff] }
 0x1bb   : > { %v1314_v16 = vpop.permute.xlu1 %1313 }
 0x1bc   : > { %1403 = vst.msk [vmem:[#allocation4 + $0x38] sm:$0xff] %vm1395_vm7, %v1314_v16  ;;  %v1320_v49 = vpop.permute.xlu0 %1319 }
 0x1bd   : > { %1690 = vrot.lane.b32.xlu1 %v1624_v47, %s4992_s11  ;;  %1406 = vst.msk [vmem:[#allocation4 + $0x50] sm:$0xff] %vm1395_vm7, %v1320_v49  ;;  %v1831_v47 = vld [vmem:[#allocation2 + $0xf2] sm:$0xff] }
 0x1be   : > { %1885 = vrot.lane.b32.xlu0 %v1818_v1, %s4993_s14  ;;  %v1641_v1 = vld [vmem:[#allocation2 + $0x111] sm:$0xff] }
 0x1bf   : > { %v1318_v5 = vpop.permute.xlu1 %1317 }
 0x1c0   : > { %1405 = vst.msk [vmem:[#allocation4 + $0x48] sm:$0xff] %vm1395_vm7, %v1318_v5  ;;  %v1324_v6 = vpop.permute.xlu0 %1323 }
 0x1c1   : > { %1883 = vrot.lane.b32.xlu1 %v1817_v12, %s4993_s14  ;;  %1408 = vst.msk [vmem:[#allocation4 + $0x60] sm:$0xff] %vm1395_vm7, %v1324_v6  ;;  %v1640_v12 = vld [vmem:[#allocation2 + $0x109] sm:$0xff] }
 0x1c2   : > { %1696 = vrot.lane.b32.xlu0 %v1627_v25, %s4992_s11  ;;  %v1834_v25 = vld [vmem:[#allocation2 + $0x112] sm:$0xff] }
 0x1c3   : > { %v1322_v2 = vpop.permute.xlu1 %1321 }
 0x1c4   : > { %1407 = vst.msk [vmem:[#allocation4 + $0x58] sm:$0xff] %vm1395_vm7, %v1322_v2  ;;  %v1328_v9 = vpop.permute.xlu0 %1327 }
 0x1c5   : > { %1694 = vrot.lane.b32.xlu1 %v1626_v27, %s4992_s11  ;;  %1410 = vst.msk [vmem:[#allocation4 + $0x70] sm:$0xff] %vm1395_vm7, %v1328_v9  ;;  %v1833_v27 = vld [vmem:[#allocation2 + $0x10a] sm:$0xff] }
 0x1c6   : > { %1889 = vrot.lane.b32.xlu0 %v1820_v30, %s4993_s14  ;;  %v1643_v30 = vld [vmem:[#allocation2 + $0x129] sm:$0xff] }
 0x1c7   : > { %v1326_v31 = vpop.permute.xlu1 %1325 }
 0x1c8   : > { %1409 = vst.msk [vmem:[#allocation4 + $0x68] sm:$0xff] %vm1395_vm7, %v1326_v31  ;;  %v1332_v52 = vpop.permute.xlu0 %1331 }
 0x1c9   : > { %1887 = vrot.lane.b32.xlu1 %v1819_v50, %s4993_s14  ;;  %1412 = vst.msk [vmem:[#allocation4 + $0x80] sm:$0xff] %vm1395_vm7, %v1332_v52  ;;  %v1642_v50 = vld [vmem:[#allocation2 + $0x121] sm:$0xff] }
 0x1ca   : > { %1700 = vrot.lane.b32.xlu0 %v1629_v54, %s4992_s11  ;;  %v1836_v54 = vld [vmem:[#allocation2 + $0x12a] sm:$0xff] }
 0x1cb   : > { %v1330_v55 = vpop.permute.xlu1 %1329 }
 0x1cc   : > { %1411 = vst.msk [vmem:[#allocation4 + $0x78] sm:$0xff] %vm1395_vm7, %v1330_v55  ;;  %v1336_v58 = vpop.permute.xlu0 %1335 }
 0x1cd   : > { %1698 = vrot.lane.b32.xlu1 %v1628_v57, %s4992_s11  ;;  %1414 = vst.msk [vmem:[#allocation4 + $0x90] sm:$0xff] %vm1395_vm7, %v1336_v58  ;;  %v1835_v57 = vld [vmem:[#allocation2 + $0x122] sm:$0xff] }
 0x1ce   : > { %1893 = vrot.lane.b32.xlu0 %v1822_v59, %s4993_s14  ;;  %v1645_v59 = vld [vmem:[#allocation2 + $0x141] sm:$0xff] }
 0x1cf   : > { %v1334_v60 = vpop.permute.xlu1 %1333 }
 0x1d0   : > { %1413 = vst.msk [vmem:[#allocation4 + $0x88] sm:$0xff] %vm1395_vm7, %v1334_v60  ;;  %v1340_v62 = vpop.permute.xlu0 %1339 }
 0x1d1   : > { %1891 = vrot.lane.b32.xlu1 %v1821_v61, %s4993_s14  ;;  %1416 = vst.msk [vmem:[#allocation4 + $0xa0] sm:$0xff] %vm1395_vm7, %v1340_v62  ;;  %v1644_v61 = vld [vmem:[#allocation2 + $0x139] sm:$0xff] }
 0x1d2   : > { %1704 = vrot.lane.b32.xlu0 %v1631_v0, %s4992_s11  ;;  %v1838_v0 = vld [vmem:[#allocation2 + $0x142] sm:$0xff] }
 0x1d3   : > { %v1338_v7 = vpop.permute.xlu1 %1337 }
 0x1d4   : > { %1415 = vst.msk [vmem:[#allocation4 + $0x98] sm:$0xff] %vm1395_vm7, %v1338_v7  ;;  %v1344_v45 = vpop.permute.xlu0 %1343 }
 0x1d5   : > { %1702 = vrot.lane.b32.xlu1 %v1630_v8, %s4992_s11  ;;  %1418 = vst.msk [vmem:[#allocation4 + $0xb0] sm:$0xff] %vm1395_vm7, %v1344_v45  ;;  %v1837_v8 = vld [vmem:[#allocation2 + $0x13a] sm:$0xff] }
 0x1d6   : > { %1897 = vrot.lane.b32.xlu0 %v1824_v48, %s4993_s14  ;;  %v1647_v48 = vld [vmem:[#allocation2 + $0x159] sm:$0xff] }
 0x1d7   : > { %v1342_v37 = vpop.permute.xlu1 %1341 }
 0x1d8   : > { %1417 = vst.msk [vmem:[#allocation4 + $0xa8] sm:$0xff] %vm1395_vm7, %v1342_v37  ;;  %v1348_v35 = vpop.permute.xlu0 %1347 }
 0x1d9   : > { %1895 = vrot.lane.b32.xlu1 %v1823_v38, %s4993_s14  ;;  %1420 = vst.msk [vmem:[#allocation4 + $0xc0] sm:$0xff] %vm1395_vm7, %v1348_v35  ;;  %v1646_v38 = vld [vmem:[#allocation2 + $0x151] sm:$0xff] }
 0x1da   : > { %1708 = vrot.lane.b32.xlu0 %v1633_v36, %s4992_s11  ;;  %v1840_v36 = vld [vmem:[#allocation2 + $0x15a] sm:$0xff] }
 0x1db   : > { %v1346_v39 = vpop.permute.xlu1 %1345 }
 0x1dc   : > { %1419 = vst.msk [vmem:[#allocation4 + $0xb8] sm:$0xff] %vm1395_vm7, %v1346_v39  ;;  %v1352_v33 = vpop.permute.xlu0 %1351 }
 0x1dd   : > { %1706 = vrot.lane.b32.xlu1 %v1632_v32, %s4992_s11  ;;  %1422 = vst.msk [vmem:[#allocation4 + $0xd0] sm:$0xff] %vm1395_vm7, %v1352_v33  ;;  %v1839_v32 = vld [vmem:[#allocation2 + $0x152] sm:$0xff] }
 0x1de   : > { %1901 = vrot.lane.b32.xlu0 %v1826_v28, %s4993_s14  ;;  %v1649_v28 = vld [vmem:[#allocation2 + $0x171] sm:$0xff] }
 0x1df   : > { %v1350_v41 = vpop.permute.xlu1 %1349 }
 0x1e0   : > { %1421 = vst.msk [vmem:[#allocation4 + $0xc8] sm:$0xff] %vm1395_vm7, %v1350_v41  ;;  %v1356_v29 = vpop.permute.xlu0 %1355 }
 0x1e1   : > { %1899 = vrot.lane.b32.xlu1 %v1825_v40, %s4993_s14  ;;  %1424 = vst.msk [vmem:[#allocation4 + $0xe0] sm:$0xff] %vm1395_vm7, %v1356_v29  ;;  %v1648_v40 = vld [vmem:[#allocation2 + $0x169] sm:$0xff] }
 0x1e2   : > { %1712 = vrot.lane.b32.xlu0 %v1635_v21, %s4992_s11  ;;  %v1842_v21 = vld [vmem:[#allocation2 + $0x172] sm:$0xff] }
 0x1e3   : > { %v1354_v43 = vpop.permute.xlu1 %1353 }
 0x1e4   : > { %1423 = vst.msk [vmem:[#allocation4 + $0xd8] sm:$0xff] %vm1395_vm7, %v1354_v43  ;;  %v1360_v44 = vpop.permute.xlu0 %1359 }
 0x1e5   : > { %1710 = vrot.lane.b32.xlu1 %v1634_v42, %s4992_s11  ;;  %1426 = vst.msk [vmem:[#allocation4 + $0xf0] sm:$0xff] %vm1395_vm7, %v1360_v44  ;;  %v1841_v42 = vld [vmem:[#allocation2 + $0x16a] sm:$0xff] }
 0x1e6   : > { %1905 = vrot.lane.b32.xlu0 %v1828_v17, %s4993_s14  ;;  %v1458_v44 = vld [vmem:[#allocation2 + $0x188] sm:$0xff] }
 0x1e7   : > { %v1358_v46 = vpop.permute.xlu1 %1357 }
 0x1e8   : > { %1425 = vst.msk [vmem:[#allocation4 + $0xe8] sm:$0xff] %vm1395_vm7, %v1358_v46  ;;  %v1494_v53 = vpop.permute.xlu0 %1493 }
 0x1e9   : > { %1903 = vrot.lane.b32.xlu1 %v1827_v22, %s4993_s14  ;;  %1590 = vst.msk [vmem:[#allocation4] sm:$0xff] %vm1589_vm8, %v1494_v53  ;;  %v1459_v53 = vld [vmem:[#allocation2 + $0x198] sm:$0xff] }
 0x1ea   : > { %1716 = vrot.lane.b32.xlu0 %v1637_v51, %s4992_s11 }
 0x1eb   : > { %v1362_v18 = vpop.permute.xlu1 %1361 }
 0x1ec   : > { %1427 = vst.msk [vmem:[#allocation4 + $0xf8] sm:$0xff] %vm1395_vm7, %v1362_v18  ;;  %v1498_v63 = vpop.permute.xlu0 %1497 }
 0x1ed   : > { %1714 = vrot.lane.b32.xlu1 %v1636_v13, %s4992_s11  ;;  %1592 = vst.msk [vmem:[#allocation4 + $0x10] sm:$0xff] %vm1589_vm8, %v1498_v63 }
 0x1ee   : > { %1909 = vrot.lane.b32.xlu0 %v1830_v56, %s4993_s14 }
 0x1ef   : > { %v1496_v10 = vpop.permute.xlu1 %1495 }
 0x1f0   : > { %1591 = vst.msk [vmem:[#allocation4 + $0x8] sm:$0xff] %vm1589_vm8, %v1496_v10  ;;  %v1502_v14 = vpop.permute.xlu0 %1501 }
 0x1f1   : > { %1907 = vrot.lane.b32.xlu1 %v1829_v34, %s4993_s14  ;;  %1594 = vst.msk [vmem:[#allocation4 + $0x20] sm:$0xff] %vm1589_vm8, %v1502_v14 }
 0x1f2   : > { %1720 = vrot.lane.b32.xlu0 %v1639_v23, %s4992_s11 }
 0x1f3   : > { %v1500_v19 = vpop.permute.xlu1 %1499 }
 0x1f4   : > { %1593 = vst.msk [vmem:[#allocation4 + $0x18] sm:$0xff] %vm1589_vm8, %v1500_v19  ;;  %v1506_v15 = vpop.permute.xlu0 %1505 }
 0x1f5   : > { %1718 = vrot.lane.b32.xlu1 %v1638_v24, %s4992_s11  ;;  %1596 = vst.msk [vmem:[#allocation4 + $0x30] sm:$0xff] %vm1589_vm8, %v1506_v15 }
 0x1f6   : > { %1913 = vrot.lane.b32.xlu0 %v1832_v20, %s4993_s14 }
 0x1f7   : > { %v1504_v16 = vpop.permute.xlu1 %1503 }
 0x1f8   : > { %1595 = vst.msk [vmem:[#allocation4 + $0x28] sm:$0xff] %vm1589_vm8, %v1504_v16  ;;  %v1510_v49 = vpop.permute.xlu0 %1509 }
 0x1f9   : > { %1911 = vrot.lane.b32.xlu1 %v1831_v47, %s4993_s14  ;;  %1598 = vst.msk [vmem:[#allocation4 + $0x40] sm:$0xff] %vm1589_vm8, %v1510_v49 }
 0x1fa   : > { %1724 = vrot.lane.b32.xlu0 %v1641_v1, %s4992_s11 }
 0x1fb   : > { %v1508_v5 = vpop.permute.xlu1 %1507 }
 0x1fc   : > { %1597 = vst.msk [vmem:[#allocation4 + $0x38] sm:$0xff] %vm1589_vm8, %v1508_v5  ;;  %v1514_v6 = vpop.permute.xlu0 %1513 }
 0x1fd   : > { %1722 = vrot.lane.b32.xlu1 %v1640_v12, %s4992_s11  ;;  %1600 = vst.msk [vmem:[#allocation4 + $0x50] sm:$0xff] %vm1589_vm8, %v1514_v6 }
 0x1fe   : > { %1917 = vrot.lane.b32.xlu0 %v1834_v25, %s4993_s14 }
 0x1ff   : > { %v1512_v2 = vpop.permute.xlu1 %1511 }
 0x200   : > { %1599 = vst.msk [vmem:[#allocation4 + $0x48] sm:$0xff] %vm1589_vm8, %v1512_v2  ;;  %v1518_v9 = vpop.permute.xlu0 %1517 }
 0x201   : > { %1915 = vrot.lane.b32.xlu1 %v1833_v27, %s4993_s14  ;;  %1602 = vst.msk [vmem:[#allocation4 + $0x60] sm:$0xff] %vm1589_vm8, %v1518_v9 }
 0x202   : > { %1728 = vrot.lane.b32.xlu0 %v1643_v30, %s4992_s11 }
 0x203   : > { %v1516_v31 = vpop.permute.xlu1 %1515 }
 0x204   : > { %1601 = vst.msk [vmem:[#allocation4 + $0x58] sm:$0xff] %vm1589_vm8, %v1516_v31  ;;  %v1522_v52 = vpop.permute.xlu0 %1521 }
 0x205   : > { %1726 = vrot.lane.b32.xlu1 %v1642_v50, %s4992_s11  ;;  %1604 = vst.msk [vmem:[#allocation4 + $0x70] sm:$0xff] %vm1589_vm8, %v1522_v52 }
 0x206   : > { %1921 = vrot.lane.b32.xlu0 %v1836_v54, %s4993_s14 }
 0x207   : > { %v1520_v55 = vpop.permute.xlu1 %1519 }
 0x208   : > { %1603 = vst.msk [vmem:[#allocation4 + $0x68] sm:$0xff] %vm1589_vm8, %v1520_v55  ;;  %v1526_v58 = vpop.permute.xlu0 %1525 }
 0x209   : > { %1919 = vrot.lane.b32.xlu1 %v1835_v57, %s4993_s14  ;;  %1606 = vst.msk [vmem:[#allocation4 + $0x80] sm:$0xff] %vm1589_vm8, %v1526_v58 }
 0x20a   : > { %1732 = vrot.lane.b32.xlu0 %v1645_v59, %s4992_s11 }
 0x20b   : > { %v1524_v60 = vpop.permute.xlu1 %1523 }
 0x20c   : > { %1605 = vst.msk [vmem:[#allocation4 + $0x78] sm:$0xff] %vm1589_vm8, %v1524_v60  ;;  %v1530_v62 = vpop.permute.xlu0 %1529 }
 0x20d   : > { %1730 = vrot.lane.b32.xlu1 %v1644_v61, %s4992_s11  ;;  %1608 = vst.msk [vmem:[#allocation4 + $0x90] sm:$0xff] %vm1589_vm8, %v1530_v62 }
 0x20e   : > { %1925 = vrot.lane.b32.xlu0 %v1838_v0, %s4993_s14 }
 0x20f   : > { %v1528_v7 = vpop.permute.xlu1 %1527 }
 0x210   : > { %1607 = vst.msk [vmem:[#allocation4 + $0x88] sm:$0xff] %vm1589_vm8, %v1528_v7  ;;  %v1534_v45 = vpop.permute.xlu0 %1533 }
 0x211   : > { %1923 = vrot.lane.b32.xlu1 %v1837_v8, %s4993_s14  ;;  %1610 = vst.msk [vmem:[#allocation4 + $0xa0] sm:$0xff] %vm1589_vm8, %v1534_v45 }
 0x212   : > { %1736 = vrot.lane.b32.xlu0 %v1647_v48, %s4992_s11 }
 0x213   : > { %v1532_v37 = vpop.permute.xlu1 %1531 }
 0x214   : > { %1609 = vst.msk [vmem:[#allocation4 + $0x98] sm:$0xff] %vm1589_vm8, %v1532_v37  ;;  %v1538_v35 = vpop.permute.xlu0 %1537 }
 0x215   : > { %1734 = vrot.lane.b32.xlu1 %v1646_v38, %s4992_s11  ;;  %1612 = vst.msk [vmem:[#allocation4 + $0xb0] sm:$0xff] %vm1589_vm8, %v1538_v35 }
 0x216   : > { %1929 = vrot.lane.b32.xlu0 %v1840_v36, %s4993_s14 }
 0x217   : > { %v1536_v39 = vpop.permute.xlu1 %1535 }
 0x218   : > { %1611 = vst.msk [vmem:[#allocation4 + $0xa8] sm:$0xff] %vm1589_vm8, %v1536_v39  ;;  %v1542_v33 = vpop.permute.xlu0 %1541 }
 0x219   : > { %1927 = vrot.lane.b32.xlu1 %v1839_v32, %s4993_s14  ;;  %1614 = vst.msk [vmem:[#allocation4 + $0xc0] sm:$0xff] %vm1589_vm8, %v1542_v33 }
 0x21a   : > { %1740 = vrot.lane.b32.xlu0 %v1649_v28, %s4992_s11 }
 0x21b   : > { %v1540_v41 = vpop.permute.xlu1 %1539 }
 0x21c   : > { %1613 = vst.msk [vmem:[#allocation4 + $0xb8] sm:$0xff] %vm1589_vm8, %v1540_v41  ;;  %v1546_v29 = vpop.permute.xlu0 %1545 }
 0x21d   : > { %1738 = vrot.lane.b32.xlu1 %v1648_v40, %s4992_s11  ;;  %1616 = vst.msk [vmem:[#allocation4 + $0xd0] sm:$0xff] %vm1589_vm8, %v1546_v29 }
 0x21e   : > { %1933 = vrot.lane.b32.xlu0 %v1842_v21, %s4993_s14 }
 0x21f   : > { %v1544_v43 = vpop.permute.xlu1 %1543 }
 0x220   : > { %1615 = vst.msk [vmem:[#allocation4 + $0xc8] sm:$0xff] %vm1589_vm8, %v1544_v43  ;;  %v1550_v17 = vpop.permute.xlu0 %1549 }
 0x221   : > { %1931 = vrot.lane.b32.xlu1 %v1841_v42, %s4993_s14  ;;  %1618 = vst.msk [vmem:[#allocation4 + $0xe0] sm:$0xff] %vm1589_vm8, %v1550_v17 }
 0x222   : > { %1742 = vrot.lane.b32.xlu0 %v5919_v11, %s4992_s11 }
 0x223   : > { %v1548_v22 = vpop.permute.xlu1 %1547 }
 0x224   : > { %1617 = vst.msk [vmem:[#allocation4 + $0xd8] sm:$0xff] %vm1589_vm8, %v1548_v22  ;;  %v1689_v46 = vpop.permute.xlu0 %1688 }
 0x225   : > { %1551 = vrot.lane.b32.xlu1 %v1458_v44, %s4991_s9  ;;  %1784 = vst.msk [vmem:[#allocation4 + $0x8] sm:$0xff] %vm1782_vm9, %v1689_v46 }
 0x226   : > { %1935 = vrot.lane.b32.xlu0 %v6019_v4, %s4993_s14  ;;  %v1460_v4 = vld [vmem:[#allocation2 + $0x1a0] sm:$0xff] }
 0x227   : > { %v1687_v51 = vpop.permute.xlu1 %1686 }
 0x228   : > { %1783 = vst.msk [vmem:[#allocation4] sm:$0xff] %vm1782_vm9, %v1687_v51  ;;  %v1882_v11 = vpop.permute.xlu0 %1881 }
 0x229   : > { %1744 = vrot.lane.b32.xlu1 %v5930_v26, %s4992_s11  ;;  %1977 = vst.msk [vmem:[#allocation4 + $0x8] sm:$0xff] %vm1975_vm10, %v1882_v11 }
 0x22a   : > { %1553 = vrot.lane.b32.xlu0 %v1459_v53, %s4991_s9 }
 0x22b   : > { %v1880_v13 = vpop.permute.xlu1 %1879 }
 0x22c   : > { %1976 = vst.msk [vmem:[#allocation4] sm:$0xff] %vm1975_vm10, %v1880_v13  ;;  %v1693_v18 = vpop.permute.xlu0 %1692 }
 0x22d   : > { %1937 = vrot.lane.b32.xlu1 %v6030_v3, %s4993_s14  ;;  %1786 = vst.msk [vmem:[#allocation4 + $0x18] sm:$0xff] %vm1782_vm9, %v1693_v18 }
 0x22f   : > { %v1691_v56 = vpop.permute.xlu1 %1690 }
 0x230   : > { %1785 = vst.msk [vmem:[#allocation4 + $0x10] sm:$0xff] %vm1782_vm9, %v1691_v56  ;;  %v1886_v26 = vpop.permute.xlu0 %1885  ;;  %v2009_v63 = vld [vmem:[#allocation4 + $0x8] sm:$0xff] }
 0x231   : > { %1555 = vrot.lane.b32.xlu1 %v1460_v4, %s4991_s9  ;;  %1979 = vst.msk [vmem:[#allocation4 + $0x18] sm:$0xff] %vm1975_vm10, %v1886_v26 }
 0x233   : > { %v1884_v34 = vpop.permute.xlu1 %1883  ;;  %v2008_v10 = vld [vmem:[#allocation4] sm:$0xff] }
 0x234   : > { %1978 = vst.msk [vmem:[#allocation4 + $0x10] sm:$0xff] %vm1975_vm10, %v1884_v34  ;;  %4814 = vmatprep.mubr.msk.f32.mxu0 %vm2049_vm11, %v2008_v10  ;;  %v1697_v3 = vpop.permute.xlu0 %1696 }
 0x235   : > { %4815 = vmatmul.mubr.msk.f32.vlgmr.msra.gmra.mrb[0].mxu0 %vm2049_vm11, %v2009_v63  ;;  %1788 = vst.msk [vmem:[#allocation4 + $0x28] sm:$0xff] %vm1782_vm9, %v1697_v3 }
 0x237   : > { %v1695_v23 = vpop.permute.xlu1 %1694 }
 0x238   : > { %1787 = vst.msk [vmem:[#allocation4 + $0x20] sm:$0xff] %vm1782_vm9, %v1695_v23  ;;  %v1890_v14 = vpop.permute.xlu0 %1889  ;;  %v2011_v24 = vld [vmem:[#allocation4 + $0x18] sm:$0xff] }
 0x239   : > { %1981 = vst.msk [vmem:[#allocation4 + $0x28] sm:$0xff] %vm1975_vm10, %v1890_v14  ;;  %v1652_v14 = vld [vmem:[#allocation2 + $0x199] sm:$0xff] }
 0x23a   : > { %1746 = vrot.lane.b32.xlu0 %v1652_v14, %s4992_s11 }
 0x23b   : > { %v1888_v19 = vpop.permute.xlu1 %1887  ;;  %v2010_v20 = vld [vmem:[#allocation4 + $0x10] sm:$0xff] }
 0x23c   : > { %1980 = vst.msk [vmem:[#allocation4 + $0x20] sm:$0xff] %vm1975_vm10, %v1888_v19  ;;  %4817 = vmatprep.mubr.msk.f32.mxu0 %vm2049_vm11, %v2010_v20  ;;  %v1701_v15 = vpop.permute.xlu0 %1700 }
 0x23d   : > { %4818 = vmatmul.mubr.msk.f32.gmra.mrb[2].mxu0 %vm2049_vm11, %v2011_v24  ;;  %1790 = vst.msk [vmem:[#allocation4 + $0x38] sm:$0xff] %vm1782_vm9, %v1701_v15  ;;  %v1653_v24 = vld [vmem:[#allocation2 + $0x1a1] sm:$0xff] }
 0x23e   : > { %1748 = vrot.lane.b32.xlu1 %v1653_v24, %s4992_s11  ;;  %v1845_v15 = vld [vmem:[#allocation2 + $0x19a] sm:$0xff] }
 0x23f   : > { %v1699_v47 = vpop.permute.xlu1 %1698  ;;  %1939 = vrot.lane.b32.xlu0 %v1845_v15, %s4993_s14 }
 0x240   : > { %1789 = vst.msk [vmem:[#allocation4 + $0x30] sm:$0xff] %vm1782_vm9, %v1699_v47  ;;  %v1894_v16 = vpop.permute.xlu0 %1893  ;;  %v2013_v1 = vld [vmem:[#allocation4 + $0x28] sm:$0xff] }
 0x241   : > { %1983 = vst.msk [vmem:[#allocation4 + $0x38] sm:$0xff] %vm1975_vm10, %v1894_v16  ;;  %v1846_v47 = vld [vmem:[#allocation2 + $0x1a2] sm:$0xff] }
 0x242   : > { %1941 = vrot.lane.b32.xlu1 %v1846_v47, %s4993_s14 }
 0x243   : > { %v1892_v49 = vpop.permute.xlu1 %1891  ;;  %v2012_v12 = vld [vmem:[#allocation4 + $0x20] sm:$0xff] }
 0x244   : > { %1982 = vst.msk [vmem:[#allocation4 + $0x30] sm:$0xff] %vm1975_vm10, %v1892_v49  ;;  %4820 = vmatprep.mubr.msk.f32.mxu0 %vm2049_vm11, %v2012_v12  ;;  %v1705_v5 = vpop.permute.xlu0 %1704 }
 0x245   : > { %4821 = vmatmul.mubr.msk.f32.gmra.mrb[4].mxu0 %vm2049_vm11, %v2013_v1  ;;  %1792 = vst.msk [vmem:[#allocation4 + $0x48] sm:$0xff] %vm1782_vm9, %v1705_v5  ;;  %v2577_v5 = vld [vmem:[#allocation3 + $0x1] sm:$0xff] }
 0x246   : > { %2641 = vrot.lane.b32.xlu0 %v2577_v5, %s4986_s28 }
 0x247   : > { %v1703_v25 = vpop.permute.xlu1 %1702 }
 0x248   : > { %1791 = vst.msk [vmem:[#allocation4 + $0x40] sm:$0xff] %vm1782_vm9, %v1703_v25  ;;  %v1898_v6 = vpop.permute.xlu0 %1897  ;;  %v2015_v27 = vld [vmem:[#allocation4 + $0x38] sm:$0xff] }
 0x249   : > { %1985 = vst.msk [vmem:[#allocation4 + $0x48] sm:$0xff] %vm1975_vm10, %v1898_v6  ;;  %v2578_v25 = vld [vmem:[#allocation3 + $0x9] sm:$0xff] }
 0x24a   : > { %2643 = vrot.lane.b32.xlu1 %v2578_v25, %s4986_s28 }
 0x24b   : > { %v1896_v2 = vpop.permute.xlu1 %1895  ;;  %v2014_v30 = vld [vmem:[#allocation4 + $0x30] sm:$0xff] }
 0x24c   : > { %1984 = vst.msk [vmem:[#allocation4 + $0x40] sm:$0xff] %vm1975_vm10, %v1896_v2  ;;  %4823 = vmatprep.mubr.msk.f32.mxu0 %vm2049_vm11, %v2014_v30  ;;  %v1709_v9 = vpop.permute.xlu0 %1708 }
 0x24d   : > { %4824 = vmatmul.mubr.msk.f32.gmra.mrb[6].mxu0 %vm2049_vm11, %v2015_v27  ;;  %1794 = vst.msk [vmem:[#allocation4 + $0x58] sm:$0xff] %vm1782_vm9, %v1709_v9 }
 0x24f   : > { %v1707_v50 = vpop.permute.xlu1 %1706 }
 0x250   : > { %1793 = vst.msk [vmem:[#allocation4 + $0x50] sm:$0xff] %vm1782_vm9, %v1707_v50  ;;  %v1902_v31 = vpop.permute.xlu0 %1901  ;;  %v2017_v54 = vld [vmem:[#allocation4 + $0x48] sm:$0xff] }
 0x251   : > { %1987 = vst.msk [vmem:[#allocation4 + $0x58] sm:$0xff] %vm1975_vm10, %v1902_v31 }
 0x253   : > { %v1900_v52 = vpop.permute.xlu1 %1899  ;;  %v2016_v57 = vld [vmem:[#allocation4 + $0x40] sm:$0xff] }
 0x254   : > { %1986 = vst.msk [vmem:[#allocation4 + $0x50] sm:$0xff] %vm1975_vm10, %v1900_v52  ;;  %4826 = vmatprep.mubr.msk.f32.mxu0 %vm2049_vm11, %v2016_v57  ;;  %v1713_v55 = vpop.permute.xlu0 %1712 }
 0x255   : > { %4827 = vmatmul.mubr.msk.f32.gmra.mrb[8].mxu0 %vm2049_vm11, %v2017_v54  ;;  %1796 = vst.msk [vmem:[#allocation4 + $0x68] sm:$0xff] %vm1782_vm9, %v1713_v55 }
 0x257   : > { %v1711_v59 = vpop.permute.xlu1 %1710 }
 0x258   : > { %1795 = vst.msk [vmem:[#allocation4 + $0x60] sm:$0xff] %vm1782_vm9, %v1711_v59  ;;  %v1906_v58 = vpop.permute.xlu0 %1905  ;;  %v2019_v61 = vld [vmem:[#allocation4 + $0x58] sm:$0xff] }
 0x259   : > { %1989 = vst.msk [vmem:[#allocation4 + $0x68] sm:$0xff] %vm1975_vm10, %v1906_v58 }
 0x25b   : > { %v1904_v60 = vpop.permute.xlu1 %1903  ;;  %v2018_v0 = vld [vmem:[#allocation4 + $0x50] sm:$0xff] }
 0x25c   : > { %1988 = vst.msk [vmem:[#allocation4 + $0x60] sm:$0xff] %vm1975_vm10, %v1904_v60  ;;  %4829 = vmatprep.mubr.msk.f32.mxu0 %vm2049_vm11, %v2018_v0  ;;  %v1717_v62 = vpop.permute.xlu0 %1716  ;;  %v2513_v0 = vld [vmem:[#allocation3] sm:$0xff] }
 0x25d   : > { %4830 = vmatmul.mubr.msk.f32.gmra.mrb[10].mxu0 %vm2049_vm11, %v2019_v61  ;;  %1798 = vst.msk [vmem:[#allocation4 + $0x78] sm:$0xff] %vm1782_vm9, %v1717_v62  ;;  %v2514_v62 = vld [vmem:[#allocation3 + $0x8] sm:$0xff] }
 0x25e   : > { %2545 = vst.msk [vmem:[#allocation4] sm:$0xff] %vm252_vm0, %v2513_v0  ;;  %2546 = vst.msk [vmem:[#allocation4 + $0x8] sm:$0xff] %vm252_vm0, %v2514_v62 }
 0x25f   : > { %v1715_v8 = vpop.permute.xlu1 %1714 }
 0x260   : > { %1797 = vst.msk [vmem:[#allocation4 + $0x70] sm:$0xff] %vm1782_vm9, %v1715_v8  ;;  %v1910_v7 = vpop.permute.xlu0 %1909  ;;  %v2021_v48 = vld [vmem:[#allocation4 + $0x68] sm:$0xff] }
 0x261   : > { %1991 = vst.msk [vmem:[#allocation4 + $0x78] sm:$0xff] %vm1975_vm10, %v1910_v7 }
 0x263   : > { %v1908_v45 = vpop.permute.xlu1 %1907  ;;  %v2020_v38 = vld [vmem:[#allocation4 + $0x60] sm:$0xff] }
 0x264   : > { %1990 = vst.msk [vmem:[#allocation4 + $0x70] sm:$0xff] %vm1975_vm10, %v1908_v45  ;;  %4832 = vmatprep.mubr.msk.f32.mxu0 %vm2049_vm11, %v2020_v38  ;;  %v1721_v37 = vpop.permute.xlu0 %1720 }
 0x265   : > { %4833 = vmatmul.mubr.msk.f32.gmra.mrb[12].mxu0 %vm2049_vm11, %v2021_v48  ;;  %1800 = vst.msk [vmem:[#allocation4 + $0x88] sm:$0xff] %vm1782_vm9, %v1721_v37  ;;  %v6381_v48 = vld [vmem:[%s7478_s2] ss:$0 sm:$0xff] }
 0x267   : > { %v1719_v36 = vpop.permute.xlu1 %1718 }
 0x268   : > { %1799 = vst.msk [vmem:[#allocation4 + $0x80] sm:$0xff] %vm1782_vm9, %v1719_v36  ;;  %v1914_v35 = vpop.permute.xlu0 %1913  ;;  %v2023_v32 = vld [vmem:[#allocation4 + $0x78] sm:$0xff]  ;;  %v6388_v36 = vld [vmem:[%s7479_s3] ss:$0 sm:$0xff] }
 0x269   : > { %1993 = vst.msk [vmem:[#allocation4 + $0x88] sm:$0xff] %vm1975_vm10, %v1914_v35 }
 0x26b   : > { %v1912_v39 = vpop.permute.xlu1 %1911  ;;  %v2022_v28 = vld [vmem:[#allocation4 + $0x70] sm:$0xff] }
 0x26c   : > { %1992 = vst.msk [vmem:[#allocation4 + $0x80] sm:$0xff] %vm1975_vm10, %v1912_v39  ;;  %4835 = vmatprep.mubr.msk.f32.mxu0 %vm2049_vm11, %v2022_v28  ;;  %v1725_v33 = vpop.permute.xlu0 %1724 }
 0x26d   : > { %4836 = vmatmul.mubr.msk.f32.gmra.mrb[14].mxu0 %vm2049_vm11, %v2023_v32  ;;  %1802 = vst.msk [vmem:[#allocation4 + $0x98] sm:$0xff] %vm1782_vm9, %v1725_v33 }
 0x26f   : > { %v1723_v40 = vpop.permute.xlu1 %1722 }
 0x270   : > { %1801 = vst.msk [vmem:[#allocation4 + $0x90] sm:$0xff] %vm1782_vm9, %v1723_v40  ;;  %v1918_v41 = vpop.permute.xlu0 %1917  ;;  %v2025_v21 = vld [vmem:[#allocation4 + $0x88] sm:$0xff] }
 0x271   : > { %1995 = vst.msk [vmem:[#allocation4 + $0x98] sm:$0xff] %vm1975_vm10, %v1918_v41 }
 0x273   : > { %v1916_v29 = vpop.permute.xlu1 %1915  ;;  %v2024_v42 = vld [vmem:[#allocation4 + $0x80] sm:$0xff] }
 0x274   : > { %1994 = vst.msk [vmem:[#allocation4 + $0x90] sm:$0xff] %vm1975_vm10, %v1916_v29  ;;  %4838 = vmatprep.mubr.msk.f32.mxu0 %vm2049_vm11, %v2024_v42  ;;  %v1729_v43 = vpop.permute.xlu0 %1728 }
 0x275   : > { %4839 = vmatmul.mubr.msk.f32.gmra.mrb[16].mxu0 %vm2049_vm11, %v2025_v21  ;;  %1804 = vst.msk [vmem:[#allocation4 + $0xa8] sm:$0xff] %vm1782_vm9, %v1729_v43 }
 0x277   : > { %v1727_v17 = vpop.permute.xlu1 %1726 }
 0x278   : > { %1803 = vst.msk [vmem:[#allocation4 + $0xa0] sm:$0xff] %vm1782_vm9, %v1727_v17  ;;  %v1922_v44 = vpop.permute.xlu0 %1921  ;;  %v2027_v22 = vld [vmem:[#allocation4 + $0x98] sm:$0xff] }
 0x279   : > { %1997 = vst.msk [vmem:[#allocation4 + $0xa8] sm:$0xff] %vm1975_vm10, %v1922_v44 }
 0x27b   : > { %v1920_v46 = vpop.permute.xlu1 %1919  ;;  %v2026_v51 = vld [vmem:[#allocation4 + $0x90] sm:$0xff] }
 0x27c   : > { %1996 = vst.msk [vmem:[#allocation4 + $0xa0] sm:$0xff] %vm1975_vm10, %v1920_v46  ;;  %4841 = vmatprep.mubr.msk.f32.mxu0 %vm2049_vm11, %v2026_v51  ;;  %v1733_v53 = vpop.permute.xlu0 %1732 }
 0x27d   : > { %4842 = vmatmul.mubr.msk.f32.gmra.mrb[18].mxu0 %vm2049_vm11, %v2027_v22  ;;  %1806 = vst.msk [vmem:[#allocation4 + $0xb8] sm:$0xff] %vm1782_vm9, %v1733_v53 }
 0x27f   : > { %v1731_v11 = vpop.permute.xlu1 %1730 }
 0x280   : > { %1805 = vst.msk [vmem:[#allocation4 + $0xb0] sm:$0xff] %vm1782_vm9, %v1731_v11  ;;  %v1926_v13 = vpop.permute.xlu0 %1925  ;;  %v2029_v18 = vld [vmem:[#allocation4 + $0xa8] sm:$0xff] }
 0x281   : > { %1999 = vst.msk [vmem:[#allocation4 + $0xb8] sm:$0xff] %vm1975_vm10, %v1926_v13 }
 0x283   : > { %v1924_v4 = vpop.permute.xlu1 %1923  ;;  %v2028_v56 = vld [vmem:[#allocation4 + $0xa0] sm:$0xff] }
 0x284   : > { %1998 = vst.msk [vmem:[#allocation4 + $0xb0] sm:$0xff] %vm1975_vm10, %v1924_v4  ;;  %4844 = vmatprep.mubr.msk.f32.mxu0 %vm2049_vm11, %v2028_v56  ;;  %v1737_v26 = vpop.permute.xlu0 %1736 }
 0x285   : > { %4845 = vmatmul.mubr.msk.f32.gmra.mrb[20].mxu0 %vm2049_vm11, %v2029_v18  ;;  %1808 = vst.msk [vmem:[#allocation4 + $0xc8] sm:$0xff] %vm1782_vm9, %v1737_v26 }
 0x287   : > { %v1735_v63 = vpop.permute.xlu1 %1734 }
 0x288   : > { %1807 = vst.msk [vmem:[#allocation4 + $0xc0] sm:$0xff] %vm1782_vm9, %v1735_v63  ;;  %v1930_v34 = vpop.permute.xlu0 %1929  ;;  %v2031_v10 = vld [vmem:[#allocation4 + $0xb8] sm:$0xff] }
 0x289   : > { %2001 = vst.msk [vmem:[#allocation4 + $0xc8] sm:$0xff] %vm1975_vm10, %v1930_v34 }
 0x28b   : > { %v1928_v3 = vpop.permute.xlu1 %1927  ;;  %v2030_v23 = vld [vmem:[#allocation4 + $0xb0] sm:$0xff] }
 0x28c   : > { %2000 = vst.msk [vmem:[#allocation4 + $0xc0] sm:$0xff] %vm1975_vm10, %v1928_v3  ;;  %4847 = vmatprep.mubr.msk.f32.mxu0 %vm2049_vm11, %v2030_v23  ;;  %v1741_v19 = vpop.permute.xlu0 %1740 }
 0x28d   : > { %4848 = vmatmul.mubr.msk.f32.gmra.mrb[22].mxu0 %vm2049_vm11, %v2031_v10  ;;  %1810 = vst.msk [vmem:[#allocation4 + $0xd8] sm:$0xff] %vm1782_vm9, %v1741_v19 }
 0x28f   : > { %v1739_v20 = vpop.permute.xlu1 %1738 }
 0x290   : > { %1809 = vst.msk [vmem:[#allocation4 + $0xd0] sm:$0xff] %vm1782_vm9, %v1739_v20  ;;  %v1934_v16 = vpop.permute.xlu0 %1933  ;;  %v2033_v1 = vld [vmem:[#allocation4 + $0xc8] sm:$0xff] }
 0x291   : > { %2003 = vst.msk [vmem:[#allocation4 + $0xd8] sm:$0xff] %vm1975_vm10, %v1934_v16 }
 0x293   : > { %v1932_v49 = vpop.permute.xlu1 %1931  ;;  %v2032_v12 = vld [vmem:[#allocation4 + $0xc0] sm:$0xff] }
 0x294   : > { %2002 = vst.msk [vmem:[#allocation4 + $0xd0] sm:$0xff] %vm1975_vm10, %v1932_v49  ;;  %4850 = vmatprep.mubr.msk.f32.mxu0 %vm2049_vm11, %v2032_v12  ;;  %v1743_v6 = vpop.permute.xlu0 %1742 }
 0x295   : > { %4851 = vmatmul.mubr.msk.f32.gmra.mrb[24].mxu0 %vm2049_vm11, %v2033_v1  ;;  %1811 = vst.msk [vmem:[#allocation4 + $0xe0] sm:$0xff] %vm1782_vm9, %v1743_v6 }
 0x297   : > { %v1552_v27 = vpop.permute.xlu1 %1551 }
 0x298   : > { %1619 = vst.msk [vmem:[#allocation4 + $0xe8] sm:$0xff] %vm1589_vm8, %v1552_v27  ;;  %v1936_v2 = vpop.permute.xlu0 %1935  ;;  %v2035_v30 = vld [vmem:[#allocation4 + $0xd8] sm:$0xff] }
 0x299   : > { %2004 = vst.msk [vmem:[#allocation4 + $0xe0] sm:$0xff] %vm1975_vm10, %v1936_v2 }
 0x29b   : > { %v1745_v9 = vpop.permute.xlu1 %1744  ;;  %v2034_v50 = vld [vmem:[#allocation4 + $0xd0] sm:$0xff] }
 0x29c   : > { %1812 = vst.msk [vmem:[#allocation4 + $0xe8] sm:$0xff] %vm1782_vm9, %v1745_v9  ;;  %4853 = vmatprep.mubr.msk.f32.mxu0 %vm2049_vm11, %v2034_v50  ;;  %v1554_v57 = vpop.permute.xlu0 %1553 }
 0x29d   : > { %4854 = vmatmul.mubr.msk.f32.gmra.mrb[26].mxu0 %vm2049_vm11, %v2035_v30  ;;  %1620 = vst.msk [vmem:[#allocation4 + $0xf0] sm:$0xff] %vm1589_vm8, %v1554_v57 }
 0x29f   : > { %v1938_v31 = vpop.permute.xlu1 %1937 }
 0x2a0   : > { %2005 = vst.msk [vmem:[#allocation4 + $0xe8] sm:$0xff] %vm1975_vm10, %v1938_v31  ;;  %v2036_v54 = vld [vmem:[#allocation4 + $0xe0] sm:$0xff] }
 0x2a1   : > { %4856 = vmatprep.mubr.msk.f32.mxu0 %vm2049_vm11, %v2036_v54 }
 0x2a3   : > { %v1556_v55 = vpop.permute.xlu1 %1555 }
 0x2a4   : > { %1621 = vst.msk [vmem:[#allocation4 + $0xf8] sm:$0xff] %vm1589_vm8, %v1556_v55 }
 0x2a7   : > { %v2037_v52 = vld [vmem:[#allocation4 + $0xe8] sm:$0xff] }
 0x2a8   : > { %4857 = vmatmul.mubr.msk.f32.gmra.mrb[28].mxu0 %vm2049_vm11, %v2037_v52 }
 0x2ac   : > { %v1747_v59 = vpop.permute.xlu0 %1746 }
 0x2ad   : > { %1813 = vst.msk [vmem:[#allocation4 + $0xf0] sm:$0xff] %vm1782_vm9, %v1747_v59 }
 0x2b0   : > { %v1749_v58 = vpop.permute.xlu1 %1748 }
 0x2b1   : > { %1814 = vst.msk [vmem:[#allocation4 + $0xf8] sm:$0xff] %vm1782_vm9, %v1749_v58  ;;  %v1940_v61 = vpop.permute.xlu0 %1939 }
 0x2b2   : > { %2006 = vst.msk [vmem:[#allocation4 + $0xf0] sm:$0xff] %vm1975_vm10, %v1940_v61 }
 0x2b4   : > { %v1942_v60 = vpop.permute.xlu1 %1941 }
 0x2b5   : > { %2007 = vst.msk [vmem:[#allocation4 + $0xf8] sm:$0xff] %vm1975_vm10, %v1942_v60 }
 0x2b8   : > { %v2642_v8 = vpop.permute.xlu0 %2641 }
 0x2b9   : > { %2737 = vst.msk [vmem:[#allocation4] sm:$0xff] %vm623_vm3, %v2642_v8  ;;  %v2038_v32 = vld [vmem:[#allocation4 + $0xf0] sm:$0xff] }
 0x2ba   : > { %4859 = vmatprep.mubr.msk.f32.mxu0 %vm2049_vm11, %v2038_v32 }
 0x2bc   : > { %v2644_v45 = vpop.permute.xlu1 %2643  ;;  %v2039_v28 = vld [vmem:[#allocation4 + $0xf8] sm:$0xff] }
 0x2bd   : > { %2738 = vst.msk [vmem:[#allocation4 + $0x8] sm:$0xff] %vm623_vm3, %v2644_v45  ;;  %4860 = vmatmul.mubr.msk.f32.gmra.mrb[30].mxu0 %vm2049_vm11, %v2039_v28 }
 0x308   : > { %v4816_v7 = vpop.f32.mrb[0].mxu0 }
 0x309   : > { %v2372_v38 = vmax.f32 %v4816_v7, 0.0  ;;  %v2212_v37 = vpop.f32.mrb[1].mxu0 }
 0x30a   : > { %v2371_v35 = vmax.f32 %v2212_v37, 0.0 }
 0x30b   : > { %v2411_v39 = vmul.f32 %v6381_v48, %v2372_v38 }
 0x30c   : > { %v2410_v33 = vmul.f32 %v6381_v48, %v2371_v35 }
 0x30d   : > { %v2450_v40 = vadd.f32 %v6388_v36, %v2411_v39 }
 0x30e   : > { %v2449_v41 = vadd.f32 %v6388_v36, %v2410_v33 }
 0x30f   : > { %2482 = vst.msk [vmem:[#allocation3 + $0x21] sm:$0xff] %vm252_vm0, %v2450_v40 }
 0x310   : > { %2481 = vst.msk [vmem:[#allocation3 + $0x19] sm:$0xff] %vm252_vm0, %v2449_v41  ;;  %v4819_v21 = vpop.f32.mrb[2].mxu0 }
 0x311   : > { %v2374_v29 = vmax.f32 %v4819_v21, 0.0  ;;  %v2222_v42 = vpop.f32.mrb[3].mxu0 }
 0x312   : > { %v2373_v43 = vmax.f32 %v2222_v42, 0.0 }
 0x313   : > { %v2413_v17 = vmul.f32 %v6381_v48, %v2374_v29 }
 0x314   : > { %v2412_v44 = vmul.f32 %v6381_v48, %v2373_v43 }
 0x315   : > { %v2452_v22 = vadd.f32 %v6388_v36, %v2413_v17 }
 0x316   : > { %v2451_v46 = vadd.f32 %v6388_v36, %v2412_v44  ;;  %v6402_v51 = vld [vmem:[#allocation3 + $0x21] sm:$0xff] }
 0x317   : > { %2484 = vst.msk [vmem:[#allocation3 + $0x39] sm:$0xff] %vm252_vm0, %v2452_v22  ;;  %2647 = vrot.lane.b32.xlu1 %v6402_v51, %s4986_s28  ;;  %v6407_v53 = vld [vmem:[#allocation3 + $0x19] sm:$0xff] }
 0x318   : > { %v6409_v11 = vld [vmem:[#allocation3 + $0x18] sm:$0xff]  ;;  %v6411_v13 = vld [vmem:[#allocation3 + $0x20] sm:$0xff]  ;;  %2483 = vst.msk [vmem:[#allocation3 + $0x31] sm:$0xff] %vm252_vm0, %v2451_v46  ;;  %2645 = vrot.lane.b32.xlu0 %v6407_v53, %s4986_s28  ;;  %v4822_v18 = vpop.f32.mrb[4].mxu0 }
 0x319   : > { %2547 = vst.msk [vmem:[#allocation4 + $0x10] sm:$0xff] %vm252_vm0, %v6409_v11  ;;  %2548 = vst.msk [vmem:[#allocation4 + $0x18] sm:$0xff] %vm252_vm0, %v6411_v13  ;;  %v2376_v4 = vmax.f32 %v4822_v18, 0.0  ;;  %v2232_v56 = vpop.f32.mrb[5].mxu0 }
 0x31a   : > { %v2375_v26 = vmax.f32 %v2232_v56, 0.0 }
 0x31b   : > { %v2415_v63 = vmul.f32 %v6381_v48, %v2376_v4 }
 0x31c   : > { %v2414_v34 = vmul.f32 %v6381_v48, %v2375_v26 }
 0x31d   : > { %v2454_v10 = vadd.f32 %v6388_v36, %v2415_v63 }
 0x31e   : > { %v2453_v3 = vadd.f32 %v6388_v36, %v2414_v34  ;;  %v6424_v23 = vld [vmem:[#allocation3 + $0x39] sm:$0xff] }
 0x31f   : > { %2486 = vst.msk [vmem:[#allocation3 + $0x51] sm:$0xff] %vm252_vm0, %v2454_v10  ;;  %2651 = vrot.lane.b32.xlu1 %v6424_v23, %s4986_s28  ;;  %v6429_v14 = vld [vmem:[#allocation3 + $0x31] sm:$0xff] }
 0x320   : > { %v6431_v24 = vld [vmem:[#allocation3 + $0x38] sm:$0xff]  ;;  %v6433_v19 = vld [vmem:[#allocation3 + $0x30] sm:$0xff]  ;;  %2485 = vst.msk [vmem:[#allocation3 + $0x49] sm:$0xff] %vm252_vm0, %v2453_v3  ;;  %2649 = vrot.lane.b32.xlu0 %v6429_v14, %s4986_s28  ;;  %v4825_v20 = vpop.f32.mrb[6].mxu0 }
 0x321   : > { %2550 = vst.msk [vmem:[#allocation4 + $0x28] sm:$0xff] %vm252_vm0, %v6431_v24  ;;  %2549 = vst.msk [vmem:[#allocation4 + $0x20] sm:$0xff] %vm252_vm0, %v6433_v19  ;;  %v2378_v15 = vmax.f32 %v4825_v20, 0.0  ;;  %v2242_v47 = vpop.f32.mrb[7].mxu0 }
 0x322   : > { %v2377_v16 = vmax.f32 %v2242_v47, 0.0 }
 0x323   : > { %v2417_v1 = vmul.f32 %v6381_v48, %v2378_v15 }
 0x324   : > { %v2416_v49 = vmul.f32 %v6381_v48, %v2377_v16 }
 0x325   : > { %v2456_v12 = vadd.f32 %v6388_v36, %v2417_v1 }
 0x326   : > { %v2455_v5 = vadd.f32 %v6388_v36, %v2416_v49  ;;  %v6446_v25 = vld [vmem:[#allocation3 + $0x51] sm:$0xff] }
 0x327   : > { %2488 = vst.msk [vmem:[#allocation3 + $0x69] sm:$0xff] %vm252_vm0, %v2456_v12  ;;  %2655 = vrot.lane.b32.xlu1 %v6446_v25, %s4986_s28  ;;  %v6451_v6 = vld [vmem:[#allocation3 + $0x49] sm:$0xff] }
 0x328   : > { %v6453_v27 = vld [vmem:[#allocation3 + $0x50] sm:$0xff]  ;;  %v6455_v2 = vld [vmem:[#allocation3 + $0x48] sm:$0xff]  ;;  %2487 = vst.msk [vmem:[#allocation3 + $0x61] sm:$0xff] %vm252_vm0, %v2455_v5  ;;  %2653 = vrot.lane.b32.xlu0 %v6451_v6, %s4986_s28  ;;  %v4828_v30 = vpop.f32.mrb[8].mxu0 }
 0x329   : > { %2552 = vst.msk [vmem:[#allocation4 + $0x38] sm:$0xff] %vm252_vm0, %v6453_v27  ;;  %2551 = vst.msk [vmem:[#allocation4 + $0x30] sm:$0xff] %vm252_vm0, %v6455_v2  ;;  %v2380_v9 = vmax.f32 %v4828_v30, 0.0  ;;  %v2252_v50 = vpop.f32.mrb[9].mxu0 }
 0x32a   : > { %v2379_v31 = vmax.f32 %v2252_v50, 0.0 }
 0x32b   : > { %v2419_v54 = vmul.f32 %v6381_v48, %v2380_v9 }
 0x32c   : > { %v2418_v52 = vmul.f32 %v6381_v48, %v2379_v31 }
 0x32d   : > { %v2458_v57 = vadd.f32 %v6388_v36, %v2419_v54 }
 0x32e   : > { %v2457_v55 = vadd.f32 %v6388_v36, %v2418_v52  ;;  %v6468_v59 = vld [vmem:[#allocation3 + $0x69] sm:$0xff] }
 0x32f   : > { %2490 = vst.msk [vmem:[#allocation3 + $0x81] sm:$0xff] %vm252_vm0, %v2458_v57  ;;  %2659 = vrot.lane.b32.xlu1 %v6468_v59, %s4986_s28  ;;  %v6473_v58 = vld [vmem:[#allocation3 + $0x61] sm:$0xff] }
 0x330   : > { %v6475_v61 = vld [vmem:[#allocation3 + $0x68] sm:$0xff]  ;;  %2489 = vst.msk [vmem:[#allocation3 + $0x79] sm:$0xff] %vm252_vm0, %v2457_v55  ;;  %2657 = vrot.lane.b32.xlu0 %v6473_v58, %s4986_s28  ;;  %v4831_v60 = vpop.f32.mrb[10].mxu0  ;;  %v6482_v0 = vld [vmem:[#allocation3 + $0x60] sm:$0xff] }
 0x331   : > { %2554 = vst.msk [vmem:[#allocation4 + $0x48] sm:$0xff] %vm252_vm0, %v6475_v61  ;;  %v2382_v62 = vmax.f32 %v4831_v60, 0.0  ;;  %v2262_v8 = vpop.f32.mrb[11].mxu0  ;;  %2553 = vst.msk [vmem:[#allocation4 + $0x40] sm:$0xff] %vm252_vm0, %v6482_v0 }
 0x332   : > { %v2381_v7 = vmax.f32 %v2262_v8, 0.0 }
 0x333   : > { %v2421_v45 = vmul.f32 %v6381_v48, %v2382_v62 }
 0x334   : > { %v2420_v38 = vmul.f32 %v6381_v48, %v2381_v7 }
 0x335   : > { %v2460_v37 = vadd.f32 %v6388_v36, %v2421_v45 }
 0x336   : > { %v2459_v35 = vadd.f32 %v6388_v36, %v2420_v38  ;;  %v6490_v32 = vld [vmem:[#allocation3 + $0x81] sm:$0xff] }
 0x337   : > { %2492 = vst.msk [vmem:[#allocation3 + $0x99] sm:$0xff] %vm252_vm0, %v2460_v37  ;;  %2663 = vrot.lane.b32.xlu1 %v6490_v32, %s4986_s28  ;;  %v6495_v39 = vld [vmem:[#allocation3 + $0x79] sm:$0xff] }
 0x338   : > { %v6497_v28 = vld [vmem:[#allocation3 + $0x80] sm:$0xff]  ;;  %2491 = vst.msk [vmem:[#allocation3 + $0x91] sm:$0xff] %vm252_vm0, %v2459_v35  ;;  %2661 = vrot.lane.b32.xlu0 %v6495_v39, %s4986_s28  ;;  %v4834_v33 = vpop.f32.mrb[12].mxu0  ;;  %v6504_v40 = vld [vmem:[#allocation3 + $0x78] sm:$0xff] }
 0x339   : > { %2556 = vst.msk [vmem:[#allocation4 + $0x58] sm:$0xff] %vm252_vm0, %v6497_v28  ;;  %v2384_v41 = vmax.f32 %v4834_v33, 0.0  ;;  %v2272_v21 = vpop.f32.mrb[13].mxu0  ;;  %2555 = vst.msk [vmem:[#allocation4 + $0x50] sm:$0xff] %vm252_vm0, %v6504_v40 }
 0x33a   : > { %v2383_v29 = vmax.f32 %v2272_v21, 0.0 }
 0x33b   : > { %v2423_v42 = vmul.f32 %v6381_v48, %v2384_v41 }
 0x33c   : > { %v2422_v43 = vmul.f32 %v6381_v48, %v2383_v29 }
 0x33d   : > { %v2462_v17 = vadd.f32 %v6388_v36, %v2423_v42 }
 0x33e   : > { %v2461_v44 = vadd.f32 %v6388_v36, %v2422_v43  ;;  %v2590_v22 = vld [vmem:[#allocation3 + $0x99] sm:$0xff] }
 0x33f   : > { %2494 = vst.msk [vmem:[#allocation3 + $0xb1] sm:$0xff] %vm252_vm0, %v2462_v17  ;;  %2667 = vrot.lane.b32.xlu1 %v2590_v22, %s4986_s28  ;;  %v2589_v46 = vld [vmem:[#allocation3 + $0x91] sm:$0xff] }
 0x340   : > { %v6514_v18 = vld [vmem:[#allocation3 + $0x98] sm:$0xff]  ;;  %2493 = vst.msk [vmem:[#allocation3 + $0xa9] sm:$0xff] %vm252_vm0, %v2461_v44  ;;  %2665 = vrot.lane.b32.xlu0 %v2589_v46, %s4986_s28  ;;  %v4837_v4 = vpop.f32.mrb[14].mxu0  ;;  %v6520_v56 = vld [vmem:[#allocation3 + $0x90] sm:$0xff] }
 0x341   : > { %2558 = vst.msk [vmem:[#allocation4 + $0x68] sm:$0xff] %vm252_vm0, %v6514_v18  ;;  %v2386_v26 = vmax.f32 %v4837_v4, 0.0  ;;  %v2282_v63 = vpop.f32.mrb[15].mxu0  ;;  %2557 = vst.msk [vmem:[#allocation4 + $0x60] sm:$0xff] %vm252_vm0, %v6520_v56 }
 0x342   : > { %v2385_v34 = vmax.f32 %v2282_v63, 0.0 }
 0x343   : > { %v2425_v10 = vmul.f32 %v6381_v48, %v2386_v26 }
 0x344   : > { %v2424_v3 = vmul.f32 %v6381_v48, %v2385_v34 }
 0x345   : > { %v2464_v20 = vadd.f32 %v6388_v36, %v2425_v10 }
 0x346   : > { %v2463_v15 = vadd.f32 %v6388_v36, %v2424_v3  ;;  %v2592_v47 = vld [vmem:[#allocation3 + $0xb1] sm:$0xff] }
 0x347   : > { %2496 = vst.msk [vmem:[#allocation3 + $0xc9] sm:$0xff] %vm252_vm0, %v2464_v20  ;;  %2671 = vrot.lane.b32.xlu1 %v2592_v47, %s4986_s28  ;;  %v2591_v16 = vld [vmem:[#allocation3 + $0xa9] sm:$0xff] }
 0x348   : > { %v6530_v1 = vld [vmem:[#allocation3 + $0xb0] sm:$0xff]  ;;  %2495 = vst.msk [vmem:[#allocation3 + $0xc1] sm:$0xff] %vm252_vm0, %v2463_v15  ;;  %2669 = vrot.lane.b32.xlu0 %v2591_v16, %s4986_s28  ;;  %v4840_v49 = vpop.f32.mrb[16].mxu0  ;;  %v6536_v12 = vld [vmem:[#allocation3 + $0xa8] sm:$0xff] }
 0x349   : > { %2560 = vst.msk [vmem:[#allocation4 + $0x78] sm:$0xff] %vm252_vm0, %v6530_v1  ;;  %v2388_v5 = vmax.f32 %v4840_v49, 0.0  ;;  %v2292_v30 = vpop.f32.mrb[17].mxu0  ;;  %2559 = vst.msk [vmem:[#allocation4 + $0x70] sm:$0xff] %vm252_vm0, %v6536_v12 }
 0x34a   : > { %v2387_v9 = vmax.f32 %v2292_v30, 0.0 }
 0x34b   : > { %v2427_v50 = vmul.f32 %v6381_v48, %v2388_v5 }
 0x34c   : > { %v2426_v31 = vmul.f32 %v6381_v48, %v2387_v9 }
 0x34d   : > { %v2466_v54 = vadd.f32 %v6388_v36, %v2427_v50 }
 0x34e   : > { %v2465_v52 = vadd.f32 %v6388_v36, %v2426_v31  ;;  %v2594_v57 = vld [vmem:[#allocation3 + $0xc9] sm:$0xff] }
 0x34f   : > { %2498 = vst.msk [vmem:[#allocation3 + $0xe1] sm:$0xff] %vm252_vm0, %v2466_v54  ;;  %2675 = vrot.lane.b32.xlu1 %v2594_v57, %s4986_s28  ;;  %v2593_v55 = vld [vmem:[#allocation3 + $0xc1] sm:$0xff] }
 0x350   : > { %v6546_v60 = vld [vmem:[#allocation3 + $0xc8] sm:$0xff]  ;;  %2497 = vst.msk [vmem:[#allocation3 + $0xd9] sm:$0xff] %vm252_vm0, %v2465_v52  ;;  %2673 = vrot.lane.b32.xlu0 %v2593_v55, %s4986_s28  ;;  %v4843_v62 = vpop.f32.mrb[18].mxu0  ;;  %v6552_v8 = vld [vmem:[#allocation3 + $0xc0] sm:$0xff] }
 0x351   : > { %2562 = vst.msk [vmem:[#allocation4 + $0x88] sm:$0xff] %vm252_vm0, %v6546_v60  ;;  %v2390_v7 = vmax.f32 %v4843_v62, 0.0  ;;  %v2302_v45 = vpop.f32.mrb[19].mxu0  ;;  %2561 = vst.msk [vmem:[#allocation4 + $0x80] sm:$0xff] %vm252_vm0, %v6552_v8 }
 0x352   : > { %v2389_v38 = vmax.f32 %v2302_v45, 0.0 }
 0x353   : > { %v2429_v37 = vmul.f32 %v6381_v48, %v2390_v7 }
 0x354   : > { %v2428_v35 = vmul.f32 %v6381_v48, %v2389_v38 }
 0x355   : > { %v2468_v33 = vadd.f32 %v6388_v36, %v2429_v37 }
 0x356   : > { %v2467_v41 = vadd.f32 %v6388_v36, %v2428_v35  ;;  %v2596_v21 = vld [vmem:[#allocation3 + $0xe1] sm:$0xff] }
 0x357   : > { %2500 = vst.msk [vmem:[#allocation3 + $0xf9] sm:$0xff] %vm252_vm0, %v2468_v33  ;;  %2679 = vrot.lane.b32.xlu1 %v2596_v21, %s4986_s28  ;;  %v2595_v29 = vld [vmem:[#allocation3 + $0xd9] sm:$0xff] }
 0x358   : > { %v6562_v42 = vld [vmem:[#allocation3 + $0xe0] sm:$0xff]  ;;  %2499 = vst.msk [vmem:[#allocation3 + $0xf1] sm:$0xff] %vm252_vm0, %v2467_v41  ;;  %2677 = vrot.lane.b32.xlu0 %v2595_v29, %s4986_s28  ;;  %v4846_v43 = vpop.f32.mrb[20].mxu0  ;;  %v6568_v17 = vld [vmem:[#allocation3 + $0xd8] sm:$0xff] }
 0x359   : > { %2564 = vst.msk [vmem:[#allocation4 + $0x98] sm:$0xff] %vm252_vm0, %v6562_v42  ;;  %v2392_v44 = vmax.f32 %v4846_v43, 0.0  ;;  %v2312_v22 = vpop.f32.mrb[21].mxu0  ;;  %2563 = vst.msk [vmem:[#allocation4 + $0x90] sm:$0xff] %vm252_vm0, %v6568_v17 }
 0x35a   : > { %v2391_v46 = vmax.f32 %v2312_v22, 0.0 }
 0x35b   : > { %v2431_v4 = vmul.f32 %v6381_v48, %v2392_v44 }
 0x35c   : > { %v2430_v26 = vmul.f32 %v6381_v48, %v2391_v46 }
 0x35d   : > { %v2470_v63 = vadd.f32 %v6388_v36, %v2431_v4 }
 0x35e   : > { %v2469_v34 = vadd.f32 %v6388_v36, %v2430_v26  ;;  %v2598_v10 = vld [vmem:[#allocation3 + $0xf9] sm:$0xff] }
 0x35f   : > { %2502 = vst.msk [vmem:[#allocation3 + $0x111] sm:$0xff] %vm252_vm0, %v2470_v63  ;;  %2683 = vrot.lane.b32.xlu1 %v2598_v10, %s4986_s28  ;;  %v2597_v3 = vld [vmem:[#allocation3 + $0xf1] sm:$0xff] }
 0x360   : > { %v6578_v20 = vld [vmem:[#allocation3 + $0xf8] sm:$0xff]  ;;  %2501 = vst.msk [vmem:[#allocation3 + $0x109] sm:$0xff] %vm252_vm0, %v2469_v34  ;;  %2681 = vrot.lane.b32.xlu0 %v2597_v3, %s4986_s28  ;;  %v4849_v15 = vpop.f32.mrb[22].mxu0  ;;  %v6584_v47 = vld [vmem:[#allocation3 + $0xf0] sm:$0xff] }
 0x361   : > { %2566 = vst.msk [vmem:[#allocation4 + $0xa8] sm:$0xff] %vm252_vm0, %v6578_v20  ;;  %v2394_v16 = vmax.f32 %v4849_v15, 0.0  ;;  %v2322_v49 = vpop.f32.mrb[23].mxu0  ;;  %2565 = vst.msk [vmem:[#allocation4 + $0xa0] sm:$0xff] %vm252_vm0, %v6584_v47 }
 0x362   : > { %v2393_v5 = vmax.f32 %v2322_v49, 0.0 }
 0x363   : > { %v2433_v30 = vmul.f32 %v6381_v48, %v2394_v16 }
 0x364   : > { %v2432_v9 = vmul.f32 %v6381_v48, %v2393_v5 }
 0x365   : > { %v2472_v50 = vadd.f32 %v6388_v36, %v2433_v30 }
 0x366   : > { %v2471_v31 = vadd.f32 %v6388_v36, %v2432_v9  ;;  %v2600_v54 = vld [vmem:[#allocation3 + $0x111] sm:$0xff] }
 0x367   : > { %2504 = vst.msk [vmem:[#allocation3 + $0x129] sm:$0xff] %vm252_vm0, %v2472_v50  ;;  %2687 = vrot.lane.b32.xlu1 %v2600_v54, %s4986_s28  ;;  %v2599_v52 = vld [vmem:[#allocation3 + $0x109] sm:$0xff] }
 0x368   : > { %v6594_v57 = vld [vmem:[#allocation3 + $0x110] sm:$0xff]  ;;  %2503 = vst.msk [vmem:[#allocation3 + $0x121] sm:$0xff] %vm252_vm0, %v2471_v31  ;;  %2685 = vrot.lane.b32.xlu0 %v2599_v52, %s4986_s28  ;;  %v4852_v55 = vpop.f32.mrb[24].mxu0  ;;  %v6600_v62 = vld [vmem:[#allocation3 + $0x108] sm:$0xff] }
 0x369   : > { %2568 = vst.msk [vmem:[#allocation4 + $0xb8] sm:$0xff] %vm252_vm0, %v6594_v57  ;;  %v2396_v7 = vmax.f32 %v4852_v55, 0.0  ;;  %v2332_v45 = vpop.f32.mrb[25].mxu0  ;;  %2567 = vst.msk [vmem:[#allocation4 + $0xb0] sm:$0xff] %vm252_vm0, %v6600_v62 }
 0x36a   : > { %v2395_v38 = vmax.f32 %v2332_v45, 0.0 }
 0x36b   : > { %v2435_v37 = vmul.f32 %v6381_v48, %v2396_v7 }
 0x36c   : > { %v2434_v35 = vmul.f32 %v6381_v48, %v2395_v38 }
 0x36d   : > { %v2474_v33 = vadd.f32 %v6388_v36, %v2435_v37 }
 0x36e   : > { %v2473_v41 = vadd.f32 %v6388_v36, %v2434_v35  ;;  %v2602_v21 = vld [vmem:[#allocation3 + $0x129] sm:$0xff] }
 0x36f   : > { %2506 = vst.msk [vmem:[#allocation3 + $0x141] sm:$0xff] %vm252_vm0, %v2474_v33  ;;  %2691 = vrot.lane.b32.xlu1 %v2602_v21, %s4986_s28  ;;  %v2601_v29 = vld [vmem:[#allocation3 + $0x121] sm:$0xff] }
 0x370   : > { %v2538_v43 = vld [vmem:[#allocation3 + $0x128] sm:$0xff]  ;;  %2505 = vst.msk [vmem:[#allocation3 + $0x139] sm:$0xff] %vm252_vm0, %v2473_v41  ;;  %2689 = vrot.lane.b32.xlu0 %v2601_v29, %s4986_s28  ;;  %v4855_v44 = vpop.f32.mrb[26].mxu0  ;;  %v6613_v22 = vld [vmem:[#allocation3 + $0x120] sm:$0xff] }
 0x371   : > { %2570 = vst.msk [vmem:[#allocation4 + $0xc8] sm:$0xff] %vm252_vm0, %v2538_v43  ;;  %v2398_v46 = vmax.f32 %v4855_v44, 0.0  ;;  %v2342_v4 = vpop.f32.mrb[27].mxu0  ;;  %2569 = vst.msk [vmem:[#allocation4 + $0xc0] sm:$0xff] %vm252_vm0, %v6613_v22  ;;  %v2770_v44 = vld [vmem:[#allocation3 + $0xa] sm:$0xff] }
 0x372   : > { %v2397_v26 = vmax.f32 %v2342_v4, 0.0  ;;  %v2769_v4 = vld [vmem:[#allocation3 + $0x2] sm:$0xff] }
 0x373   : > { %v2437_v63 = vmul.f32 %v6381_v48, %v2398_v46 }
 0x374   : > { %v2436_v34 = vmul.f32 %v6381_v48, %v2397_v26  ;;  %v6645_v26 = vld [vmem:[#allocation3 + $0x22] sm:$0xff] }
 0x375   : > { %v2476_v10 = vadd.f32 %v6388_v36, %v2437_v63 }
 0x376   : > { %v2475_v3 = vadd.f32 %v6388_v36, %v2436_v34  ;;  %v2604_v15 = vld [vmem:[#allocation3 + $0x141] sm:$0xff] }
 0x377   : > { %2508 = vst.msk [vmem:[#allocation3 + $0x159] sm:$0xff] %vm252_vm0, %v2476_v10  ;;  %2695 = vrot.lane.b32.xlu1 %v2604_v15, %s4986_s28  ;;  %v2603_v16 = vld [vmem:[#allocation3 + $0x139] sm:$0xff] }
 0x378   : > { %v2540_v49 = vld [vmem:[#allocation3 + $0x140] sm:$0xff]  ;;  %2507 = vst.msk [vmem:[#allocation3 + $0x151] sm:$0xff] %vm252_vm0, %v2475_v3  ;;  %2693 = vrot.lane.b32.xlu0 %v2603_v16, %s4986_s28  ;;  %v2539_v5 = vld [vmem:[#allocation3 + $0x138] sm:$0xff] }
 0x379   : > { %2572 = vst.msk [vmem:[#allocation4 + $0xd8] sm:$0xff] %vm252_vm0, %v2540_v49  ;;  %2571 = vst.msk [vmem:[#allocation4 + $0xd0] sm:$0xff] %vm252_vm0, %v2539_v5  ;;  %v6650_v10 = vld [vmem:[#allocation3 + $0x1a] sm:$0xff]  ;;  %v6659_v15 = vld [vmem:[#allocation3 + $0x32] sm:$0xff] }
 0x37a   : > { %v6655_v3 = vld [vmem:[#allocation3 + $0x3a] sm:$0xff]  ;;  %v6663_v16 = vld [vmem:[#allocation3 + $0x52] sm:$0xff] }
 0x37b   : > { %v4858_v30 = vpop.f32.mrb[28].mxu0 }
 0x37c   : > { %v2400_v9 = vmax.f32 %v4858_v30, 0.0  ;;  %v2352_v50 = vpop.f32.mrb[29].mxu0  ;;  %v6668_v30 = vld [vmem:[#allocation3 + $0x4a] sm:$0xff] }
 0x37d   : > { %v2399_v31 = vmax.f32 %v2352_v50, 0.0  ;;  %v6677_v50 = vld [vmem:[#allocation3 + $0x62] sm:$0xff] }
 0x37e   : > { %v2439_v54 = vmul.f32 %v6381_v48, %v2400_v9  ;;  %v2606_v52 = vld [vmem:[#allocation3 + $0x159] sm:$0xff]  ;;  %v6673_v9 = vld [vmem:[#allocation3 + $0x6a] sm:$0xff] }
 0x37f   : > { %v2438_v55 = vmul.f32 %v6381_v48, %v2399_v31  ;;  %2699 = vrot.lane.b32.xlu1 %v2606_v52, %s4986_s28  ;;  %v2605_v7 = vld [vmem:[#allocation3 + $0x151] sm:$0xff]  ;;  %v6681_v31 = vld [vmem:[#allocation3 + $0x82] sm:$0xff] }
 0x380   : > { %v2542_v45 = vld [vmem:[#allocation3 + $0x158] sm:$0xff]  ;;  %v2478_v38 = vadd.f32 %v6388_v36, %v2439_v54  ;;  %2697 = vrot.lane.b32.xlu0 %v2605_v7, %s4986_s28  ;;  %v2541_v37 = vld [vmem:[#allocation3 + $0x150] sm:$0xff] }
 0x381   : > { %2574 = vst.msk [vmem:[#allocation4 + $0xe8] sm:$0xff] %vm252_vm0, %v2542_v45  ;;  %v2477_v35 = vadd.f32 %v6388_v36, %v2438_v55  ;;  %2573 = vst.msk [vmem:[#allocation4 + $0xe0] sm:$0xff] %vm252_vm0, %v2541_v37  ;;  %v6686_v55 = vld [vmem:[#allocation3 + $0x7a] sm:$0xff]  ;;  %v6695_v45 = vld [vmem:[#allocation3 + $0x92] sm:$0xff] }
 0x382   : > { %2510 = vst.msk [vmem:[#allocation3 + $0x171] sm:$0xff] %vm252_vm0, %v2478_v38  ;;  %v6691_v7 = vld [vmem:[#allocation3 + $0x9a] sm:$0xff]  ;;  %v6699_v38 = vld [vmem:[#allocation3 + $0xb2] sm:$0xff] }
 0x383   : > { %2509 = vst.msk [vmem:[#allocation3 + $0x169] sm:$0xff] %vm252_vm0, %v2477_v35 }
 0x389   : > { %v2608_v33 = vld [vmem:[#allocation3 + $0x171] sm:$0xff]  ;;  %v2648_v41 = vpop.permute.xlu1 %2647 }
 0x38a   : > { %2703 = vrot.lane.b32.xlu1 %v2608_v33, %s4986_s28  ;;  %v2646_v21 = vpop.permute.xlu0 %2645  ;;  %2740 = vst.msk [vmem:[#allocation4 + $0x18] sm:$0xff] %vm623_vm3, %v2648_v41  ;;  %v2607_v29 = vld [vmem:[#allocation3 + $0x169] sm:$0xff] }
 0x38b   : > { %v2544_v43 = vld [vmem:[#allocation3 + $0x170] sm:$0xff]  ;;  %2739 = vst.msk [vmem:[#allocation4 + $0x10] sm:$0xff] %vm623_vm3, %v2646_v21  ;;  %2701 = vrot.lane.b32.xlu0 %v2607_v29, %s4986_s28  ;;  %v2543_v46 = vld [vmem:[#allocation3 + $0x168] sm:$0xff] }
 0x38c   : > { %2576 = vst.msk [vmem:[#allocation4 + $0xf8] sm:$0xff] %vm252_vm0, %v2544_v43  ;;  %2575 = vst.msk [vmem:[#allocation4 + $0xf0] sm:$0xff] %vm252_vm0, %v2543_v46  ;;  %v6704_v33 = vld [vmem:[#allocation3 + $0xaa] sm:$0xff]  ;;  %v6713_v21 = vld [vmem:[#allocation3 + $0xc2] sm:$0xff] }
 0x38d   : > { %v6709_v41 = vld [vmem:[#allocation3 + $0xca] sm:$0xff]  ;;  %v6717_v29 = vld [vmem:[#allocation3 + $0xe2] sm:$0xff]  ;;  %v6722_v46 = vld [vmem:[#allocation3 + $0xda] sm:$0xff] }
 0x38e   : > { %2835 = vrot.lane.b32.xlu1 %v2770_v44, %s4987_s29 }
 0x38f   : > { %2833 = vrot.lane.b32.xlu0 %v2769_v4, %s4987_s29  ;;  %v2790_v4 = vld [vmem:[#allocation3 + $0xfa] sm:$0xff] }
 0x391   : > { %v2652_v63 = vpop.permute.xlu1 %2651 }
 0x392   : > { %2839 = vrot.lane.b32.xlu1 %v6645_v26, %s4987_s29  ;;  %2742 = vst.msk [vmem:[#allocation4 + $0x28] sm:$0xff] %vm623_vm3, %v2652_v63  ;;  %v2650_v34 = vpop.permute.xlu0 %2649  ;;  %v2789_v63 = vld [vmem:[#allocation3 + $0xf2] sm:$0xff] }
 0x393   : > { %2741 = vst.msk [vmem:[#allocation4 + $0x20] sm:$0xff] %vm623_vm3, %v2650_v34  ;;  %2837 = vrot.lane.b32.xlu0 %v6650_v10, %s4987_s29  ;;  %v2792_v34 = vld [vmem:[#allocation3 + $0x112] sm:$0xff] }
 0x396   : > { %2843 = vrot.lane.b32.xlu1 %v6655_v3, %s4987_s29 }
 0x397   : > { %2841 = vrot.lane.b32.xlu0 %v6659_v15, %s4987_s29 }
 0x399   : > { %v2656_v49 = vpop.permute.xlu1 %2655 }
 0x39a   : > { %2847 = vrot.lane.b32.xlu1 %v6663_v16, %s4987_s29  ;;  %2744 = vst.msk [vmem:[#allocation4 + $0x38] sm:$0xff] %vm623_vm3, %v2656_v49  ;;  %v2654_v5 = vpop.permute.xlu0 %2653 }
 0x39b   : > { %2743 = vst.msk [vmem:[#allocation4 + $0x30] sm:$0xff] %vm623_vm3, %v2654_v5  ;;  %2845 = vrot.lane.b32.xlu0 %v6668_v30, %s4987_s29 }
 0x39e   : > { %2851 = vrot.lane.b32.xlu1 %v6673_v9, %s4987_s29 }
 0x39f   : > { %2849 = vrot.lane.b32.xlu0 %v6677_v50, %s4987_s29 }
 0x3a1   : > { %v2660_v54 = vpop.permute.xlu1 %2659 }
 0x3a2   : > { %2855 = vrot.lane.b32.xlu1 %v6681_v31, %s4987_s29  ;;  %2746 = vst.msk [vmem:[#allocation4 + $0x48] sm:$0xff] %vm623_vm3, %v2660_v54  ;;  %v2658_v52 = vpop.permute.xlu0 %2657  ;;  %v2791_v54 = vld [vmem:[#allocation3 + $0x10a] sm:$0xff] }
 0x3a3   : > { %2745 = vst.msk [vmem:[#allocation4 + $0x40] sm:$0xff] %vm623_vm3, %v2658_v52  ;;  %2853 = vrot.lane.b32.xlu0 %v6686_v55, %s4987_s29  ;;  %v2794_v52 = vld [vmem:[#allocation3 + $0x12a] sm:$0xff] }
 0x3a6   : > { %2859 = vrot.lane.b32.xlu1 %v6691_v7, %s4987_s29 }
 0x3a7   : > { %2857 = vrot.lane.b32.xlu0 %v6695_v45, %s4987_s29 }
 0x3a9   : > { %v2664_v37 = vpop.permute.xlu1 %2663 }
 0x3aa   : > { %2863 = vrot.lane.b32.xlu1 %v6699_v38, %s4987_s29  ;;  %2748 = vst.msk [vmem:[#allocation4 + $0x58] sm:$0xff] %vm623_vm3, %v2664_v37  ;;  %v2662_v35 = vpop.permute.xlu0 %2661  ;;  %v2793_v37 = vld [vmem:[#allocation3 + $0x122] sm:$0xff] }
 0x3ab   : > { %2747 = vst.msk [vmem:[#allocation4 + $0x50] sm:$0xff] %vm623_vm3, %v2662_v35  ;;  %2861 = vrot.lane.b32.xlu0 %v6704_v33, %s4987_s29  ;;  %v2796_v35 = vld [vmem:[#allocation3 + $0x142] sm:$0xff] }
 0x3ae   : > { %2867 = vrot.lane.b32.xlu1 %v6709_v41, %s4987_s29 }
 0x3af   : > { %2865 = vrot.lane.b32.xlu0 %v6713_v21, %s4987_s29 }
 0x3b1   : > { %v2668_v43 = vpop.permute.xlu1 %2667 }
 0x3b2   : > { %2871 = vrot.lane.b32.xlu1 %v6717_v29, %s4987_s29  ;;  %2750 = vst.msk [vmem:[#allocation4 + $0x68] sm:$0xff] %vm623_vm3, %v2668_v43  ;;  %v2666_v44 = vpop.permute.xlu0 %2665 }
 0x3b3   : > { %2749 = vst.msk [vmem:[#allocation4 + $0x60] sm:$0xff] %vm623_vm3, %v2666_v44  ;;  %2869 = vrot.lane.b32.xlu0 %v6722_v46, %s4987_s29 }
 0x3b6   : > { %2875 = vrot.lane.b32.xlu1 %v2790_v4, %s4987_s29  ;;  %v2795_v4 = vld [vmem:[#allocation3 + $0x13a] sm:$0xff] }
 0x3b7   : > { %2873 = vrot.lane.b32.xlu0 %v2789_v63, %s4987_s29  ;;  %v2798_v63 = vld [vmem:[#allocation3 + $0x15a] sm:$0xff] }
 0x3b9   : > { %v2672_v49 = vpop.permute.xlu1 %2671 }
 0x3ba   : > { %2879 = vrot.lane.b32.xlu1 %v2792_v34, %s4987_s29  ;;  %2752 = vst.msk [vmem:[#allocation4 + $0x78] sm:$0xff] %vm623_vm3, %v2672_v49  ;;  %v2670_v5 = vpop.permute.xlu0 %2669  ;;  %v2797_v34 = vld [vmem:[#allocation3 + $0x152] sm:$0xff] }
 0x3bb   : > { %2751 = vst.msk [vmem:[#allocation4 + $0x70] sm:$0xff] %vm623_vm3, %v2670_v5  ;;  %2877 = vrot.lane.b32.xlu0 %v2791_v54, %s4987_s29  ;;  %v2800_v49 = vld [vmem:[#allocation3 + $0x172] sm:$0xff] }
 0x3be   : > { %2883 = vrot.lane.b32.xlu1 %v2794_v52, %s4987_s29  ;;  %v2799_v52 = vld [vmem:[#allocation3 + $0x16a] sm:$0xff] }
 0x3bf   : > { %2881 = vrot.lane.b32.xlu0 %v2793_v37, %s4987_s29 }
 0x3c1   : > { %v2676_v43 = vpop.permute.xlu1 %2675 }
 0x3c2   : > { %2887 = vrot.lane.b32.xlu1 %v2796_v35, %s4987_s29  ;;  %2754 = vst.msk [vmem:[#allocation4 + $0x88] sm:$0xff] %vm623_vm3, %v2676_v43  ;;  %v2674_v44 = vpop.permute.xlu0 %2673 }
 0x3c3   : > { %2753 = vst.msk [vmem:[#allocation4 + $0x80] sm:$0xff] %vm623_vm3, %v2674_v44  ;;  %2885 = vrot.lane.b32.xlu0 %v2795_v4, %s4987_s29 }
 0x3c6   : > { %2891 = vrot.lane.b32.xlu1 %v2798_v63, %s4987_s29 }
 0x3c7   : > { %2889 = vrot.lane.b32.xlu0 %v2797_v34, %s4987_s29  ;;  %v4146_v34 = vld [vmem:[%s7480_s4] sm:$0xff] }
 0x3c9   : > { %v2680_v5 = vpop.permute.xlu1 %2679 }
 0x3ca   : > { %2895 = vrot.lane.b32.xlu1 %v2800_v49, %s4987_s29  ;;  %2756 = vst.msk [vmem:[#allocation4 + $0x98] sm:$0xff] %vm623_vm3, %v2680_v5  ;;  %v2678_v54 = vpop.permute.xlu0 %2677  ;;  %v4147_v49 = vld [vmem:[%s7480_s4 + $0x8] sm:$0xff] }
 0x3cb   : > { %2755 = vst.msk [vmem:[#allocation4 + $0x90] sm:$0xff] %vm623_vm3, %v2678_v54  ;;  %2893 = vrot.lane.b32.xlu0 %v2799_v52, %s4987_s29  ;;  %v4944_v5 = vpack.c.bf16 %v4147_v49, %v4146_v34  ;;  %v4148_v52 = vld [vmem:[%s7480_s4 + $0x10] sm:$0xff] }
 0x3cd   : > { %4945 = vmatprep.subr.bf16.mxu1 %v4944_v5 }
 0x3ce   : > { %3027 = vrot.lane.b32.xlu1 %v6411_v13, %s4988_s30  ;;  %4947 = vmatpush3.bf16.msra.mxu1 %v4944_v5 }
 0x3cf   : > { %3025 = vrot.lane.b32.xlu0 %v6409_v11, %s4988_s30 }
 0x3d1   : > { %v2684_v37 = vpop.permute.xlu1 %2683 }
 0x3d2   : > { %3031 = vrot.lane.b32.xlu1 %v6431_v24, %s4988_s30  ;;  %2758 = vst.msk [vmem:[#allocation4 + $0xa8] sm:$0xff] %vm623_vm3, %v2684_v37  ;;  %v2682_v35 = vpop.permute.xlu0 %2681  ;;  %v4149_v37 = vld [vmem:[%s7480_s4 + $0x18] sm:$0xff] }
 0x3d3   : > { %2757 = vst.msk [vmem:[#allocation4 + $0xa0] sm:$0xff] %vm623_vm3, %v2682_v35  ;;  %3029 = vrot.lane.b32.xlu0 %v6433_v19, %s4988_s30  ;;  %v4948_v35 = vpack.c.bf16 %v4149_v37, %v4148_v52 }
 0x3d5   : > { %4949 = vmatprep.subr.bf16.mxu1 %v4948_v35 }
 0x3d6   : > { %3035 = vrot.lane.b32.xlu1 %v6453_v27, %s4988_s30  ;;  %4951 = vmatpush3.bf16.msra.mxu1 %v4948_v35 }
 0x3d7   : > { %3033 = vrot.lane.b32.xlu0 %v6455_v2, %s4988_s30 }
 0x3d9   : > { %v2688_v13 = vpop.permute.xlu1 %2687 }
 0x3da   : > { %3039 = vrot.lane.b32.xlu1 %v6475_v61, %s4988_s30  ;;  %2760 = vst.msk [vmem:[#allocation4 + $0xb8] sm:$0xff] %vm623_vm3, %v2688_v13  ;;  %v2686_v11 = vpop.permute.xlu0 %2685  ;;  %v4150_v13 = vld [vmem:[%s7480_s4 + $0x20] sm:$0xff] }
 0x3db   : > { %2759 = vst.msk [vmem:[#allocation4 + $0xb0] sm:$0xff] %vm623_vm3, %v2686_v11  ;;  %3037 = vrot.lane.b32.xlu0 %v6482_v0, %s4988_s30  ;;  %v4151_v11 = vld [vmem:[%s7480_s4 + $0x28] sm:$0xff] }
 0x3de   : > { %3043 = vrot.lane.b32.xlu1 %v6497_v28, %s4988_s30 }
 0x3df   : > { %3041 = vrot.lane.b32.xlu0 %v6504_v40, %s4988_s30 }
 0x3e1   : > { %v2692_v43 = vpop.permute.xlu1 %2691 }
 0x3e2   : > { %3047 = vrot.lane.b32.xlu1 %v6514_v18, %s4988_s30  ;;  %2762 = vst.msk [vmem:[#allocation4 + $0xc8] sm:$0xff] %vm623_vm3, %v2692_v43  ;;  %v2690_v44 = vpop.permute.xlu0 %2689  ;;  %v4153_v43 = vld [vmem:[%s7480_s4 + $0x38] sm:$0xff] }
 0x3e3   : > { %2761 = vst.msk [vmem:[#allocation4 + $0xc0] sm:$0xff] %vm623_vm3, %v2690_v44  ;;  %3045 = vrot.lane.b32.xlu0 %v6520_v56, %s4988_s30 }
 0x3e6   : > { %3051 = vrot.lane.b32.xlu1 %v6530_v1, %s4988_s30 }
 0x3e7   : > { %3049 = vrot.lane.b32.xlu0 %v6536_v12, %s4988_s30 }
 0x3e9   : > { %v2696_v4 = vpop.permute.xlu1 %2695 }
 0x3ea   : > { %3055 = vrot.lane.b32.xlu1 %v6546_v60, %s4988_s30  ;;  %2764 = vst.msk [vmem:[#allocation4 + $0xd8] sm:$0xff] %vm623_vm3, %v2696_v4  ;;  %v2694_v63 = vpop.permute.xlu0 %2693  ;;  %v4154_v4 = vld [vmem:[%s7480_s4 + $0x40] sm:$0xff] }
 0x3eb   : > { %2763 = vst.msk [vmem:[#allocation4 + $0xd0] sm:$0xff] %vm623_vm3, %v2694_v63  ;;  %3053 = vrot.lane.b32.xlu0 %v6552_v8, %s4988_s30 }
 0x3ee   : > { %3217 = vrot.lane.b32.xlu1 %v6407_v53, %s4989_s7 }
 0x3ef   : > { %3057 = vrot.lane.b32.xlu0 %v6568_v17, %s4988_s30 }
 0x3f1   : > { %v2700_v54 = vpop.permute.xlu1 %2699 }
 0x3f2   : > { %3409 = vrot.lane.b32.xlu1 %v6650_v10, %s4990_s8  ;;  %2766 = vst.msk [vmem:[#allocation4 + $0xe8] sm:$0xff] %vm623_vm3, %v2700_v54  ;;  %v2698_v53 = vpop.permute.xlu0 %2697  ;;  %v4952_v10 = vpack.c.bf16 %v4151_v11, %v4150_v13 }
 0x3f3   : > { %2765 = vst.msk [vmem:[#allocation4 + $0xe0] sm:$0xff] %vm623_vm3, %v2698_v53  ;;  %3219 = vrot.lane.b32.xlu0 %v6402_v51, %s4989_s7  ;;  %v4152_v51 = vld [vmem:[%s7480_s4 + $0x30] sm:$0xff] }
 0x3f4   : > { %4953 = vmatprep.subr.bf16.mxu1 %v4952_v10  ;;  %v4956_v44 = vpack.c.bf16 %v4153_v43, %v4152_v51 }
 0x3f5   : > { %4955 = vmatpush3.bf16.msra.mxu1 %v4952_v10 }
 0x3f6   : > { %3602 = vrot.lane.b32.xlu1 %v6433_v19, %s4991_s9  ;;  %4957 = vmatprep.subr.bf16.mxu1 %v4956_v44 }
 0x3f7   : > { %3411 = vrot.lane.b32.xlu0 %v6645_v26, %s4990_s8 }
 0x3f9   : > { %4959 = vmatpush3.bf16.msra.mxu1 %v4956_v44 }
 0x3fa   : > { %3794 = vrot.lane.b32.xlu1 %v6429_v14, %s4992_s11  ;;  %4878 = vmatprep.subr.mxu1 %v4154_v4 }
 0x3fb   : > { %3604 = vrot.lane.b32.xlu0 %v6431_v24, %s4991_s9 }
 0x3fc   : > { %v2704_v19 = vpop.permute.xlu1 %2703 }
 0x3fd   : > { %2768 = vst.msk [vmem:[#allocation4 + $0xf8] sm:$0xff] %vm623_vm3, %v2704_v19  ;;  %v2702_v26 = vpop.permute.xlu0 %2701  ;;  %4879 = vmatpush3.msra.mxu1 %v4154_v4 }
 0x3fe   : > { %2767 = vst.msk [vmem:[#allocation4 + $0xf0] sm:$0xff] %vm623_vm3, %v2702_v26  ;;  %3796 = vrot.lane.b32.xlu1 %v6424_v23, %s4992_s11 }
 0x3ff   : > { %3221 = vrot.lane.b32.xlu0 %v6429_v14, %s4989_s7 }
 0x400   : > { %v2836_v24 = vpop.permute.xlu1 %2835 }
 0x401   : > { %2930 = vst.msk [vmem:[#allocation4 + $0x8] sm:$0xff] %vm816_vm4, %v2836_v24  ;;  %v2834_v63 = vpop.permute.xlu0 %2833 }
 0x402   : > { %2929 = vst.msk [vmem:[#allocation4] sm:$0xff] %vm816_vm4, %v2834_v63  ;;  %3223 = vrot.lane.b32.xlu1 %v6424_v23, %s4989_s7 }
 0x403   : > { %3986 = vrot.lane.b32.xlu0 %v6659_v15, %s4993_s14 }
 0x404   : > { %v2840_v34 = vpop.permute.xlu1 %2839 }
 0x405   : > { %2932 = vst.msk [vmem:[#allocation4 + $0x18] sm:$0xff] %vm816_vm4, %v2840_v34  ;;  %v2838_v49 = vpop.permute.xlu0 %2837  ;;  %v3162_v34 = vld [vmem:[#allocation3 + $0x81] sm:$0xff] }
 0x406   : > { %2931 = vst.msk [vmem:[#allocation4 + $0x10] sm:$0xff] %vm816_vm4, %v2838_v49  ;;  %3988 = vrot.lane.b32.xlu1 %v6655_v3, %s4993_s14 }
 0x407   : > { %3413 = vrot.lane.b32.xlu0 %v6659_v15, %s4990_s8 }
 0x408   : > { %v2844_v14 = vpop.permute.xlu1 %2843 }
 0x409   : > { %2934 = vst.msk [vmem:[#allocation4 + $0x28] sm:$0xff] %vm816_vm4, %v2844_v14  ;;  %v2842_v5 = vpop.permute.xlu0 %2841 }
 0x40a   : > { %2933 = vst.msk [vmem:[#allocation4 + $0x20] sm:$0xff] %vm816_vm4, %v2842_v5  ;;  %3606 = vrot.lane.b32.xlu1 %v6455_v2, %s4991_s9 }
 0x40b   : > { %3415 = vrot.lane.b32.xlu0 %v6655_v3, %s4990_s8 }
 0x40c   : > { %v2848_v23 = vpop.permute.xlu1 %2847 }
 0x40d   : > { %2936 = vst.msk [vmem:[#allocation4 + $0x38] sm:$0xff] %vm816_vm4, %v2848_v23  ;;  %v2846_v54 = vpop.permute.xlu0 %2845  ;;  %v3738_v23 = vld [vmem:[#allocation3 + $0x91] sm:$0xff] }
 0x40e   : > { %2935 = vst.msk [vmem:[#allocation4 + $0x30] sm:$0xff] %vm816_vm4, %v2846_v54  ;;  %3798 = vrot.lane.b32.xlu1 %v6451_v6, %s4992_s11 }
 0x40f   : > { %3608 = vrot.lane.b32.xlu0 %v6453_v27, %s4991_s9 }
 0x410   : > { %v2852_v15 = vpop.permute.xlu1 %2851 }
 0x411   : > { %2938 = vst.msk [vmem:[#allocation4 + $0x48] sm:$0xff] %vm816_vm4, %v2852_v15  ;;  %v2850_v52 = vpop.permute.xlu0 %2849 }
 0x412   : > { %2937 = vst.msk [vmem:[#allocation4 + $0x40] sm:$0xff] %vm816_vm4, %v2850_v52  ;;  %3800 = vrot.lane.b32.xlu1 %v6446_v25, %s4992_s11 }
 0x413   : > { %3225 = vrot.lane.b32.xlu0 %v6451_v6, %s4989_s7  ;;  %v4861_v6 = vpop.f32.mrb[30].mxu0 }
 0x414   : > { %v2856_v2 = vpop.permute.xlu1 %2855  ;;  %v2402_v53 = vmax.f32 %v4861_v6, 0.0  ;;  %v2362_v35 = vpop.f32.mrb[31].mxu0  ;;  %v3740_v6 = vld [vmem:[#allocation3 + $0xa9] sm:$0xff] }
 0x415   : > { %2940 = vst.msk [vmem:[#allocation4 + $0x58] sm:$0xff] %vm816_vm4, %v2856_v2  ;;  %v2854_v3 = vpop.permute.xlu0 %2853 }
 0x416   : > { %2939 = vst.msk [vmem:[#allocation4 + $0x50] sm:$0xff] %vm816_vm4, %v2854_v3  ;;  %3227 = vrot.lane.b32.xlu1 %v6446_v25, %s4989_s7  ;;  %v2401_v25 = vmax.f32 %v2362_v35, 0.0  ;;  %v2441_v10 = vmul.f32 %v6381_v48, %v2402_v53 }
 0x417   : > { %3990 = vrot.lane.b32.xlu0 %v6668_v30, %s4993_s14 }
 0x418   : > { %v2860_v27 = vpop.permute.xlu1 %2859  ;;  %v2440_v51 = vmul.f32 %v6381_v48, %v2401_v25 }
 0x419   : > { %2942 = vst.msk [vmem:[#allocation4 + $0x68] sm:$0xff] %vm816_vm4, %v2860_v27  ;;  %v2858_v37 = vpop.permute.xlu0 %2857 }
 0x41a   : > { %2941 = vst.msk [vmem:[#allocation4 + $0x60] sm:$0xff] %vm816_vm4, %v2858_v37  ;;  %3992 = vrot.lane.b32.xlu1 %v6663_v16, %s4993_s14  ;;  %v2479_v44 = vadd.f32 %v6388_v36, %v2440_v51 }
 0x41b   : > { %3417 = vrot.lane.b32.xlu0 %v6668_v30, %s4990_s8  ;;  %v2480_v30 = vadd.f32 %v6388_v36, %v2441_v10 }
 0x41c   : > { %v2864_v13 = vpop.permute.xlu1 %2863  ;;  %2511 = vst.msk [vmem:[#allocation3 + $0x181] sm:$0xff] %vm252_vm0, %v2479_v44 }
 0x41d   : > { %2944 = vst.msk [vmem:[#allocation4 + $0x78] sm:$0xff] %vm816_vm4, %v2864_v13  ;;  %v2862_v11 = vpop.permute.xlu0 %2861 }
 0x41e   : > { %2943 = vst.msk [vmem:[#allocation4 + $0x70] sm:$0xff] %vm816_vm4, %v2862_v11  ;;  %3610 = vrot.lane.b32.xlu1 %v6482_v0, %s4991_s9 }
 0x41f   : > { %3419 = vrot.lane.b32.xlu0 %v6663_v16, %s4990_s8  ;;  %2512 = vst.msk [vmem:[#allocation3 + $0x189] sm:$0xff] %vm252_vm0, %v2480_v30  ;;  %v3742_v30 = vld [vmem:[#allocation3 + $0xc1] sm:$0xff] }
 0x420   : > { %v2868_v43 = vpop.permute.xlu1 %2867 }
 0x421   : > { %2946 = vst.msk [vmem:[#allocation4 + $0x88] sm:$0xff] %vm816_vm4, %v2868_v43  ;;  %v2866_v19 = vpop.permute.xlu0 %2865 }
 0x422   : > { %2945 = vst.msk [vmem:[#allocation4 + $0x80] sm:$0xff] %vm816_vm4, %v2866_v19  ;;  %3802 = vrot.lane.b32.xlu1 %v6473_v58, %s4992_s11 }
 0x423   : > { %3612 = vrot.lane.b32.xlu0 %v6475_v61, %s4991_s9 }
 0x424   : > { %v2872_v48 = vpop.permute.xlu1 %2871 }
 0x425   : > { %2948 = vst.msk [vmem:[#allocation4 + $0x98] sm:$0xff] %vm816_vm4, %v2872_v48  ;;  %v2870_v0 = vpop.permute.xlu0 %2869 }
 0x426   : > { %2947 = vst.msk [vmem:[#allocation4 + $0x90] sm:$0xff] %vm816_vm4, %v2870_v0  ;;  %3804 = vrot.lane.b32.xlu1 %v6468_v59, %s4992_s11 }
 0x427   : > { %3229 = vrot.lane.b32.xlu0 %v6473_v58, %s4989_s7 }
 0x428   : > { %v2876_v36 = vpop.permute.xlu1 %2875 }
 0x429   : > { %2950 = vst.msk [vmem:[#allocation4 + $0xa8] sm:$0xff] %vm816_vm4, %v2876_v36  ;;  %v2874_v16 = vpop.permute.xlu0 %2873 }
 0x42a   : > { %2949 = vst.msk [vmem:[#allocation4 + $0xa0] sm:$0xff] %vm816_vm4, %v2874_v16  ;;  %3231 = vrot.lane.b32.xlu1 %v6468_v59, %s4989_s7 }
 0x42b   : > { %3994 = vrot.lane.b32.xlu0 %v6677_v50, %s4993_s14 }
 0x42c   : > { %v2880_v61 = vpop.permute.xlu1 %2879 }
 0x42d   : > { %2952 = vst.msk [vmem:[#allocation4 + $0xb8] sm:$0xff] %vm816_vm4, %v2880_v61  ;;  %v2878_v26 = vpop.permute.xlu0 %2877 }
 0x42e   : > { %2951 = vst.msk [vmem:[#allocation4 + $0xb0] sm:$0xff] %vm816_vm4, %v2878_v26  ;;  %3996 = vrot.lane.b32.xlu1 %v6673_v9, %s4993_s14 }
 0x42f   : > { %3421 = vrot.lane.b32.xlu0 %v6677_v50, %s4990_s8 }
 0x430   : > { %v2884_v58 = vpop.permute.xlu1 %2883 }
 0x431   : > { %2954 = vst.msk [vmem:[#allocation4 + $0xc8] sm:$0xff] %vm816_vm4, %v2884_v58  ;;  %v2882_v4 = vpop.permute.xlu0 %2881 }
 0x432   : > { %2953 = vst.msk [vmem:[#allocation4 + $0xc0] sm:$0xff] %vm816_vm4, %v2882_v4  ;;  %3614 = vrot.lane.b32.xlu1 %v6504_v40, %s4991_s9 }
 0x433   : > { %3423 = vrot.lane.b32.xlu0 %v6673_v9, %s4990_s8 }
 0x434   : > { %v2888_v59 = vpop.permute.xlu1 %2887 }
 0x435   : > { %2956 = vst.msk [vmem:[#allocation4 + $0xd8] sm:$0xff] %vm816_vm4, %v2888_v59  ;;  %v2886_v24 = vpop.permute.xlu0 %2885  ;;  %v3745_v59 = vld [vmem:[#allocation3 + $0xe1] sm:$0xff] }
 0x436   : > { %2955 = vst.msk [vmem:[#allocation4 + $0xd0] sm:$0xff] %vm816_vm4, %v2886_v24  ;;  %3806 = vrot.lane.b32.xlu1 %v6495_v39, %s4992_s11 }
 0x437   : > { %3616 = vrot.lane.b32.xlu0 %v6497_v28, %s4991_s9 }
 0x438   : > { %v2892_v50 = vpop.permute.xlu1 %2891 }
 0x439   : > { %2958 = vst.msk [vmem:[#allocation4 + $0xe8] sm:$0xff] %vm816_vm4, %v2892_v50  ;;  %v2890_v63 = vpop.permute.xlu0 %2889 }
 0x43a   : > { %2957 = vst.msk [vmem:[#allocation4 + $0xe0] sm:$0xff] %vm816_vm4, %v2890_v63  ;;  %3808 = vrot.lane.b32.xlu1 %v6490_v32, %s4992_s11 }
 0x43b   : > { %3233 = vrot.lane.b32.xlu0 %v6495_v39, %s4989_s7 }
 0x43c   : > { %v2896_v40 = vpop.permute.xlu1 %2895 }
 0x43d   : > { %2960 = vst.msk [vmem:[#allocation4 + $0xf8] sm:$0xff] %vm816_vm4, %v2896_v40  ;;  %v2894_v9 = vpop.permute.xlu0 %2893 }
 0x43e   : > { %2959 = vst.msk [vmem:[#allocation4 + $0xf0] sm:$0xff] %vm816_vm4, %v2894_v9  ;;  %3235 = vrot.lane.b32.xlu1 %v3162_v34, %s4989_s7 }
 0x43f   : > { %3998 = vrot.lane.b32.xlu0 %v6686_v55, %s4993_s14 }
 0x440   : > { %v3028_v28 = vpop.permute.xlu1 %3027 }
 0x441   : > { %3122 = vst.msk [vmem:[#allocation4 + $0x8] sm:$0xff] %vm1009_vm5, %v3028_v28  ;;  %v3026_v49 = vpop.permute.xlu0 %3025 }
 0x442   : > { %3121 = vst.msk [vmem:[#allocation4] sm:$0xff] %vm1009_vm5, %v3026_v49  ;;  %4000 = vrot.lane.b32.xlu1 %v6681_v31, %s4993_s14 }
 0x443   : > { %3425 = vrot.lane.b32.xlu0 %v6686_v55, %s4990_s8 }
 0x444   : > { %v3032_v32 = vpop.permute.xlu1 %3031 }
 0x445   : > { %3124 = vst.msk [vmem:[#allocation4 + $0x18] sm:$0xff] %vm1009_vm5, %v3032_v32  ;;  %v3030_v39 = vpop.permute.xlu0 %3029  ;;  %v3746_v32 = vld [vmem:[#allocation3 + $0xf1] sm:$0xff] }
 0x446   : > { %3123 = vst.msk [vmem:[#allocation4 + $0x10] sm:$0xff] %vm1009_vm5, %v3030_v39  ;;  %3618 = vrot.lane.b32.xlu1 %v6520_v56, %s4991_s9  ;;  %v3739_v56 = vld [vmem:[#allocation3 + $0x99] sm:$0xff] }
 0x447   : > { %3427 = vrot.lane.b32.xlu0 %v6681_v31, %s4990_s8 }
 0x448   : > { %v3036_v14 = vpop.permute.xlu1 %3035 }
 0x449   : > { %3126 = vst.msk [vmem:[#allocation4 + $0x28] sm:$0xff] %vm1009_vm5, %v3036_v14  ;;  %v3034_v5 = vpop.permute.xlu0 %3033 }
 0x44a   : > { %3125 = vst.msk [vmem:[#allocation4 + $0x20] sm:$0xff] %vm1009_vm5, %v3034_v5  ;;  %3810 = vrot.lane.b32.xlu1 %v3738_v23, %s4992_s11  ;;  %v3938_v5 = vld [vmem:[#allocation3 + $0xf2] sm:$0xff] }
 0x44b   : > { %3620 = vrot.lane.b32.xlu0 %v6514_v18, %s4991_s9 }
 0x44c   : > { %v3040_v55 = vpop.permute.xlu1 %3039 }
 0x44d   : > { %3128 = vst.msk [vmem:[#allocation4 + $0x38] sm:$0xff] %vm1009_vm5, %v3040_v55  ;;  %v3038_v54 = vpop.permute.xlu0 %3037  ;;  %v3747_v55 = vld [vmem:[#allocation3 + $0xf9] sm:$0xff] }
 0x44e   : > { %3127 = vst.msk [vmem:[#allocation4 + $0x30] sm:$0xff] %vm1009_vm5, %v3038_v54  ;;  %3812 = vrot.lane.b32.xlu1 %v3739_v56, %s4992_s11 }
 0x44f   : > { %3237 = vrot.lane.b32.xlu0 %v3738_v23, %s4989_s7 }
 0x450   : > { %v3044_v31 = vpop.permute.xlu1 %3043 }
 0x451   : > { %3130 = vst.msk [vmem:[#allocation4 + $0x48] sm:$0xff] %vm1009_vm5, %v3044_v31  ;;  %v3042_v15 = vpop.permute.xlu0 %3041 }
 0x452   : > { %3129 = vst.msk [vmem:[#allocation4 + $0x40] sm:$0xff] %vm1009_vm5, %v3042_v15  ;;  %3239 = vrot.lane.b32.xlu1 %v3739_v56, %s4989_s7 }
 0x453   : > { %4002 = vrot.lane.b32.xlu0 %v6695_v45, %s4993_s14 }
 0x454   : > { %v3048_v18 = vpop.permute.xlu1 %3047 }
 0x455   : > { %3132 = vst.msk [vmem:[#allocation4 + $0x58] sm:$0xff] %vm1009_vm5, %v3048_v18  ;;  %v3046_v52 = vpop.permute.xlu0 %3045  ;;  %v3364_v18 = vld [vmem:[#allocation3 + $0xfa] sm:$0xff] }
 0x456   : > { %3131 = vst.msk [vmem:[#allocation4 + $0x50] sm:$0xff] %vm1009_vm5, %v3046_v52  ;;  %4004 = vrot.lane.b32.xlu1 %v6691_v7, %s4993_s14 }
 0x457   : > { %3429 = vrot.lane.b32.xlu0 %v6695_v45, %s4990_s8 }
 0x458   : > { %v3052_v2 = vpop.permute.xlu1 %3051 }
 0x459   : > { %3134 = vst.msk [vmem:[#allocation4 + $0x68] sm:$0xff] %vm1009_vm5, %v3052_v2  ;;  %v3050_v3 = vpop.permute.xlu0 %3049 }
 0x45a   : > { %3133 = vst.msk [vmem:[#allocation4 + $0x60] sm:$0xff] %vm1009_vm5, %v3050_v3  ;;  %3622 = vrot.lane.b32.xlu1 %v6536_v12, %s4991_s9  ;;  %v3741_v12 = vld [vmem:[#allocation3 + $0xb1] sm:$0xff] }
 0x45b   : > { %3431 = vrot.lane.b32.xlu0 %v6691_v7, %s4990_s8 }
 0x45c   : > { %v3056_v27 = vpop.permute.xlu1 %3055 }
 0x45d   : > { %3136 = vst.msk [vmem:[#allocation4 + $0x78] sm:$0xff] %vm1009_vm5, %v3056_v27  ;;  %v3054_v37 = vpop.permute.xlu0 %3053 }
 0x45e   : > { %3135 = vst.msk [vmem:[#allocation4 + $0x70] sm:$0xff] %vm1009_vm5, %v3054_v37  ;;  %3814 = vrot.lane.b32.xlu1 %v3740_v6, %s4992_s11  ;;  %v3748_v37 = vld [vmem:[#allocation3 + $0x109] sm:$0xff] }
 0x45f   : > { %3624 = vrot.lane.b32.xlu0 %v6530_v1, %s4991_s9 }
 0x460   : > { %v3218_v45 = vpop.permute.xlu1 %3217 }
 0x461   : > { %3313 = vst.msk [vmem:[#allocation4] sm:$0xff] %vm1202_vm6, %v3218_v45  ;;  %v3058_v53 = vpop.permute.xlu0 %3057 }
 0x462   : > { %3137 = vst.msk [vmem:[#allocation4 + $0x80] sm:$0xff] %vm1009_vm5, %v3058_v53  ;;  %3816 = vrot.lane.b32.xlu1 %v3741_v12, %s4992_s11 }
 0x463   : > { %3241 = vrot.lane.b32.xlu0 %v3740_v6, %s4989_s7 }
 0x464   : > { %v3410_v7 = vpop.permute.xlu1 %3409 }
 0x465   : > { %3505 = vst.msk [vmem:[#allocation4] sm:$0xff] %vm1395_vm7, %v3410_v7  ;;  %v3220_v35 = vpop.permute.xlu0 %3219 }
 0x466   : > { %3314 = vst.msk [vmem:[#allocation4 + $0x8] sm:$0xff] %vm1202_vm6, %v3220_v35  ;;  %3243 = vrot.lane.b32.xlu1 %v3741_v12, %s4989_s7  ;;  %v3940_v35 = vld [vmem:[#allocation3 + $0x10a] sm:$0xff] }
 0x467   : > { %4006 = vrot.lane.b32.xlu0 %v6704_v33, %s4993_s14 }
 0x468   : > { %v3603_v1 = vpop.permute.xlu1 %3602 }
 0x469   : > { %3698 = vst.msk [vmem:[#allocation4] sm:$0xff] %vm1589_vm8, %v3603_v1  ;;  %v3412_v13 = vpop.permute.xlu0 %3411  ;;  %v3749_v1 = vld [vmem:[#allocation3 + $0x111] sm:$0xff] }
 0x46a   : > { %3506 = vst.msk [vmem:[#allocation4 + $0x8] sm:$0xff] %vm1395_vm7, %v3412_v13  ;;  %4008 = vrot.lane.b32.xlu1 %v6699_v38, %s4993_s14 }
 0x46b   : > { %3433 = vrot.lane.b32.xlu0 %v6704_v33, %s4990_s8 }
 0x46c   : > { %v3795_v25 = vpop.permute.xlu1 %3794 }
 0x46d   : > { %3890 = vst.msk [vmem:[#allocation4] sm:$0xff] %vm1782_vm9, %v3795_v25  ;;  %v3605_v11 = vpop.permute.xlu0 %3604 }
 0x46e   : > { %3699 = vst.msk [vmem:[#allocation4 + $0x8] sm:$0xff] %vm1589_vm8, %v3605_v11  ;;  %3626 = vrot.lane.b32.xlu1 %v6552_v8, %s4991_s9  ;;  %v3743_v8 = vld [vmem:[#allocation3 + $0xc9] sm:$0xff] }
 0x46f   : > { %3435 = vrot.lane.b32.xlu0 %v6699_v38, %s4990_s8 }
 0x470   : > { %v3797_v10 = vpop.permute.xlu1 %3796 }
 0x471   : > { %3891 = vst.msk [vmem:[#allocation4 + $0x8] sm:$0xff] %vm1782_vm9, %v3797_v10  ;;  %v3222_v51 = vpop.permute.xlu0 %3221  ;;  %v3366_v10 = vld [vmem:[#allocation3 + $0x112] sm:$0xff] }
 0x472   : > { %3315 = vst.msk [vmem:[#allocation4 + $0x10] sm:$0xff] %vm1202_vm6, %v3222_v51  ;;  %3818 = vrot.lane.b32.xlu1 %v3742_v30, %s4992_s11 }
 0x473   : > { %3628 = vrot.lane.b32.xlu0 %v6546_v60, %s4991_s9 }
 0x474   : > { %v3224_v33 = vpop.permute.xlu1 %3223 }
 0x475   : > { %3316 = vst.msk [vmem:[#allocation4 + $0x18] sm:$0xff] %vm1202_vm6, %v3224_v33  ;;  %v3987_v43 = vpop.permute.xlu0 %3986 }
 0x476   : > { %4082 = vst.msk [vmem:[#allocation4] sm:$0xff] %vm1975_vm10, %v3987_v43  ;;  %3820 = vrot.lane.b32.xlu1 %v3743_v8, %s4992_s11 }
 0x477   : > { %3245 = vrot.lane.b32.xlu0 %v3742_v30, %s4989_s7 }
 0x478   : > { %v3989_v38 = vpop.permute.xlu1 %3988 }
 0x479   : > { %4083 = vst.msk [vmem:[#allocation4 + $0x8] sm:$0xff] %vm1975_vm10, %v3989_v38  ;;  %v3414_v44 = vpop.permute.xlu0 %3413 }
 0x47a   : > { %3507 = vst.msk [vmem:[#allocation4 + $0x10] sm:$0xff] %vm1395_vm7, %v3414_v44  ;;  %3247 = vrot.lane.b32.xlu1 %v3743_v8, %s4989_s7  ;;  %v3750_v8 = vld [vmem:[#allocation3 + $0x121] sm:$0xff] }
 0x47b   : > { %4010 = vrot.lane.b32.xlu0 %v6713_v21, %s4993_s14  ;;  %v3559_v44 = vld [vmem:[#allocation3 + $0x128] sm:$0xff] }
 0x47c   : > { %v3607_v60 = vpop.permute.xlu1 %3606 }
 0x47d   : > { %3700 = vst.msk [vmem:[#allocation4 + $0x10] sm:$0xff] %vm1589_vm8, %v3607_v60  ;;  %v3416_v19 = vpop.permute.xlu0 %3415  ;;  %v4114_v48 = vld [vmem:[#allocation4] sm:$0xff] }
 0x47e   : > { %3508 = vst.msk [vmem:[#allocation4 + $0x18] sm:$0xff] %vm1395_vm7, %v3416_v19  ;;  %4012 = vrot.lane.b32.xlu1 %v6709_v41, %s4993_s14  ;;  %4880 = vmatprep.mubr.msk.f32.mxu1 %vm2049_vm11, %v4114_v48 }
 0x47f   : > { %3437 = vrot.lane.b32.xlu0 %v6713_v21, %s4990_s8  ;;  %v3744_v21 = vld [vmem:[#allocation3 + $0xd9] sm:$0xff] }
 0x480   : > { %v3799_v0 = vpop.permute.xlu1 %3798  ;;  %v4115_v36 = vld [vmem:[#allocation4 + $0x8] sm:$0xff] }
 0x481   : > { %3892 = vst.msk [vmem:[#allocation4 + $0x10] sm:$0xff] %vm1782_vm9, %v3799_v0  ;;  %4881 = vmatmul.mubr.msk.f32.vlgmr.msra.gmra.mrb[0].mxu1 %vm2049_vm11, %v4115_v36  ;;  %v3609_v16 = vpop.permute.xlu0 %3608  ;;  %v3942_v36 = vld [vmem:[#allocation3 + $0x122] sm:$0xff] }
 0x482   : > { %3701 = vst.msk [vmem:[#allocation4 + $0x18] sm:$0xff] %vm1589_vm8, %v3609_v16  ;;  %3630 = vrot.lane.b32.xlu1 %v6568_v17, %s4991_s9  ;;  %v3751_v16 = vld [vmem:[#allocation3 + $0x129] sm:$0xff] }
 0x483   : > { %3439 = vrot.lane.b32.xlu0 %v6709_v41, %s4990_s8 }
 0x484   : > { %v3801_v61 = vpop.permute.xlu1 %3800 }
 0x485   : > { %3893 = vst.msk [vmem:[#allocation4 + $0x18] sm:$0xff] %vm1782_vm9, %v3801_v61  ;;  %v3226_v26 = vpop.permute.xlu0 %3225 }
 0x486   : > { %3317 = vst.msk [vmem:[#allocation4 + $0x20] sm:$0xff] %vm1202_vm6, %v3226_v26  ;;  %3822 = vrot.lane.b32.xlu1 %v3744_v21, %s4992_s11 }
 0x487   : > { %3632 = vrot.lane.b32.xlu0 %v6562_v42, %s4991_s9 }
 0x488   : > { %v3228_v58 = vpop.permute.xlu1 %3227 }
 0x489   : > { %3318 = vst.msk [vmem:[#allocation4 + $0x28] sm:$0xff] %vm1202_vm6, %v3228_v58  ;;  %v3991_v4 = vpop.permute.xlu0 %3990 }
 0x48a   : > { %4084 = vst.msk [vmem:[#allocation4 + $0x10] sm:$0xff] %vm1975_vm10, %v3991_v4  ;;  %3249 = vrot.lane.b32.xlu1 %v3744_v21, %s4989_s7  ;;  %v3368_v4 = vld [vmem:[#allocation3 + $0x12a] sm:$0xff] }
 0x48b   : > { %3059 = vrot.lane.b32.xlu0 %v6562_v42, %s4988_s30 }
 0x48c   : > { %v3993_v17 = vpop.permute.xlu1 %3992 }
 0x48d   : > { %4085 = vst.msk [vmem:[#allocation4 + $0x18] sm:$0xff] %vm1975_vm10, %v3993_v17  ;;  %v3418_v41 = vpop.permute.xlu0 %3417 }
 0x48e   : > { %3509 = vst.msk [vmem:[#allocation4 + $0x20] sm:$0xff] %vm1395_vm7, %v3418_v41  ;;  %4014 = vrot.lane.b32.xlu1 %v6722_v46, %s4993_s14 }
 0x48f   : > { %3824 = vrot.lane.b32.xlu0 %v3745_v59, %s4992_s11 }
 0x490   : > { %v3611_v24 = vpop.permute.xlu1 %3610 }
 0x491   : > { %3702 = vst.msk [vmem:[#allocation4 + $0x20] sm:$0xff] %vm1589_vm8, %v3611_v24  ;;  %v3420_v50 = vpop.permute.xlu0 %3419  ;;  %v4116_v63 = vld [vmem:[#allocation4 + $0x10] sm:$0xff] }
 0x492   : > { %3510 = vst.msk [vmem:[#allocation4 + $0x28] sm:$0xff] %vm1395_vm7, %v3420_v50  ;;  %3441 = vrot.lane.b32.xlu1 %v6722_v46, %s4990_s8  ;;  %4883 = vmatprep.mubr.msk.f32.mxu1 %vm2049_vm11, %v4116_v63 }
 0x493   : > { %3251 = vrot.lane.b32.xlu0 %v3745_v59, %s4989_s7  ;;  %v2985_v59 = vld [vmem:[#allocation3 + $0x138] sm:$0xff] }
 0x494   : > { %v3803_v42 = vpop.permute.xlu1 %3802  ;;  %v4117_v40 = vld [vmem:[#allocation4 + $0x18] sm:$0xff] }
 0x495   : > { %3894 = vst.msk [vmem:[#allocation4 + $0x20] sm:$0xff] %vm1782_vm9, %v3803_v42  ;;  %4884 = vmatmul.mubr.msk.f32.gmra.mrb[2].mxu1 %vm2049_vm11, %v4117_v40  ;;  %v3613_v9 = vpop.permute.xlu0 %3612  ;;  %v3752_v40 = vld [vmem:[#allocation3 + $0x139] sm:$0xff] }
 0x496   : > { %3703 = vst.msk [vmem:[#allocation4 + $0x28] sm:$0xff] %vm1589_vm8, %v3613_v9  ;;  %3443 = vrot.lane.b32.xlu1 %v6717_v29, %s4990_s8  ;;  %v3561_v9 = vld [vmem:[#allocation3 + $0x140] sm:$0xff] }
 0x497   : > { %4016 = vrot.lane.b32.xlu0 %v6717_v29, %s4993_s14 }
 0x498   : > { %v3805_v46 = vpop.permute.xlu1 %3804 }
 0x499   : > { %3895 = vst.msk [vmem:[#allocation4 + $0x28] sm:$0xff] %vm1782_vm9, %v3805_v46  ;;  %v3230_v34 = vpop.permute.xlu0 %3229 }
 0x49a   : > { %3319 = vst.msk [vmem:[#allocation4 + $0x30] sm:$0xff] %vm1202_vm6, %v3230_v34  ;;  %3061 = vrot.lane.b32.xlu1 %v6584_v47, %s4988_s30 }
 0x49b   : > { %3634 = vrot.lane.b32.xlu0 %v6584_v47, %s4991_s9 }
 0x49c   : > { %v3232_v28 = vpop.permute.xlu1 %3231 }
 0x49d   : > { %3320 = vst.msk [vmem:[#allocation4 + $0x38] sm:$0xff] %vm1202_vm6, %v3232_v28  ;;  %v3995_v49 = vpop.permute.xlu0 %3994 }
 0x49e   : > { %4086 = vst.msk [vmem:[#allocation4 + $0x20] sm:$0xff] %vm1975_vm10, %v3995_v49  ;;  %3826 = vrot.lane.b32.xlu1 %v3746_v32, %s4992_s11 }
 0x49f   : > { %3636 = vrot.lane.b32.xlu0 %v6578_v20, %s4991_s9 }
 0x4a0   : > { %v3997_v29 = vpop.permute.xlu1 %3996 }
 0x4a1   : > { %4087 = vst.msk [vmem:[#allocation4 + $0x28] sm:$0xff] %vm1975_vm10, %v3997_v29  ;;  %v3422_v39 = vpop.permute.xlu0 %3421  ;;  %v3753_v29 = vld [vmem:[#allocation3 + $0x141] sm:$0xff] }
 0x4a2   : > { %3511 = vst.msk [vmem:[#allocation4 + $0x30] sm:$0xff] %vm1395_vm7, %v3422_v39  ;;  %3253 = vrot.lane.b32.xlu1 %v3746_v32, %s4989_s7  ;;  %v3944_v32 = vld [vmem:[#allocation3 + $0x13a] sm:$0xff] }
 0x4a3   : > { %3063 = vrot.lane.b32.xlu0 %v6578_v20, %s4988_s30 }
 0x4a4   : > { %v3615_v47 = vpop.permute.xlu1 %3614 }
 0x4a5   : > { %3704 = vst.msk [vmem:[#allocation4 + $0x30] sm:$0xff] %vm1589_vm8, %v3615_v47  ;;  %v3424_v14 = vpop.permute.xlu0 %3423  ;;  %v4118_v23 = vld [vmem:[#allocation4 + $0x20] sm:$0xff] }
 0x4a6   : > { %3512 = vst.msk [vmem:[#allocation4 + $0x38] sm:$0xff] %vm1395_vm7, %v3424_v14  ;;  %4018 = vrot.lane.b32.xlu1 %v3938_v5, %s4993_s14  ;;  %4886 = vmatprep.mubr.msk.f32.mxu1 %vm2049_vm11, %v4118_v23  ;;  %v3370_v23 = vld [vmem:[#allocation3 + $0x142] sm:$0xff] }
 0x4a7   : > { %3828 = vrot.lane.b32.xlu0 %v3747_v55, %s4992_s11 }
 0x4a8   : > { %v3807_v54 = vpop.permute.xlu1 %3806  ;;  %v4119_v56 = vld [vmem:[#allocation4 + $0x28] sm:$0xff] }
 0x4a9   : > { %3896 = vst.msk [vmem:[#allocation4 + $0x30] sm:$0xff] %vm1782_vm9, %v3807_v54  ;;  %4887 = vmatmul.mubr.msk.f32.gmra.mrb[4].mxu1 %vm2049_vm11, %v4119_v56  ;;  %v3617_v20 = vpop.permute.xlu0 %3616 }
 0x4aa   : > { %3705 = vst.msk [vmem:[#allocation4 + $0x38] sm:$0xff] %vm1589_vm8, %v3617_v20  ;;  %3445 = vrot.lane.b32.xlu1 %v3938_v5, %s4990_s8 }
 0x4ab   : > { %3255 = vrot.lane.b32.xlu0 %v3747_v55, %s4989_s7 }
 0x4ac   : > { %v3809_v31 = vpop.permute.xlu1 %3808 }
 0x4ad   : > { %3897 = vst.msk [vmem:[#allocation4 + $0x38] sm:$0xff] %vm1782_vm9, %v3809_v31  ;;  %v3234_v15 = vpop.permute.xlu0 %3233  ;;  %v2987_v31 = vld [vmem:[#allocation3 + $0x150] sm:$0xff] }
 0x4ae   : > { %3321 = vst.msk [vmem:[#allocation4 + $0x40] sm:$0xff] %vm1202_vm6, %v3234_v15  ;;  %3447 = vrot.lane.b32.xlu1 %v3364_v18, %s4990_s8 }
 0x4af   : > { %4020 = vrot.lane.b32.xlu0 %v3364_v18, %s4993_s14 }
 0x4b0   : > { %v3236_v52 = vpop.permute.xlu1 %3235 }
 0x4b1   : > { %3322 = vst.msk [vmem:[#allocation4 + $0x48] sm:$0xff] %vm1202_vm6, %v3236_v52  ;;  %v3999_v2 = vpop.permute.xlu0 %3998  ;;  %v3754_v52 = vld [vmem:[#allocation3 + $0x151] sm:$0xff] }
 0x4b2   : > { %4088 = vst.msk [vmem:[#allocation4 + $0x30] sm:$0xff] %vm1975_vm10, %v3999_v2  ;;  %3065 = vrot.lane.b32.xlu1 %v6600_v62, %s4988_s30  ;;  %v3563_v2 = vld [vmem:[#allocation3 + $0x158] sm:$0xff] }
 0x4b3   : > { %3638 = vrot.lane.b32.xlu0 %v6600_v62, %s4991_s9 }
 0x4b4   : > { %v4001_v3 = vpop.permute.xlu1 %4000 }
 0x4b5   : > { %4089 = vst.msk [vmem:[#allocation4 + $0x38] sm:$0xff] %vm1975_vm10, %v4001_v3  ;;  %v3426_v27 = vpop.permute.xlu0 %3425 }
 0x4b6   : > { %3513 = vst.msk [vmem:[#allocation4 + $0x40] sm:$0xff] %vm1395_vm7, %v3426_v27  ;;  %3830 = vrot.lane.b32.xlu1 %v3748_v37, %s4992_s11 }
 0x4b7   : > { %3640 = vrot.lane.b32.xlu0 %v6594_v57, %s4991_s9 }
 0x4b8   : > { %v3619_v6 = vpop.permute.xlu1 %3618 }
 0x4b9   : > { %3706 = vst.msk [vmem:[#allocation4 + $0x40] sm:$0xff] %vm1589_vm8, %v3619_v6  ;;  %v3428_v45 = vpop.permute.xlu0 %3427  ;;  %v4120_v53 = vld [vmem:[#allocation4 + $0x30] sm:$0xff] }
 0x4ba   : > { %3514 = vst.msk [vmem:[#allocation4 + $0x48] sm:$0xff] %vm1395_vm7, %v3428_v45  ;;  %3257 = vrot.lane.b32.xlu1 %v3748_v37, %s4989_s7  ;;  %4889 = vmatprep.mubr.msk.f32.mxu1 %vm2049_vm11, %v4120_v53  ;;  %v3946_v45 = vld [vmem:[#allocation3 + $0x152] sm:$0xff] }
 0x4bb   : > { %3067 = vrot.lane.b32.xlu0 %v6594_v57, %s4988_s30  ;;  %v3755_v53 = vld [vmem:[#allocation3 + $0x159] sm:$0xff] }
 0x4bc   : > { %v3811_v62 = vpop.permute.xlu1 %3810  ;;  %v4121_v12 = vld [vmem:[#allocation4 + $0x38] sm:$0xff] }
 0x4bd   : > { %3898 = vst.msk [vmem:[#allocation4 + $0x40] sm:$0xff] %vm1782_vm9, %v3811_v62  ;;  %4890 = vmatmul.mubr.msk.f32.gmra.mrb[6].mxu1 %vm2049_vm11, %v4121_v12  ;;  %v3621_v7 = vpop.permute.xlu0 %3620 }
 0x4be   : > { %3707 = vst.msk [vmem:[#allocation4 + $0x48] sm:$0xff] %vm1589_vm8, %v3621_v7  ;;  %4022 = vrot.lane.b32.xlu1 %v3940_v35, %s4993_s14 }
 0x4bf   : > { %3832 = vrot.lane.b32.xlu0 %v3749_v1, %s4992_s11 }
 0x4c0   : > { %v3813_v13 = vpop.permute.xlu1 %3812 }
 0x4c1   : > { %3899 = vst.msk [vmem:[#allocation4 + $0x48] sm:$0xff] %vm1782_vm9, %v3813_v13  ;;  %v3238_v25 = vpop.permute.xlu0 %3237  ;;  %v3372_v13 = vld [vmem:[#allocation3 + $0x15a] sm:$0xff] }
 0x4c2   : > { %3323 = vst.msk [vmem:[#allocation4 + $0x50] sm:$0xff] %vm1202_vm6, %v3238_v25  ;;  %3449 = vrot.lane.b32.xlu1 %v3940_v35, %s4990_s8 }
 0x4c3   : > { %3259 = vrot.lane.b32.xlu0 %v3749_v1, %s4989_s7 }
 0x4c4   : > { %v3240_v57 = vpop.permute.xlu1 %3239 }
 0x4c5   : > { %3324 = vst.msk [vmem:[#allocation4 + $0x58] sm:$0xff] %vm1202_vm6, %v3240_v57  ;;  %v4003_v11 = vpop.permute.xlu0 %4002 }
 0x4c6   : > { %4090 = vst.msk [vmem:[#allocation4 + $0x40] sm:$0xff] %vm1975_vm10, %v4003_v11  ;;  %3451 = vrot.lane.b32.xlu1 %v3366_v10, %s4990_s8  ;;  %v2989_v11 = vld [vmem:[#allocation3 + $0x168] sm:$0xff] }
 0x4c7   : > { %4024 = vrot.lane.b32.xlu0 %v3366_v10, %s4993_s14 }
 0x4c8   : > { %v4005_v51 = vpop.permute.xlu1 %4004 }
 0x4c9   : > { %4091 = vst.msk [vmem:[#allocation4 + $0x48] sm:$0xff] %vm1975_vm10, %v4005_v51  ;;  %v3430_v30 = vpop.permute.xlu0 %3429 }
 0x4ca   : > { %3515 = vst.msk [vmem:[#allocation4 + $0x50] sm:$0xff] %vm1395_vm7, %v3430_v30  ;;  %3069 = vrot.lane.b32.xlu1 %v6613_v22, %s4988_s30 }
 0x4cb   : > { %3642 = vrot.lane.b32.xlu0 %v6613_v22, %s4991_s9 }
 0x4cc   : > { %v3623_v33 = vpop.permute.xlu1 %3622 }
 0x4cd   : > { %3708 = vst.msk [vmem:[#allocation4 + $0x50] sm:$0xff] %vm1589_vm8, %v3623_v33  ;;  %v3432_v43 = vpop.permute.xlu0 %3431  ;;  %v4122_v38 = vld [vmem:[#allocation4 + $0x40] sm:$0xff] }
 0x4ce   : > { %3516 = vst.msk [vmem:[#allocation4 + $0x58] sm:$0xff] %vm1395_vm7, %v3432_v43  ;;  %3834 = vrot.lane.b32.xlu1 %v3750_v8, %s4992_s11  ;;  %4892 = vmatprep.mubr.msk.f32.mxu1 %vm2049_vm11, %v4122_v38  ;;  %v3756_v33 = vld [vmem:[#allocation3 + $0x169] sm:$0xff] }
 0x4cf   : > { %3644 = vrot.lane.b32.xlu0 %v3559_v44, %s4991_s9  ;;  %v3565_v43 = vld [vmem:[#allocation3 + $0x170] sm:$0xff] }
 0x4d0   : > { %v3815_v60 = vpop.permute.xlu1 %3814  ;;  %v4123_v19 = vld [vmem:[#allocation4 + $0x48] sm:$0xff] }
 0x4d1   : > { %3900 = vst.msk [vmem:[#allocation4 + $0x50] sm:$0xff] %vm1782_vm9, %v3815_v60  ;;  %4893 = vmatmul.mubr.msk.f32.gmra.mrb[8].mxu1 %vm2049_vm11, %v4123_v19  ;;  %v3625_v22 = vpop.permute.xlu0 %3624  ;;  %v3948_v19 = vld [vmem:[#allocation3 + $0x16a] sm:$0xff] }
 0x4d2   : > { %3709 = vst.msk [vmem:[#allocation4 + $0x58] sm:$0xff] %vm1589_vm8, %v3625_v22  ;;  %3261 = vrot.lane.b32.xlu1 %v3750_v8, %s4989_s7  ;;  %v3757_v22 = vld [vmem:[#allocation3 + $0x171] sm:$0xff] }
 0x4d3   : > { %3071 = vrot.lane.b32.xlu0 %v3559_v44, %s4988_s30 }
 0x4d4   : > { %v3817_v48 = vpop.permute.xlu1 %3816 }
 0x4d5   : > { %3901 = vst.msk [vmem:[#allocation4 + $0x58] sm:$0xff] %vm1782_vm9, %v3817_v48  ;;  %v3242_v0 = vpop.permute.xlu0 %3241 }
 0x4d6   : > { %3325 = vst.msk [vmem:[#allocation4 + $0x60] sm:$0xff] %vm1202_vm6, %v3242_v0  ;;  %4026 = vrot.lane.b32.xlu1 %v3942_v36, %s4993_s14 }
 0x4d7   : > { %3836 = vrot.lane.b32.xlu0 %v3751_v16, %s4992_s11 }
 0x4d8   : > { %v3244_v61 = vpop.permute.xlu1 %3243 }
 0x4d9   : > { %3326 = vst.msk [vmem:[#allocation4 + $0x68] sm:$0xff] %vm1202_vm6, %v3244_v61  ;;  %v4007_v26 = vpop.permute.xlu0 %4006 }
 0x4da   : > { %4092 = vst.msk [vmem:[#allocation4 + $0x50] sm:$0xff] %vm1975_vm10, %v4007_v26  ;;  %3453 = vrot.lane.b32.xlu1 %v3942_v36, %s4990_s8  ;;  %v3374_v26 = vld [vmem:[#allocation3 + $0x172] sm:$0xff] }
 0x4db   : > { %3263 = vrot.lane.b32.xlu0 %v3751_v16, %s4989_s7 }
 0x4dc   : > { %v4009_v21 = vpop.permute.xlu1 %4008 }
 0x4dd   : > { %4093 = vst.msk [vmem:[#allocation4 + $0x58] sm:$0xff] %vm1975_vm10, %v4009_v21  ;;  %v3434_v58 = vpop.permute.xlu0 %3433 }
 0x4de   : > { %3517 = vst.msk [vmem:[#allocation4 + $0x60] sm:$0xff] %vm1395_vm7, %v3434_v58  ;;  %3455 = vrot.lane.b32.xlu1 %v3368_v4, %s4990_s8 }
 0x4df   : > { %4028 = vrot.lane.b32.xlu0 %v3368_v4, %s4993_s14 }
 0x4e0   : > { %v3627_v17 = vpop.permute.xlu1 %3626 }
 0x4e1   : > { %3710 = vst.msk [vmem:[#allocation4 + $0x60] sm:$0xff] %vm1589_vm8, %v3627_v17  ;;  %v3436_v41 = vpop.permute.xlu0 %3435  ;;  %v4124_v24 = vld [vmem:[#allocation4 + $0x50] sm:$0xff] }
 0x4e2   : > { %3518 = vst.msk [vmem:[#allocation4 + $0x68] sm:$0xff] %vm1395_vm7, %v3436_v41  ;;  %3073 = vrot.lane.b32.xlu1 %v2985_v59, %s4988_s30  ;;  %4895 = vmatprep.mubr.msk.f32.mxu1 %vm2049_vm11, %v4124_v24  ;;  %v2991_v17 = vld [vmem:[#allocation3 + $0x180] sm:$0xff] }
 0x4e3   : > { %3646 = vrot.lane.b32.xlu0 %v2985_v59, %s4991_s9  ;;  %v3758_v24 = vld [vmem:[#allocation3 + $0x181] sm:$0xff] }
 0x4e4   : > { %v3819_v50 = vpop.permute.xlu1 %3818  ;;  %v4125_v63 = vld [vmem:[#allocation4 + $0x58] sm:$0xff] }
 0x4e5   : > { %3902 = vst.msk [vmem:[#allocation4 + $0x60] sm:$0xff] %vm1782_vm9, %v3819_v50  ;;  %4896 = vmatmul.mubr.msk.f32.gmra.mrb[10].mxu1 %vm2049_vm11, %v4125_v63  ;;  %v3629_v42 = vpop.permute.xlu0 %3628  ;;  %v3567_v50 = vld [vmem:[#allocation3 + $0x188] sm:$0xff] }
 0x4e6   : > { %3711 = vst.msk [vmem:[#allocation4 + $0x68] sm:$0xff] %vm1589_vm8, %v3629_v42  ;;  %3838 = vrot.lane.b32.xlu1 %v3752_v40, %s4992_s11 }
 0x4e7   : > { %3648 = vrot.lane.b32.xlu0 %v3561_v9, %s4991_s9 }
 0x4e8   : > { %v3821_v46 = vpop.permute.xlu1 %3820 }
 0x4e9   : > { %3903 = vst.msk [vmem:[#allocation4 + $0x68] sm:$0xff] %vm1782_vm9, %v3821_v46  ;;  %v3246_v34 = vpop.permute.xlu0 %3245  ;;  %v3950_v46 = vld [vmem:[#allocation3 + $0x182] sm:$0xff] }
 0x4ea   : > { %3327 = vst.msk [vmem:[#allocation4 + $0x70] sm:$0xff] %vm1202_vm6, %v3246_v34  ;;  %3265 = vrot.lane.b32.xlu1 %v3752_v40, %s4989_s7  ;;  %v3759_v34 = vld [vmem:[#allocation3 + $0x189] sm:$0xff] }
 0x4eb   : > { %3075 = vrot.lane.b32.xlu0 %v3561_v9, %s4988_s30 }
 0x4ec   : > { %v3248_v28 = vpop.permute.xlu1 %3247 }
 0x4ed   : > { %3328 = vst.msk [vmem:[#allocation4 + $0x78] sm:$0xff] %vm1202_vm6, %v3248_v28  ;;  %v4011_v49 = vpop.permute.xlu0 %4010 }
 0x4ee   : > { %4094 = vst.msk [vmem:[#allocation4 + $0x60] sm:$0xff] %vm1975_vm10, %v4011_v49  ;;  %4030 = vrot.lane.b32.xlu1 %v3944_v32, %s4993_s14 }
 0x4ef   : > { %3840 = vrot.lane.b32.xlu0 %v3753_v29, %s4992_s11 }
 0x4f0   : > { %v4013_v39 = vpop.permute.xlu1 %4012 }
 0x4f1   : > { %4095 = vst.msk [vmem:[#allocation4 + $0x68] sm:$0xff] %vm1975_vm10, %v4013_v39  ;;  %v3438_v47 = vpop.permute.xlu0 %3437 }
 0x4f2   : > { %3519 = vst.msk [vmem:[#allocation4 + $0x70] sm:$0xff] %vm1395_vm7, %v3438_v47  ;;  %3457 = vrot.lane.b32.xlu1 %v3944_v32, %s4990_s8  ;;  %v3376_v47 = vld [vmem:[#allocation3 + $0x18a] sm:$0xff] }
 0x4f3   : > { %3267 = vrot.lane.b32.xlu0 %v3753_v29, %s4989_s7 }
 0x4f4   : > { %v3631_v14 = vpop.permute.xlu1 %3630 }
 0x4f5   : > { %3712 = vst.msk [vmem:[#allocation4 + $0x70] sm:$0xff] %vm1589_vm8, %v3631_v14  ;;  %v3440_v5 = vpop.permute.xlu0 %3439  ;;  %v4126_v55 = vld [vmem:[#allocation4 + $0x60] sm:$0xff]  ;;  %v3569_v14 = vld [vmem:[#allocation3 + $0x1a0] sm:$0xff] }
 0x4f6   : > { %3520 = vst.msk [vmem:[#allocation4 + $0x78] sm:$0xff] %vm1395_vm7, %v3440_v5  ;;  %3459 = vrot.lane.b32.xlu1 %v3370_v23, %s4990_s8  ;;  %4898 = vmatprep.mubr.msk.f32.mxu1 %vm2049_vm11, %v4126_v55 }
 0x4f7   : > { %4032 = vrot.lane.b32.xlu0 %v3370_v23, %s4993_s14  ;;  %v3568_v23 = vld [vmem:[#allocation3 + $0x198] sm:$0xff] }
 0x4f8   : > { %v3823_v54 = vpop.permute.xlu1 %3822  ;;  %v4127_v56 = vld [vmem:[#allocation4 + $0x68] sm:$0xff] }
 0x4f9   : > { %3904 = vst.msk [vmem:[#allocation4 + $0x70] sm:$0xff] %vm1782_vm9, %v3823_v54  ;;  %4899 = vmatmul.mubr.msk.f32.gmra.mrb[12].mxu1 %vm2049_vm11, %v4127_v56  ;;  %v3633_v20 = vpop.permute.xlu0 %3632  ;;  %v3761_v56 = vld [vmem:[#allocation3 + $0x1a1] sm:$0xff] }
 0x4fa   : > { %3713 = vst.msk [vmem:[#allocation4 + $0x78] sm:$0xff] %vm1589_vm8, %v3633_v20  ;;  %3077 = vrot.lane.b32.xlu1 %v2987_v31, %s4988_s30 }
 0x4fb   : > { %3650 = vrot.lane.b32.xlu0 %v2987_v31, %s4991_s9  ;;  %v3760_v31 = vld [vmem:[#allocation3 + $0x199] sm:$0xff] }
 0x4fc   : > { %v3250_v15 = vpop.permute.xlu1 %3249 }
 0x4fd   : > { %3329 = vst.msk [vmem:[#allocation4 + $0x80] sm:$0xff] %vm1202_vm6, %v3250_v15  ;;  %v3060_v18 = vpop.permute.xlu0 %3059 }
 0x4fe   : > { %3138 = vst.msk [vmem:[#allocation4 + $0x88] sm:$0xff] %vm1009_vm5, %v3060_v18  ;;  %3842 = vrot.lane.b32.xlu1 %v3754_v52, %s4992_s11  ;;  %v3953_v18 = vld [vmem:[#allocation3 + $0x1a2] sm:$0xff] }
 0x4ff   : > { %3652 = vrot.lane.b32.xlu0 %v3563_v2, %s4991_s9 }
 0x500   : > { %v4015_v3 = vpop.permute.xlu1 %4014 }
 0x501   : > { %4096 = vst.msk [vmem:[#allocation4 + $0x70] sm:$0xff] %vm1975_vm10, %v4015_v3  ;;  %v3825_v27 = vpop.permute.xlu0 %3824 }
 0x502   : > { %3905 = vst.msk [vmem:[#allocation4 + $0x78] sm:$0xff] %vm1782_vm9, %v3825_v27  ;;  %3269 = vrot.lane.b32.xlu1 %v3754_v52, %s4989_s7 }
 0x503   : > { %3079 = vrot.lane.b32.xlu0 %v3563_v2, %s4988_s30  ;;  %v3952_v2 = vld [vmem:[#allocation3 + $0x19a] sm:$0xff] }
 0x504   : > { %v3442_v37 = vpop.permute.xlu1 %3441 }
 0x505   : > { %3521 = vst.msk [vmem:[#allocation4 + $0x80] sm:$0xff] %vm1395_vm7, %v3442_v37  ;;  %v3252_v6 = vpop.permute.xlu0 %3251 }
 0x506   : > { %3330 = vst.msk [vmem:[#allocation4 + $0x88] sm:$0xff] %vm1202_vm6, %v3252_v6  ;;  %4034 = vrot.lane.b32.xlu1 %v3946_v45, %s4993_s14 }
 0x507   : > { %3844 = vrot.lane.b32.xlu0 %v3755_v53, %s4992_s11 }
 0x508   : > { %v3444_v62 = vpop.permute.xlu1 %3443  ;;  %v4128_v12 = vld [vmem:[#allocation4 + $0x70] sm:$0xff] }
 0x509   : > { %3522 = vst.msk [vmem:[#allocation4 + $0x88] sm:$0xff] %vm1395_vm7, %v3444_v62  ;;  %4901 = vmatprep.mubr.msk.f32.mxu1 %vm2049_vm11, %v4128_v12  ;;  %v4017_v7 = vpop.permute.xlu0 %4016  ;;  %v7271_v62 = vld [vmem:[%s7481_s5] ss:$0 sm:$0xff] }
 0x50a   : > { %4097 = vst.msk [vmem:[#allocation4 + $0x78] sm:$0xff] %vm1975_vm10, %v4017_v7  ;;  %3461 = vrot.lane.b32.xlu1 %v3946_v45, %s4990_s8 }
 0x50b   : > { %3271 = vrot.lane.b32.xlu0 %v3755_v53, %s4989_s7 }
 0x50c   : > { %v3062_v35 = vpop.permute.xlu1 %3061 }
 0x50d   : > { %3139 = vst.msk [vmem:[#allocation4 + $0x90] sm:$0xff] %vm1009_vm5, %v3062_v35  ;;  %v3635_v1 = vpop.permute.xlu0 %3634 }
 0x50e   : > { %3714 = vst.msk [vmem:[#allocation4 + $0x80] sm:$0xff] %vm1589_vm8, %v3635_v1  ;;  %3463 = vrot.lane.b32.xlu1 %v3372_v13, %s4990_s8 }
 0x50f   : > { %4036 = vrot.lane.b32.xlu0 %v3372_v13, %s4993_s14 }
 0x510   : > { %v3827_v25 = vpop.permute.xlu1 %3826 }
 0x511   : > { %3906 = vst.msk [vmem:[#allocation4 + $0x80] sm:$0xff] %vm1782_vm9, %v3827_v25  ;;  %v3637_v57 = vpop.permute.xlu0 %3636  ;;  %v4129_v10 = vld [vmem:[#allocation4 + $0x78] sm:$0xff] }
 0x512   : > { %3715 = vst.msk [vmem:[#allocation4 + $0x88] sm:$0xff] %vm1589_vm8, %v3637_v57  ;;  %3081 = vrot.lane.b32.xlu1 %v2989_v11, %s4988_s30  ;;  %4902 = vmatmul.mubr.msk.f32.gmra.mrb[14].mxu1 %vm2049_vm11, %v4129_v10  ;;  %v7638_v57 = vld [vmem:[#allocation6_spill] sm:$0xff]  ;;  %v7639_v10 = vld [vmem:[#allocation5_spill] sm:$0xff] }
 0x513   : > { %3654 = vrot.lane.b32.xlu0 %v2989_v11, %s4991_s9 }
 0x514   : > { %v3254_v51 = vpop.permute.xlu1 %3253 }
 0x515   : > { %3331 = vst.msk [vmem:[#allocation4 + $0x90] sm:$0xff] %vm1202_vm6, %v3254_v51  ;;  %v3064_v30 = vpop.permute.xlu0 %3063 }
 0x516   : > { %3140 = vst.msk [vmem:[#allocation4 + $0x98] sm:$0xff] %vm1009_vm5, %v3064_v30  ;;  %3846 = vrot.lane.b32.xlu1 %v3756_v33, %s4992_s11 }
 0x517   : > { %3656 = vrot.lane.b32.xlu0 %v3565_v43, %s4991_s9 }
 0x518   : > { %v4019_v8 = vpop.permute.xlu1 %4018 }
 0x519   : > { %4098 = vst.msk [vmem:[#allocation4 + $0x80] sm:$0xff] %vm1975_vm10, %v4019_v8  ;;  %v3829_v38 = vpop.permute.xlu0 %3828 }
 0x51a   : > { %3907 = vst.msk [vmem:[#allocation4 + $0x88] sm:$0xff] %vm1782_vm9, %v3829_v38  ;;  %3273 = vrot.lane.b32.xlu1 %v3756_v33, %s4989_s7 }
 0x51b   : > { %3083 = vrot.lane.b32.xlu0 %v3565_v43, %s4988_s30 }
 0x51c   : > { %v3446_v44 = vpop.permute.xlu1 %3445 }
 0x51d   : > { %3523 = vst.msk [vmem:[#allocation4 + $0x90] sm:$0xff] %vm1395_vm7, %v3446_v44  ;;  %v3256_v60 = vpop.permute.xlu0 %3255 }
 0x51e   : > { %3332 = vst.msk [vmem:[#allocation4 + $0x98] sm:$0xff] %vm1202_vm6, %v3256_v60  ;;  %4038 = vrot.lane.b32.xlu1 %v3948_v19, %s4993_s14 }
 0x51f   : > { %3848 = vrot.lane.b32.xlu0 %v3757_v22, %s4992_s11 }
 0x520   : > { %v3448_v48 = vpop.permute.xlu1 %3447  ;;  %v4130_v0 = vld [vmem:[#allocation4 + $0x80] sm:$0xff] }
 0x521   : > { %3524 = vst.msk [vmem:[#allocation4 + $0x98] sm:$0xff] %vm1395_vm7, %v3448_v48  ;;  %4904 = vmatprep.mubr.msk.f32.mxu1 %vm2049_vm11, %v4130_v0  ;;  %v4021_v36 = vpop.permute.xlu0 %4020 }
 0x522   : > { %4099 = vst.msk [vmem:[#allocation4 + $0x88] sm:$0xff] %vm1975_vm10, %v4021_v36  ;;  %3465 = vrot.lane.b32.xlu1 %v3948_v19, %s4990_s8 }
 0x523   : > { %3275 = vrot.lane.b32.xlu0 %v3757_v22, %s4989_s7 }
 0x524   : > { %v3066_v16 = vpop.permute.xlu1 %3065 }
 0x525   : > { %3141 = vst.msk [vmem:[#allocation4 + $0xa0] sm:$0xff] %vm1009_vm5, %v3066_v16  ;;  %v3639_v61 = vpop.permute.xlu0 %3638 }
 0x526   : > { %3716 = vst.msk [vmem:[#allocation4 + $0x90] sm:$0xff] %vm1589_vm8, %v3639_v61  ;;  %3467 = vrot.lane.b32.xlu1 %v3374_v26, %s4990_s8 }
 0x527   : > { %4040 = vrot.lane.b32.xlu0 %v3374_v26, %s4993_s14 }
 0x528   : > { %v3831_v21 = vpop.permute.xlu1 %3830 }
 0x529   : > { %3908 = vst.msk [vmem:[#allocation4 + $0x90] sm:$0xff] %vm1782_vm9, %v3831_v21  ;;  %v3641_v58 = vpop.permute.xlu0 %3640  ;;  %v4131_v4 = vld [vmem:[#allocation4 + $0x88] sm:$0xff] }
 0x52a   : > { %3717 = vst.msk [vmem:[#allocation4 + $0x98] sm:$0xff] %vm1589_vm8, %v3641_v58  ;;  %4905 = vmatmul.mubr.msk.f32.gmra.mrb[16].mxu1 %vm2049_vm11, %v4131_v4  ;;  %3085 = vrot.lane.b32.xlu1 %v2991_v17, %s4988_s30 }
 0x52b   : > { %3658 = vrot.lane.b32.xlu0 %v2991_v17, %s4991_s9  ;;  %v7640_v17 = vld [vmem:[#allocation8_spill] sm:$0xff] }
 0x52c   : > { %v3258_v41 = vpop.permute.xlu1 %3257 }
 0x52d   : > { %3333 = vst.msk [vmem:[#allocation4 + $0xa0] sm:$0xff] %vm1202_vm6, %v3258_v41  ;;  %v3068_v59 = vpop.permute.xlu0 %3067 }
 0x52e   : > { %3142 = vst.msk [vmem:[#allocation4 + $0xa8] sm:$0xff] %vm1009_vm5, %v3068_v59  ;;  %3850 = vrot.lane.b32.xlu1 %v3758_v24, %s4992_s11  ;;  %v7641_v59 = vld [vmem:[#allocation7_spill] sm:$0xff] }
 0x52f   : > { %3660 = vrot.lane.b32.xlu0 %v3567_v50, %s4991_s9 }
 0x530   : > { %v4023_v63 = vpop.permute.xlu1 %4022 }
 0x531   : > { %4100 = vst.msk [vmem:[#allocation4 + $0x90] sm:$0xff] %vm1975_vm10, %v4023_v63  ;;  %v3833_v42 = vpop.permute.xlu0 %3832 }
 0x532   : > { %3909 = vst.msk [vmem:[#allocation4 + $0x98] sm:$0xff] %vm1782_vm9, %v3833_v42  ;;  %3277 = vrot.lane.b32.xlu1 %v3758_v24, %s4989_s7 }
 0x533   : > { %3087 = vrot.lane.b32.xlu0 %v3567_v50, %s4988_s30 }
 0x534   : > { %v3450_v40 = vpop.permute.xlu1 %3449 }
 0x535   : > { %3525 = vst.msk [vmem:[#allocation4 + $0xa0] sm:$0xff] %vm1395_vm7, %v3450_v40  ;;  %v3260_v9 = vpop.permute.xlu0 %3259 }
 0x536   : > { %3334 = vst.msk [vmem:[#allocation4 + $0xa8] sm:$0xff] %vm1202_vm6, %v3260_v9  ;;  %4042 = vrot.lane.b32.xlu1 %v3950_v46, %s4993_s14 }
 0x537   : > { %3852 = vrot.lane.b32.xlu0 %v3759_v34, %s4992_s11 }
 0x538   : > { %v3452_v28 = vpop.permute.xlu1 %3451  ;;  %v4132_v49 = vld [vmem:[#allocation4 + $0x90] sm:$0xff] }
 0x539   : > { %3526 = vst.msk [vmem:[#allocation4 + $0xa8] sm:$0xff] %vm1395_vm7, %v3452_v28  ;;  %4907 = vmatprep.mubr.msk.f32.mxu1 %vm2049_vm11, %v4132_v49  ;;  %v4025_v32 = vpop.permute.xlu0 %4024 }
 0x53a   : > { %4101 = vst.msk [vmem:[#allocation4 + $0x98] sm:$0xff] %vm1975_vm10, %v4025_v32  ;;  %3469 = vrot.lane.b32.xlu1 %v3950_v46, %s4990_s8 }
 0x53b   : > { %3279 = vrot.lane.b32.xlu0 %v3759_v34, %s4989_s7 }
 0x53c   : > { %v3070_v29 = vpop.permute.xlu1 %3069 }
 0x53d   : > { %3143 = vst.msk [vmem:[#allocation4 + $0xb0] sm:$0xff] %vm1009_vm5, %v3070_v29  ;;  %v3643_v39 = vpop.permute.xlu0 %3642 }
 0x53e   : > { %3718 = vst.msk [vmem:[#allocation4 + $0xa0] sm:$0xff] %vm1589_vm8, %v3643_v39  ;;  %3471 = vrot.lane.b32.xlu1 %v3376_v47, %s4990_s8 }
 0x53f   : > { %4044 = vrot.lane.b32.xlu0 %v3376_v47, %s4993_s14 }
 0x540   : > { %v3835_v5 = vpop.permute.xlu1 %3834 }
 0x541   : > { %3910 = vst.msk [vmem:[#allocation4 + $0xa0] sm:$0xff] %vm1782_vm9, %v3835_v5  ;;  %v3645_v55 = vpop.permute.xlu0 %3644  ;;  %v4133_v54 = vld [vmem:[#allocation4 + $0x98] sm:$0xff] }
 0x542   : > { %3719 = vst.msk [vmem:[#allocation4 + $0xa8] sm:$0xff] %vm1589_vm8, %v3645_v55  ;;  %4908 = vmatmul.mubr.msk.f32.gmra.mrb[18].mxu1 %vm2049_vm11, %v4133_v54  ;;  %3664 = vrot.lane.b32.xlu1 %v3569_v14, %s4991_s9  ;;  %v7642_v54 = vld [vmem:[#allocation10_spill] sm:$0xff] }
 0x543   : > { %3662 = vrot.lane.b32.xlu0 %v3568_v23, %s4991_s9 }
 0x544   : > { %v3262_v20 = vpop.permute.xlu1 %3261 }
 0x545   : > { %3335 = vst.msk [vmem:[#allocation4 + $0xb0] sm:$0xff] %vm1202_vm6, %v3262_v20  ;;  %v3072_v15 = vpop.permute.xlu0 %3071  ;;  %v7643_v20 = vld [vmem:[#allocation9_spill] sm:$0xff] }
 0x546   : > { %3144 = vst.msk [vmem:[#allocation4 + $0xb8] sm:$0xff] %vm1009_vm5, %v3072_v15  ;;  %3856 = vrot.lane.b32.xlu1 %v3761_v56, %s4992_s11 }
 0x547   : > { %3854 = vrot.lane.b32.xlu0 %v3760_v31, %s4992_s11  ;;  %s7283_s11 = scalar_lea.vmem %s7482_s6, %s4712_s24 }
 0x548   : > { %v4027_v52 = vpop.permute.xlu1 %4026 }
 0x549   : > { %4102 = vst.msk [vmem:[#allocation4 + $0xa0] sm:$0xff] %vm1975_vm10, %v4027_v52  ;;  %v3837_v3 = vpop.permute.xlu0 %3836 }
 0x54a   : > { %3911 = vst.msk [vmem:[#allocation4 + $0xa8] sm:$0xff] %vm1782_vm9, %v3837_v3  ;;  %4048 = vrot.lane.b32.xlu1 %v3953_v18, %s4993_s14 }
 0x54b   : > { %4046 = vrot.lane.b32.xlu0 %v3952_v2, %s4993_s14 }
 0x54c   : > { %v3454_v27 = vpop.permute.xlu1 %3453 }
 0x54d   : > { %3527 = vst.msk [vmem:[#allocation4 + $0xb0] sm:$0xff] %vm1395_vm7, %v3454_v27  ;;  %v3264_v37 = vpop.permute.xlu0 %3263 }
 0x54e   : > { %3336 = vst.msk [vmem:[#allocation4 + $0xb8] sm:$0xff] %vm1202_vm6, %v3264_v37 }
 0x550   : > { %v3456_v6 = vpop.permute.xlu1 %3455  ;;  %v4134_v45 = vld [vmem:[#allocation4 + $0xa0] sm:$0xff] }
 0x551   : > { %3528 = vst.msk [vmem:[#allocation4 + $0xb8] sm:$0xff] %vm1395_vm7, %v3456_v6  ;;  %4910 = vmatprep.mubr.msk.f32.mxu1 %vm2049_vm11, %v4134_v45  ;;  %v4029_v53 = vpop.permute.xlu0 %4028 }
 0x552   : > { %4103 = vst.msk [vmem:[#allocation4 + $0xa8] sm:$0xff] %vm1975_vm10, %v4029_v53 }
 0x554   : > { %v3074_v12 = vpop.permute.xlu1 %3073  ;;  %v4882_v7 = vpop.f32.mrb[0].mxu1 }
 0x555   : > { %3145 = vst.msk [vmem:[#allocation4 + $0xc0] sm:$0xff] %vm1009_vm5, %v3074_v12  ;;  %v4330_v35 = vadd.f32 %v4882_v7, %v7271_v62  ;;  %v4324_v1 = vpop.f32.mrb[1].mxu1  ;;  %v3647_v13 = vpop.permute.xlu0 %3646 }
 0x556   : > { %v4325_v25 = vadd.f32 %v7271_v62, %v4324_v1  ;;  %3720 = vst.msk [vmem:[#allocation4 + $0xb0] sm:$0xff] %vm1589_vm8, %v3647_v13 }
 0x557   : > { %v4484_v11 = vadd.f32 %v4330_v35, %v7638_v57 }
 0x558   : > { %v4483_v51 = vadd.f32 %v4325_v25, %v7639_v10  ;;  %v3839_v30 = vpop.permute.xlu1 %3838  ;;  %v7644_v10 = vld [vmem:[#allocation12_spill] sm:$0xff] }
 0x559   : > { %v4516_v33 = vmax.f32 %v4484_v11, 0.0  ;;  %3912 = vst.msk [vmem:[#allocation4 + $0xb0] sm:$0xff] %vm1782_vm9, %v3839_v30  ;;  %v3649_v43 = vpop.permute.xlu0 %3648  ;;  %v4135_v8 = vld [vmem:[#allocation4 + $0xa8] sm:$0xff]  ;;  %v7645_v30 = vld [vmem:[#allocation11_spill] sm:$0xff] }
 0x55a   : > { %v4515_v38 = vmax.f32 %v4483_v51, 0.0  ;;  %3721 = vst.msk [vmem:[#allocation4 + $0xb8] sm:$0xff] %vm1589_vm8, %v3649_v43  ;;  %4911 = vmatmul.mubr.msk.f32.gmra.mrb[20].mxu1 %vm2049_vm11, %v4135_v8 }
 0x55b   : > { %4548 = vst.msk [vmem:[%s7283_s11 + $0x8] sm:$0xff] %vm252_vm0, %v4516_v33 }
 0x55c   : > { %4547 = vst.msk [vmem:[%s7283_s11] sm:$0xff] %vm252_vm0, %v4515_v38  ;;  %v3266_v44 = vpop.permute.xlu1 %3265 }
 0x55d   : > { %3337 = vst.msk [vmem:[#allocation4 + $0xc0] sm:$0xff] %vm1202_vm6, %v3266_v44  ;;  %v3076_v60 = vpop.permute.xlu0 %3075 }
 0x55e   : > { %3146 = vst.msk [vmem:[#allocation4 + $0xc8] sm:$0xff] %vm1009_vm5, %v3076_v60 }
 0x560   : > { %v4031_v19 = vpop.permute.xlu1 %4030 }
 0x561   : > { %4104 = vst.msk [vmem:[#allocation4 + $0xb0] sm:$0xff] %vm1975_vm10, %v4031_v19  ;;  %v3841_v22 = vpop.permute.xlu0 %3840 }
 0x562   : > { %3913 = vst.msk [vmem:[#allocation4 + $0xb8] sm:$0xff] %vm1782_vm9, %v3841_v22 }
 0x564   : > { %v3458_v48 = vpop.permute.xlu1 %3457 }
 0x565   : > { %3529 = vst.msk [vmem:[#allocation4 + $0xc0] sm:$0xff] %vm1395_vm7, %v3458_v48  ;;  %v3268_v0 = vpop.permute.xlu0 %3267 }
 0x566   : > { %3338 = vst.msk [vmem:[#allocation4 + $0xc8] sm:$0xff] %vm1202_vm6, %v3268_v0 }
 0x568   : > { %v3460_v36 = vpop.permute.xlu1 %3459  ;;  %v4885_v16 = vpop.f32.mrb[2].mxu1  ;;  %v4136_v61 = vld [vmem:[#allocation4 + $0xb0] sm:$0xff] }
 0x569   : > { %3530 = vst.msk [vmem:[#allocation4 + $0xc8] sm:$0xff] %vm1395_vm7, %v3460_v36  ;;  %v4340_v26 = vadd.f32 %v4885_v16, %v7271_v62  ;;  %v4334_v21 = vpop.f32.mrb[3].mxu1  ;;  %4913 = vmatprep.mubr.msk.f32.mxu1 %vm2049_vm11, %v4136_v61  ;;  %v4033_v58 = vpop.permute.xlu0 %4032 }
 0x56a   : > { %v4335_v4 = vadd.f32 %v7271_v62, %v4334_v21  ;;  %4105 = vst.msk [vmem:[#allocation4 + $0xb8] sm:$0xff] %vm1975_vm10, %v4033_v58 }
 0x56b   : > { %v4486_v41 = vadd.f32 %v4340_v26, %v7640_v17 }
 0x56c   : > { %v4485_v24 = vadd.f32 %v4335_v4, %v7641_v59  ;;  %v3078_v50 = vpop.permute.xlu1 %3077  ;;  %v7646_v59 = vld [vmem:[#allocation14_spill] sm:$0xff] }
 0x56d   : > { %v4518_v63 = vmax.f32 %v4486_v41, 0.0  ;;  %3147 = vst.msk [vmem:[#allocation4 + $0xd0] sm:$0xff] %vm1009_vm5, %v3078_v50  ;;  %v3651_v42 = vpop.permute.xlu0 %3650  ;;  %v7647_v50 = vld [vmem:[#allocation13_spill] sm:$0xff] }
 0x56e   : > { %v4517_v40 = vmax.f32 %v4485_v24, 0.0  ;;  %3722 = vst.msk [vmem:[#allocation4 + $0xc0] sm:$0xff] %vm1589_vm8, %v3651_v42 }
 0x56f   : > { %4550 = vst.msk [vmem:[%s7283_s11 + $0x18] sm:$0xff] %vm252_vm0, %v4518_v63 }
 0x570   : > { %4549 = vst.msk [vmem:[%s7283_s11 + $0x10] sm:$0xff] %vm252_vm0, %v4517_v40  ;;  %v3843_v9 = vpop.permute.xlu1 %3842 }
 0x571   : > { %3914 = vst.msk [vmem:[#allocation4 + $0xc0] sm:$0xff] %vm1782_vm9, %v3843_v9  ;;  %v3653_v46 = vpop.permute.xlu0 %3652  ;;  %v4137_v34 = vld [vmem:[#allocation4 + $0xb8] sm:$0xff] }
 0x572   : > { %3723 = vst.msk [vmem:[#allocation4 + $0xc8] sm:$0xff] %vm1589_vm8, %v3653_v46  ;;  %4914 = vmatmul.mubr.msk.f32.gmra.mrb[22].mxu1 %vm2049_vm11, %v4137_v34 }
 0x574   : > { %v3270_v28 = vpop.permute.xlu1 %3269 }
 0x575   : > { %3339 = vst.msk [vmem:[#allocation4 + $0xd0] sm:$0xff] %vm1202_vm6, %v3270_v28  ;;  %v3080_v49 = vpop.permute.xlu0 %3079 }
 0x576   : > { %3148 = vst.msk [vmem:[#allocation4 + $0xd8] sm:$0xff] %vm1009_vm5, %v3080_v49 }
 0x578   : > { %v4035_v32 = vpop.permute.xlu1 %4034 }
 0x579   : > { %4106 = vst.msk [vmem:[#allocation4 + $0xc0] sm:$0xff] %vm1975_vm10, %v4035_v32  ;;  %v3845_v29 = vpop.permute.xlu0 %3844 }
 0x57a   : > { %3915 = vst.msk [vmem:[#allocation4 + $0xc8] sm:$0xff] %vm1782_vm9, %v3845_v29 }
 0x57c   : > { %v3462_v39 = vpop.permute.xlu1 %3461  ;;  %v4888_v47 = vpop.f32.mrb[4].mxu1 }
 0x57d   : > { %3531 = vst.msk [vmem:[#allocation4 + $0xd0] sm:$0xff] %vm1395_vm7, %v3462_v39  ;;  %v4350_v14 = vadd.f32 %v4888_v47, %v7271_v62  ;;  %v4344_v5 = vpop.f32.mrb[5].mxu1  ;;  %v3272_v23 = vpop.permute.xlu0 %3271 }
 0x57e   : > { %v4345_v55 = vadd.f32 %v7271_v62, %v4344_v5  ;;  %3340 = vst.msk [vmem:[#allocation4 + $0xd8] sm:$0xff] %vm1202_vm6, %v3272_v23 }
 0x57f   : > { %v4488_v56 = vadd.f32 %v4350_v14, %v7642_v54 }
 0x580   : > { %v4487_v31 = vadd.f32 %v4345_v55, %v7643_v20  ;;  %v3464_v15 = vpop.permute.xlu1 %3463  ;;  %v4138_v18 = vld [vmem:[#allocation4 + $0xc0] sm:$0xff] }
 0x581   : > { %v4520_v52 = vmax.f32 %v4488_v56, 0.0  ;;  %3532 = vst.msk [vmem:[#allocation4 + $0xd8] sm:$0xff] %vm1395_vm7, %v3464_v15  ;;  %4916 = vmatprep.mubr.msk.f32.mxu1 %vm2049_vm11, %v4138_v18  ;;  %v4037_v2 = vpop.permute.xlu0 %4036  ;;  %v7649_v18 = vld [vmem:[#allocation15_spill] sm:$0xff] }
 0x582   : > { %v4519_v3 = vmax.f32 %v4487_v31, 0.0  ;;  %4107 = vst.msk [vmem:[#allocation4 + $0xc8] sm:$0xff] %vm1975_vm10, %v4037_v2  ;;  %v7648_v31 = vld [vmem:[#allocation16_spill] sm:$0xff] }
 0x583   : > { %4552 = vst.msk [vmem:[%s7283_s11 + $0x28] sm:$0xff] %vm252_vm0, %v4520_v52 }
 0x584   : > { %4551 = vst.msk [vmem:[%s7283_s11 + $0x20] sm:$0xff] %vm252_vm0, %v4519_v3  ;;  %v3082_v27 = vpop.permute.xlu1 %3081 }
 0x585   : > { %3149 = vst.msk [vmem:[#allocation4 + $0xe0] sm:$0xff] %vm1009_vm5, %v3082_v27  ;;  %v3655_v37 = vpop.permute.xlu0 %3654 }
 0x586   : > { %3724 = vst.msk [vmem:[#allocation4 + $0xd0] sm:$0xff] %vm1589_vm8, %v3655_v37 }
 0x588   : > { %v3847_v6 = vpop.permute.xlu1 %3846 }
 0x589   : > { %3916 = vst.msk [vmem:[#allocation4 + $0xd0] sm:$0xff] %vm1782_vm9, %v3847_v6  ;;  %v3657_v45 = vpop.permute.xlu0 %3656  ;;  %v4139_v53 = vld [vmem:[#allocation4 + $0xc8] sm:$0xff] }
 0x58a   : > { %3725 = vst.msk [vmem:[#allocation4 + $0xd8] sm:$0xff] %vm1589_vm8, %v3657_v45  ;;  %4917 = vmatmul.mubr.msk.f32.gmra.mrb[24].mxu1 %vm2049_vm11, %v4139_v53 }
 0x58c   : > { %v3274_v12 = vpop.permute.xlu1 %3273 }
 0x58d   : > { %3341 = vst.msk [vmem:[#allocation4 + $0xe0] sm:$0xff] %vm1202_vm6, %v3274_v12  ;;  %v3084_v7 = vpop.permute.xlu0 %3083 }
 0x58e   : > { %3150 = vst.msk [vmem:[#allocation4 + $0xe8] sm:$0xff] %vm1009_vm5, %v3084_v7 }
 0x590   : > { %v4039_v35 = vpop.permute.xlu1 %4038  ;;  %v4891_v1 = vpop.f32.mrb[6].mxu1 }
 0x591   : > { %4108 = vst.msk [vmem:[#allocation4 + $0xd0] sm:$0xff] %vm1975_vm10, %v4039_v35  ;;  %v4360_v13 = vadd.f32 %v4891_v1, %v7271_v62  ;;  %v4354_v25 = vpop.f32.mrb[7].mxu1  ;;  %v3849_v57 = vpop.permute.xlu0 %3848  ;;  %v7650_v1 = vld [vmem:[#allocation18_spill] sm:$0xff] }
 0x592   : > { %v4355_v11 = vadd.f32 %v7271_v62, %v4354_v25  ;;  %3917 = vst.msk [vmem:[#allocation4 + $0xd8] sm:$0xff] %vm1782_vm9, %v3849_v57  ;;  %v7651_v25 = vld [vmem:[#allocation17_spill] sm:$0xff] }
 0x593   : > { %v4490_v51 = vadd.f32 %v4360_v13, %v7644_v10 }
 0x594   : > { %v4489_v33 = vadd.f32 %v4355_v11, %v7645_v30  ;;  %v3466_v43 = vpop.permute.xlu1 %3465 }
 0x595   : > { %v4522_v8 = vmax.f32 %v4490_v51, 0.0  ;;  %3533 = vst.msk [vmem:[#allocation4 + $0xe0] sm:$0xff] %vm1395_vm7, %v3466_v43  ;;  %v3276_v38 = vpop.permute.xlu0 %3275 }
 0x596   : > { %v4521_v44 = vmax.f32 %v4489_v33, 0.0  ;;  %3342 = vst.msk [vmem:[#allocation4 + $0xe8] sm:$0xff] %vm1202_vm6, %v3276_v38 }
 0x597   : > { %4554 = vst.msk [vmem:[%s7283_s11 + $0x38] sm:$0xff] %vm252_vm0, %v4522_v8  ;;  %v7652_v8 = vld [vmem:[#allocation20_spill] sm:$0xff] }
 0x598   : > { %4553 = vst.msk [vmem:[%s7283_s11 + $0x30] sm:$0xff] %vm252_vm0, %v4521_v44  ;;  %v3468_v60 = vpop.permute.xlu1 %3467  ;;  %v4140_v19 = vld [vmem:[#allocation4 + $0xd0] sm:$0xff] }
 0x599   : > { %3534 = vst.msk [vmem:[#allocation4 + $0xe8] sm:$0xff] %vm1395_vm7, %v3468_v60  ;;  %4919 = vmatprep.mubr.msk.f32.mxu1 %vm2049_vm11, %v4140_v19  ;;  %v4041_v22 = vpop.permute.xlu0 %4040  ;;  %v7653_v44 = vld [vmem:[#allocation19_spill] sm:$0xff] }
 0x59a   : > { %4109 = vst.msk [vmem:[#allocation4 + $0xd8] sm:$0xff] %vm1975_vm10, %v4041_v22 }
 0x59c   : > { %v3086_v48 = vpop.permute.xlu1 %3085 }
 0x59d   : > { %3151 = vst.msk [vmem:[#allocation4 + $0xf0] sm:$0xff] %vm1009_vm5, %v3086_v48  ;;  %v3659_v0 = vpop.permute.xlu0 %3658 }
 0x59e   : > { %3726 = vst.msk [vmem:[#allocation4 + $0xe0] sm:$0xff] %vm1589_vm8, %v3659_v0 }
 0x5a0   : > { %v3851_v36 = vpop.permute.xlu1 %3850 }
 0x5a1   : > { %3918 = vst.msk [vmem:[#allocation4 + $0xe0] sm:$0xff] %vm1782_vm9, %v3851_v36  ;;  %v3661_v16 = vpop.permute.xlu0 %3660  ;;  %v4141_v61 = vld [vmem:[#allocation4 + $0xd8] sm:$0xff] }
 0x5a2   : > { %3727 = vst.msk [vmem:[#allocation4 + $0xe8] sm:$0xff] %vm1589_vm8, %v3661_v16  ;;  %4920 = vmatmul.mubr.msk.f32.gmra.mrb[26].mxu1 %vm2049_vm11, %v4141_v61  ;;  %v7654_v61 = vld [vmem:[#allocation22_spill] sm:$0xff] }
 0x5a4   : > { %v4894_v26 = vpop.f32.mrb[8].mxu1  ;;  %v3278_v21 = vpop.permute.xlu1 %3277 }
 0x5a5   : > { %v4370_v58 = vadd.f32 %v4894_v26, %v7271_v62  ;;  %3343 = vst.msk [vmem:[#allocation4 + $0xf0] sm:$0xff] %vm1202_vm6, %v3278_v21  ;;  %v4364_v4 = vpop.f32.mrb[9].mxu1  ;;  %v3088_v17 = vpop.permute.xlu0 %3087  ;;  %v7655_v21 = vld [vmem:[#allocation21_spill] sm:$0xff] }
 0x5a6   : > { %v4365_v41 = vadd.f32 %v7271_v62, %v4364_v4  ;;  %3152 = vst.msk [vmem:[#allocation4 + $0xf8] sm:$0xff] %vm1009_vm5, %v3088_v17 }
 0x5a7   : > { %v4492_v24 = vadd.f32 %v4370_v58, %v7646_v59 }
 0x5a8   : > { %v4491_v63 = vadd.f32 %v4365_v41, %v7647_v50  ;;  %v4043_v42 = vpop.permute.xlu1 %4042 }
 0x5a9   : > { %v4524_v40 = vmax.f32 %v4492_v24, 0.0  ;;  %4110 = vst.msk [vmem:[#allocation4 + $0xe0] sm:$0xff] %vm1975_vm10, %v4043_v42  ;;  %v3853_v9 = vpop.permute.xlu0 %3852 }
 0x5aa   : > { %v4523_v46 = vmax.f32 %v4491_v63, 0.0  ;;  %3919 = vst.msk [vmem:[#allocation4 + $0xe8] sm:$0xff] %vm1782_vm9, %v3853_v9  ;;  %v7656_v63 = vld [vmem:[#allocation24_spill] sm:$0xff] }
 0x5ab   : > { %4556 = vst.msk [vmem:[%s7283_s11 + $0x48] sm:$0xff] %vm252_vm0, %v4524_v40  ;;  %v7657_v40 = vld [vmem:[#allocation23_spill] sm:$0xff] }
 0x5ac   : > { %4555 = vst.msk [vmem:[%s7283_s11 + $0x40] sm:$0xff] %vm252_vm0, %v4523_v46  ;;  %v3470_v34 = vpop.permute.xlu1 %3469 }
 0x5ad   : > { %3535 = vst.msk [vmem:[#allocation4 + $0xf0] sm:$0xff] %vm1395_vm7, %v3470_v34  ;;  %v3280_v28 = vpop.permute.xlu0 %3279 }
 0x5ae   : > { %3344 = vst.msk [vmem:[#allocation4 + $0xf8] sm:$0xff] %vm1202_vm6, %v3280_v28 }
 0x5b0   : > { %v3472_v49 = vpop.permute.xlu1 %3471  ;;  %v4142_v32 = vld [vmem:[#allocation4 + $0xe0] sm:$0xff] }
 0x5b1   : > { %3536 = vst.msk [vmem:[#allocation4 + $0xf8] sm:$0xff] %vm1395_vm7, %v3472_v49  ;;  %v4045_v29 = vpop.permute.xlu0 %4044  ;;  %4922 = vmatprep.mubr.msk.f32.mxu1 %vm2049_vm11, %v4142_v32 }
 0x5b2   : > { %4111 = vst.msk [vmem:[#allocation4 + $0xe8] sm:$0xff] %vm1975_vm10, %v4045_v29 }
 0x5b4   : > { %v3665_v39 = vpop.permute.xlu1 %3664 }
 0x5b5   : > { %v3663_v47 = vpop.permute.xlu0 %3662  ;;  %3729 = vst.msk [vmem:[#allocation4 + $0xf8] sm:$0xff] %vm1589_vm8, %v3665_v39  ;;  %v7658_v39 = vld [vmem:[#allocation26_spill] sm:$0xff] }
 0x5b6   : > { %3728 = vst.msk [vmem:[#allocation4 + $0xf0] sm:$0xff] %vm1589_vm8, %v3663_v47 }
 0x5b8   : > { %v4897_v14 = vpop.f32.mrb[10].mxu1  ;;  %v3857_v5 = vpop.permute.xlu1 %3856 }
 0x5b9   : > { %v4380_v23 = vadd.f32 %v4897_v14, %v7271_v62  ;;  %v4374_v55 = vpop.f32.mrb[11].mxu1  ;;  %v3855_v54 = vpop.permute.xlu0 %3854  ;;  %v4143_v56 = vld [vmem:[#allocation4 + $0xe8] sm:$0xff]  ;;  %3921 = vst.msk [vmem:[#allocation4 + $0xf8] sm:$0xff] %vm1782_vm9, %v3857_v5  ;;  %v7659_v14 = vld [vmem:[#allocation25_spill] sm:$0xff] }
 0x5ba   : > { %v4375_v20 = vadd.f32 %v7271_v62, %v4374_v55  ;;  %3920 = vst.msk [vmem:[#allocation4 + $0xf0] sm:$0xff] %vm1782_vm9, %v3855_v54  ;;  %4923 = vmatmul.mubr.msk.f32.gmra.mrb[28].mxu1 %vm2049_vm11, %v4143_v56 }
 0x5bb   : > { %v4494_v15 = vadd.f32 %v4380_v23, %v7648_v31 }
 0x5bc   : > { %v4493_v52 = vadd.f32 %v4375_v20, %v7649_v18  ;;  %v4049_v2 = vpop.permute.xlu1 %4048 }
 0x5bd   : > { %v4526_v3 = vmax.f32 %v4494_v15, 0.0  ;;  %v4047_v27 = vpop.permute.xlu0 %4046  ;;  %4113 = vst.msk [vmem:[#allocation4 + $0xf8] sm:$0xff] %vm1975_vm10, %v4049_v2  ;;  %v7660_v15 = vld [vmem:[#allocation28_spill] sm:$0xff] }
 0x5be   : > { %v4525_v37 = vmax.f32 %v4493_v52, 0.0  ;;  %4112 = vst.msk [vmem:[#allocation4 + $0xf0] sm:$0xff] %vm1975_vm10, %v4047_v27  ;;  %v7661_v52 = vld [vmem:[#allocation27_spill] sm:$0xff] }
 0x5bf   : > { %4558 = vst.msk [vmem:[%s7283_s11 + $0x58] sm:$0xff] %vm252_vm0, %v4526_v3 }
 0x5c0   : > { %4557 = vst.msk [vmem:[%s7283_s11 + $0x50] sm:$0xff] %vm252_vm0, %v4525_v37 }
 0x5c4   : > { %v4145_v6 = vld [vmem:[#allocation4 + $0xf8] sm:$0xff] }
 0x5c5   : > { %v4144_v45 = vld [vmem:[#allocation4 + $0xf0] sm:$0xff] }
 0x5c6   : > { %4925 = vmatprep.mubr.msk.f32.mxu1 %vm2049_vm11, %v4144_v45 }
 0x5c7   : > { %4926 = vmatmul.mubr.msk.f32.gmra.mrb[30].mxu1 %vm2049_vm11, %v4145_v6 }
 0x5cc   : > { %v4900_v53 = vpop.f32.mrb[12].mxu1 }
 0x5cd   : > { %v4390_v12 = vadd.f32 %v4900_v53, %v7271_v62  ;;  %v4384_v7 = vpop.f32.mrb[13].mxu1 }
 0x5ce   : > { %v4385_v35 = vadd.f32 %v7271_v62, %v4384_v7 }
 0x5cf   : > { %v4496_v13 = vadd.f32 %v4390_v12, %v7650_v1  ;;  %v7662_v12 = vld [vmem:[#allocation30_spill] sm:$0xff] }
 0x5d0   : > { %v4495_v57 = vadd.f32 %v4385_v35, %v7651_v25  ;;  %v7663_v35 = vld [vmem:[#allocation29_spill] sm:$0xff] }
 0x5d1   : > { %v4528_v11 = vmax.f32 %v4496_v13, 0.0 }
 0x5d2   : > { %v4527_v10 = vmax.f32 %v4495_v57, 0.0 }
 0x5d3   : > { %4560 = vst.msk [vmem:[%s7283_s11 + $0x68] sm:$0xff] %vm252_vm0, %v4528_v11 }
 0x5d4   : > { %4559 = vst.msk [vmem:[%s7283_s11 + $0x60] sm:$0xff] %vm252_vm0, %v4527_v10 }
 0x5e5   : > { %v4903_v51 = vpop.f32.mrb[14].mxu1 }
 0x5e6   : > { %v4400_v30 = vadd.f32 %v4903_v51, %v7271_v62  ;;  %v4394_v33 = vpop.f32.mrb[15].mxu1 }
 0x5e7   : > { %v4395_v43 = vadd.f32 %v7271_v62, %v4394_v33 }
 0x5e8   : > { %v4498_v38 = vadd.f32 %v4400_v30, %v7652_v8  ;;  %v7664_v30 = vld [vmem:[#allocation32_spill] sm:$0xff] }
 0x5e9   : > { %v4497_v60 = vadd.f32 %v4395_v43, %v7653_v44  ;;  %v7665_v43 = vld [vmem:[#allocation31_spill] sm:$0xff] }
 0x5ea   : > { %v4530_v19 = vmax.f32 %v4498_v38, 0.0 }
 0x5eb   : > { %v4529_v22 = vmax.f32 %v4497_v60, 0.0 }
 0x5ec   : > { %4562 = vst.msk [vmem:[%s7283_s11 + $0x78] sm:$0xff] %vm252_vm0, %v4530_v19 }
 0x5ed   : > { %4561 = vst.msk [vmem:[%s7283_s11 + $0x70] sm:$0xff] %vm252_vm0, %v4529_v22 }
 0x5fd   : > { %v4906_v48 = vpop.f32.mrb[16].mxu1 }
 0x5fe   : > { %v4410_v0 = vadd.f32 %v4906_v48, %v7271_v62  ;;  %v4404_v36 = vpop.f32.mrb[17].mxu1 }
 0x5ff   : > { %v4405_v16 = vadd.f32 %v7271_v62, %v4404_v36 }
 0x600   : > { %v4500_v26 = vadd.f32 %v4410_v0, %v7654_v61  ;;  %v7666_v0 = vld [vmem:[#allocation34_spill] sm:$0xff] }
 0x601   : > { %v4499_v58 = vadd.f32 %v4405_v16, %v7655_v21  ;;  %v7667_v16 = vld [vmem:[#allocation33_spill] sm:$0xff] }
 0x602   : > { %v4532_v4 = vmax.f32 %v4500_v26, 0.0 }
 0x603   : > { %v4531_v17 = vmax.f32 %v4499_v58, 0.0 }
 0x604   : > { %4564 = vst.msk [vmem:[%s7283_s11 + $0x88] sm:$0xff] %vm252_vm0, %v4532_v4 }
 0x605   : > { %4563 = vst.msk [vmem:[%s7283_s11 + $0x80] sm:$0xff] %vm252_vm0, %v4531_v17 }
 0x615   : > { %v4909_v41 = vpop.f32.mrb[18].mxu1 }
 0x616   : > { %v4420_v59 = vadd.f32 %v4909_v41, %v7271_v62  ;;  %v4414_v24 = vpop.f32.mrb[19].mxu1 }
 0x617   : > { %v4415_v50 = vadd.f32 %v7271_v62, %v4414_v24 }
 0x618   : > { %v4502_v42 = vadd.f32 %v4420_v59, %v7656_v63  ;;  %v7668_v59 = vld [vmem:[#allocation38_spill] sm:$0xff] }
 0x619   : > { %v4501_v9 = vadd.f32 %v4415_v50, %v7657_v40  ;;  %v7669_v50 = vld [vmem:[#allocation36_spill] sm:$0xff] }
 0x61a   : > { %v4534_v46 = vmax.f32 %v4502_v42, 0.0 }
 0x61b   : > { %v4533_v34 = vmax.f32 %v4501_v9, 0.0 }
 0x61c   : > { %4566 = vst.msk [vmem:[%s7283_s11 + $0x98] sm:$0xff] %vm252_vm0, %v4534_v46 }
 0x61d   : > { %4565 = vst.msk [vmem:[%s7283_s11 + $0x90] sm:$0xff] %vm252_vm0, %v4533_v34 }
 0x62d   : > { %v4912_v28 = vpop.f32.mrb[20].mxu1 }
 0x62e   : > { %v4430_v49 = vadd.f32 %v4912_v28, %v7271_v62  ;;  %v4424_v32 = vpop.f32.mrb[21].mxu1 }
 0x62f   : > { %v4425_v29 = vadd.f32 %v7271_v62, %v4424_v32 }
 0x630   : > { %v4504_v47 = vadd.f32 %v4430_v49, %v7658_v39 }
 0x631   : > { %v4503_v5 = vadd.f32 %v4425_v29, %v7659_v14 }
 0x632   : > { %v4536_v23 = vmax.f32 %v4504_v47, 0.0 }
 0x633   : > { %v4535_v55 = vmax.f32 %v4503_v5, 0.0 }
 0x634   : > { %4568 = vst.msk [vmem:[%s7283_s11 + $0xa8] sm:$0xff] %vm252_vm0, %v4536_v23 }
 0x635   : > { %4567 = vst.msk [vmem:[%s7283_s11 + $0xa0] sm:$0xff] %vm252_vm0, %v4535_v55 }
 0x645   : > { %v4915_v54 = vpop.f32.mrb[22].mxu1 }
 0x646   : > { %v4440_v56 = vadd.f32 %v4915_v54, %v7271_v62  ;;  %v4434_v20 = vpop.f32.mrb[23].mxu1 }
 0x647   : > { %v4435_v31 = vadd.f32 %v7271_v62, %v4434_v20 }
 0x648   : > { %v4506_v18 = vadd.f32 %v4440_v56, %v7660_v15 }
 0x649   : > { %v4505_v2 = vadd.f32 %v4435_v31, %v7661_v52 }
 0x64a   : > { %v4538_v3 = vmax.f32 %v4506_v18, 0.0 }
 0x64b   : > { %v4537_v27 = vmax.f32 %v4505_v2, 0.0 }
 0x64c   : > { %4570 = vst.msk [vmem:[%s7283_s11 + $0xb8] sm:$0xff] %vm252_vm0, %v4538_v3 }
 0x64d   : > { %4569 = vst.msk [vmem:[%s7283_s11 + $0xb0] sm:$0xff] %vm252_vm0, %v4537_v27 }
 0x65d   : > { %v4918_v37 = vpop.f32.mrb[24].mxu1 }
 0x65e   : > { %v4450_v6 = vadd.f32 %v4918_v37, %v7271_v62  ;;  %v4444_v45 = vpop.f32.mrb[25].mxu1 }
 0x65f   : > { %v4445_v53 = vadd.f32 %v7271_v62, %v4444_v45 }
 0x660   : > { %v4508_v7 = vadd.f32 %v4450_v6, %v7662_v12 }
 0x661   : > { %v4507_v1 = vadd.f32 %v4445_v53, %v7663_v35 }
 0x662   : > { %v4540_v13 = vmax.f32 %v4508_v7, 0.0 }
 0x663   : > { %v4539_v25 = vmax.f32 %v4507_v1, 0.0 }
 0x664   : > { %4572 = vst.msk [vmem:[%s7283_s11 + $0xc8] sm:$0xff] %vm252_vm0, %v4540_v13 }
 0x665   : > { %4571 = vst.msk [vmem:[%s7283_s11 + $0xc0] sm:$0xff] %vm252_vm0, %v4539_v25 }
 0x675   : > { %v4921_v57 = vpop.f32.mrb[26].mxu1 }
 0x676   : > { %v4460_v11 = vadd.f32 %v4921_v57, %v7271_v62  ;;  %v4454_v10 = vpop.f32.mrb[27].mxu1 }
 0x677   : > { %v4455_v51 = vadd.f32 %v7271_v62, %v4454_v10 }
 0x678   : > { %v4510_v33 = vadd.f32 %v4460_v11, %v7664_v30 }
 0x679   : > { %v4509_v8 = vadd.f32 %v4455_v51, %v7665_v43 }
 0x67a   : > { %v4542_v38 = vmax.f32 %v4510_v33, 0.0 }
 0x67b   : > { %v4541_v44 = vmax.f32 %v4509_v8, 0.0 }
 0x67c   : > { %4574 = vst.msk [vmem:[%s7283_s11 + $0xd8] sm:$0xff] %vm252_vm0, %v4542_v38 }
 0x67d   : > { %4573 = vst.msk [vmem:[%s7283_s11 + $0xd0] sm:$0xff] %vm252_vm0, %v4541_v44 }
 0x68d   : > { %v4924_v60 = vpop.f32.mrb[28].mxu1 }
 0x68e   : > { %v4470_v19 = vadd.f32 %v4924_v60, %v7271_v62  ;;  %v4464_v22 = vpop.f32.mrb[29].mxu1 }
 0x68f   : > { %v4465_v48 = vadd.f32 %v7271_v62, %v4464_v22 }
 0x690   : > { %v4512_v36 = vadd.f32 %v4470_v19, %v7666_v0 }
 0x691   : > { %v4511_v61 = vadd.f32 %v4465_v48, %v7667_v16 }
 0x692   : > { %v4544_v26 = vmax.f32 %v4512_v36, 0.0 }
 0x693   : > { %v4543_v21 = vmax.f32 %v4511_v61, 0.0 }
 0x694   : > { %4576 = vst.msk [vmem:[%s7283_s11 + $0xe8] sm:$0xff] %vm252_vm0, %v4544_v26 }
 0x695   : > { %4575 = vst.msk [vmem:[%s7283_s11 + $0xe0] sm:$0xff] %vm252_vm0, %v4543_v21 }
 0x69a   : > { %v4927_v58 = vpop.f32.mrb[30].mxu1 }
 0x69b   : > { %v4480_v4 = vadd.f32 %v4927_v58, %v7271_v62  ;;  %v4474_v17 = vpop.f32.mrb[31].mxu1 }
 0x69c   : > { %v4475_v41 = vadd.f32 %v7271_v62, %v4474_v17 }
 0x69d   : > { %v4514_v24 = vadd.f32 %v4480_v4, %v7668_v59 }
 0x69e   : > { %v4513_v63 = vadd.f32 %v4475_v41, %v7669_v50 }
 0x69f   : > { %v4546_v42 = vmax.f32 %v4514_v24, 0.0 }
 0x6a0   : > { %v4545_v40 = vmax.f32 %v4513_v63, 0.0 }
 0x6a1   : > { %4578 = vst.msk [vmem:[%s7283_s11 + $0xf8] sm:$0xff] %vm252_vm0, %v4546_v42 }
 0x6a2   : > { %4577 = vst.msk [vmem:[%s7283_s11 + $0xf0] sm:$0xff] %vm252_vm0, %v4545_v40 }
 0x6a3 PF: > { %s16_s21 = sadd.s32 1, %s4983_s21  }
 0x6a4   : > { %p13_p4 = scmp.ge.s32.totalorder %s16_s21, 4  }
 0x6a6   :  { %15 = sbr.rel (!%p13_p4) target bundleno = 1 (0x1), region = 80 }

</bundles_post_ra>
